<compile_context>
chip_gen: v7x
topology: tpu7x:2x2x1
jax: 0.10.0
libtpu: 0.0.40
codegen_flags: <defaults>
</compile_context>

<pallas_src>
import math

import jax
import jax.numpy as jnp
from jax import lax
from jax.experimental import pallas as pl
from jax.experimental.pallas import tpu as pltpu


# ----------------------------------------------------------------------------
# Fused kernel: (all timesteps x all layers) recurrence + end_conv decoder
# ----------------------------------------------------------------------------
def make_fused_gru_kernel(num_layers, hidden, t_block):
    """Ref layout (closure over L = num_layers):
      inputs : x_blk, wx[0..L-1], wh[0..L-1], bias_x[0..L-1], bh_n[0..L-1],
               end_w, end_b
      outputs: out
      scratch: h[0..L-1]   (per-layer VMEM-resident hidden state, f32)
    """
    L, H, Tt = num_layers, hidden, t_block

    def kernel(*refs):
        idx = 0
        x_ref = refs[idx]; idx += 1                    # [Tt, Mblk, Din] bf16 (streamed)
        wx_refs = refs[idx:idx + L]; idx += L          # [Din_l, 3H] bf16 (resident)
        wh_refs = refs[idx:idx + L]; idx += L          # [H, 3H]     bf16 (resident)
        bx_refs = refs[idx:idx + L]; idx += L          # [1, 3H] f32  (bx + bh for r,i)
        bhn_refs = refs[idx:idx + L]; idx += L         # [1, H]  f32  (bh_n only)
        end_w_ref = refs[idx]; idx += 1                # [H, O] bf16
        end_b_ref = refs[idx]; idx += 1                # [1, O] f32
        out_ref = refs[idx]; idx += 1                  # [Mblk, O] f32
        h_refs = refs[idx:idx + L]                     # [Mblk, H] f32 scratch

        tb = pl.program_id(1)

        @pl.when(tb == 0)
        def _init():  # init_hidden_state -> zeros, once per M-block
            for h_ref in h_refs:
                h_ref[...] = jnp.zeros_like(h_ref)

        def step(t, carry):
            x = x_ref[t]                               # [Mblk, Din] bf16
            for l in range(L):
                h_prev = h_refs[l][...]                # f32
                # gx carries the folded (bx_r+bh_r, bx_i+bh_i, bx_n) bias.
                gx = (
                    jnp.dot(x, wx_refs[l][...], preferred_element_type=jnp.float32)
                    + bx_refs[l][...]
                )
                gh = jnp.dot(
                    h_prev.astype(jnp.bfloat16), wh_refs[l][...],
                    preferred_element_type=jnp.float32,
                )
                # Single sigmoid on the contiguous r|i slab.
                ri = jax.nn.sigmoid(gx[:, : 2 * H] + gh[:, : 2 * H])
                r = ri[:, :H]
                i = ri[:, H:]
                n = jnp.tanh(gx[:, 2 * H:] + r * (gh[:, 2 * H:] + bhn_refs[l][...]))
                h_new = n + i * (h_prev - n)           # hy = n + i*(h - n)
                h_refs[l][...] = h_new
                x = h_new.astype(jnp.bfloat16)         # input to the next layer
            return carry

        # Tt timesteps per grid step (amortizes per-grid-step overhead).
        lax.fori_loop(0, Tt, step, 0, unroll=True)

        # ---- end_conv decoder, fused at the final time block ----
        @pl.when(tb == pl.num_programs(1) - 1)
        def _decode():
            g = h_refs[L - 1][...].astype(jnp.bfloat16)
            out_ref[...] = (
                jnp.dot(g, end_w_ref[...], preferred_element_type=jnp.float32)
                + end_b_ref[...]
            )

    return kernel


# ----------------------------------------------------------------------------
# Wrappers
# ----------------------------------------------------------------------------
def _round_up(x, m):
    return ((x + m - 1) // m) * m


def _choose_block_m(M):
    """Row block for the parallel M axis: multiple of 16 (bf16 sublane tile),
    bounded VMEM for large M, and >= 2 blocks when M allows it so the
    'parallel' axis can shard across TensorCores (v7x megacore)."""
    if M >= 1024:
        return 512
    if M >= 512:
        return 256
    return max(16, _round_up(pl.cdiv(M, 2), 16))


def _choose_t_block(T, target=8):
    """Largest divisor of T that is <= target."""
    tb = 1
    for cand in range(1, min(T, target) + 1):
        if T % cand == 0:
            tb = cand
    return tb


def prepare_kernel_params(params, hidden):
    """bf16 weights for the MXU; fold bh_r/bh_i into the x-side bias."""
    H = hidden
    layers = []
    for layer in params["layers"]:
        bx, bh = layer["bx"], layer["bh"]
        bias_x = jnp.concatenate(
            [bx[:, : 2 * H] + bh[:, : 2 * H], bx[:, 2 * H:]], axis=1
        )
        layers.append(
            {
                "wx": layer["wx"].astype(jnp.bfloat16),
                "wh": layer["wh"].astype(jnp.bfloat16),
                "bias_x": bias_x,            # [1, 3H] f32
                "bh_n": bh[:, 2 * H:],       # [1, H]  f32
            }
        )
    return {
        "layers": layers,
        "end_w": params["end_w"].astype(jnp.bfloat16),
        "end_b": params["end_b"],
    }


def fused_gru_forward(x_tmd, kparams, hidden, block_m, t_block):
    """x_tmd: [T, Mp, D_in] bf16 (Mp multiple of block_m, T multiple of t_block).
    Returns [Mp, O] f32."""
    T, Mp, Din = x_tmd.shape
    H = hidden
    layers = kparams["layers"]
    L = len(layers)
    O = kparams["end_w"].shape[1]
    n_mb = Mp // block_m
    n_tb = T // t_block

    kernel = make_fused_gru_kernel(L, H, t_block)

    const = lambda m, tb: (0, 0)   # resident weights: DMA'd once, stay in VMEM

    in_specs = [pl.BlockSpec((t_block, block_m, Din), lambda m, tb: (tb, m, 0))]
    inputs = [x_tmd]
    for l in range(L):
        w = layers[l]["wx"]
        in_specs.append(pl.BlockSpec(w.shape, const)); inputs.append(w)
    for l in range(L):
        w = layers[l]["wh"]
        in_specs.append(pl.BlockSpec(w.shape, const)); inputs.append(w)
    for l in range(L):
        b = layers[l]["bias_x"]
        in_specs.append(pl.BlockSpec(b.shape, const)); inputs.append(b)
    for l in range(L):
        b = layers[l]["bh_n"]
        in_specs.append(pl.BlockSpec(b.shape, const)); inputs.append(b)
    in_specs.append(pl.BlockSpec(kparams["end_w"].shape, const))
    inputs.append(kparams["end_w"])
    in_specs.append(pl.BlockSpec(kparams["end_b"].shape, const))
    inputs.append(kparams["end_b"])

    return pl.pallas_call(
        kernel,
        out_shape=jax.ShapeDtypeStruct((Mp, O), jnp.float32),
        grid=(n_mb, n_tb),
        in_specs=in_specs,
        out_specs=pl.BlockSpec((block_m, O), lambda m, tb: (m, 0)),
        scratch_shapes=[pltpu.VMEM((block_m, H), jnp.float32) for _ in range(L)],
        compiler_params=pltpu.CompilerParams(
            dimension_semantics=("parallel", "arbitrary"),
            vmem_limit_bytes=48 * 1024 * 1024,
        ),
    )(*inputs)


def gru_forward(source, params, hidden):
    """source: [B, lag, N, D_in]  ->  [B, output_dim*horizon, N, 1]"""
    B, T, N, D = source.shape
    M = B * N
    O = params["end_w"].shape[1]

    block_m = _choose_block_m(M)
    Mp = _round_up(M, block_m)
    t_block = _choose_t_block(T)

    kparams = prepare_kernel_params(params, hidden)

    # [B, T, N, D] -> [T, M, D]; pad rows (independent across M, discarded at
    # the end) to a multiple of block_m; stream as bf16.
    x = jnp.transpose(source, (1, 0, 2, 3)).reshape(T, M, D)
    if Mp > M:
        x = jnp.pad(x, ((0, 0), (0, Mp - M), (0, 0)))
    x = x.astype(jnp.bfloat16)

    out = fused_gru_forward(x, kparams, hidden, block_m, t_block)   # [Mp, O]
    out = out[:M].reshape(B, N, O)
    return jnp.transpose(out, (0, 2, 1))[..., None]                 # [B, O, N, 1]


# ----------------------------------------------------------------------------
# Parameter init (deterministic, mirrors GRUCell.reset_parameters uniform(-std, std))
# Gate weights stored concatenated: wx [D_in, 3H], wh [H, 3H], biases [1, 3H],
# column blocks ordered (r, i, n) to match torch's chunk(3, dim=-1).
# ----------------------------------------------------------------------------
def init_params(key, input_dim, hidden, output_dim, horizon, num_layers):
    std = 1.0 / math.sqrt(hidden)
    layers = []
    for layer in range(num_layers):
        d_in = input_dim if layer == 0 else hidden
        key, k1, k2, k3, k4 = jax.random.split(key, 5)
        layers.append(
            {
                "wx": jax.random.uniform(k1, (d_in, 3 * hidden), jnp.float32, -std, std),
                "wh": jax.random.uniform(k2, (hidden, 3 * hidden), jnp.float32, -std, std),
                "bx": jax.random.uniform(k3, (1, 3 * hidden), jnp.float32, -std, std),
                "bh": jax.random.uniform(k4, (1, 3 * hidden), jnp.float32, -std, std),
            }
        )
    key, k5, k6 = jax.random.split(key, 3)
    O = output_dim * horizon
    bound = 1.0 / math.sqrt(hidden)  # nn.Linear default init scale
    end_w = jax.random.uniform(k5, (hidden, O), jnp.float32, -bound, bound)
    end_b = jax.random.uniform(k6, (1, O), jnp.float32, -bound, bound)
    return {"layers": layers, "end_w": end_w, "end_b": end_b}


# ----------------------------------------------------------------------------
# Pure-JAX f32 reference (same math, no Pallas) for correctness check.
# ----------------------------------------------------------------------------
def gru_forward_ref(source, params, hidden):
    B, T, N, _ = source.shape
    H = hidden
    cur = source
    for layer in params["layers"]:
        h = jnp.zeros((B * N, H), jnp.float32)
        outs = []
        for t in range(T):
            x_t = cur[:, t].reshape(B * N, -1)
            gx = x_t @ layer["wx"] + layer["bx"]
            gh = h @ layer["wh"] + layer["bh"]
            r = jax.nn.sigmoid(gx[:, :H] + gh[:, :H])
            i = jax.nn.sigmoid(gx[:, H:2 * H] + gh[:, H:2 * H])
            n = jnp.tanh(gx[:, 2 * H:] + r * gh[:, 2 * H:])
            h = n + i * (h - n)
            outs.append(h.reshape(B, N, H))
        cur = jnp.stack(outs, axis=1)
    g_out = cur[:, -1].reshape(B * N, H)
    out = g_out @ params["end_w"] + params["end_b"]
    out = out.reshape(B, N, -1)
    return jnp.transpose(out, (0, 2, 1))[..., None]


if __name__ == "__main__":
    # Small, module-consistent shapes
    B, LAG, N, D_IN = 2, 8, 16, 2
    HIDDEN, OUT_DIM, HORIZON, NUM_LAYERS = 32, 1, 3, 2

    key = jax.random.PRNGKey(0)
    key, kx = jax.random.split(key)
    source = jax.random.normal(kx, (B, LAG, N, D_IN), jnp.float32)

    params = init_params(key, D_IN, HIDDEN, OUT_DIM, HORIZON, NUM_LAYERS)

    run = jax.jit(lambda s, p: gru_forward(s, p, HIDDEN))
    out = jax.block_until_ready(run(source, params))
    assert out.shape == (B, OUT_DIM * HORIZON, N, 1), out.shape

    ref = jax.block_until_ready(gru_forward_ref(source, params, HIDDEN))
    err = float(jnp.max(jnp.abs(out - ref)))
    # bf16 MXU operands vs. an all-f32 reference -> allow a few e-3 drift
    # accumulated over T steps and L layers.
    assert jnp.allclose(out, ref, atol=3e-2, rtol=3e-2), err

    print("KERNEL_OK")
</pallas_src>

<mosaic_0001>
module attributes {stable_mosaic.version = 11 : i64} {
  func.func @kernel(%arg0: i32, %arg1: i32, %arg2: memref<8x16x2xbf16, #tpu.memory_space<vmem>>, %arg3: memref<2x96xbf16, #tpu.memory_space<vmem>>, %arg4: memref<32x96xbf16, #tpu.memory_space<vmem>>, %arg5: memref<32x96xbf16, #tpu.memory_space<vmem>>, %arg6: memref<32x96xbf16, #tpu.memory_space<vmem>>, %arg7: memref<1x96xf32, #tpu.memory_space<vmem>>, %arg8: memref<1x96xf32, #tpu.memory_space<vmem>>, %arg9: memref<1x32xf32, #tpu.memory_space<vmem>>, %arg10: memref<1x32xf32, #tpu.memory_space<vmem>>, %arg11: memref<32x3xbf16, #tpu.memory_space<vmem>>, %arg12: memref<1x3xf32, #tpu.memory_space<vmem>>, %arg13: memref<16x3xf32, #tpu.memory_space<vmem>>, %arg14: memref<16x32xf32, #tpu.memory_space<vmem>>, %arg15: memref<16x32xf32, #tpu.memory_space<vmem>>) attributes {dimension_semantics = [#tpu.dimension_semantics<parallel>, #tpu.dimension_semantics<arbitrary>], iteration_bounds = array<i64: 2, 1>, scalar_prefetch = 0 : i64, scratch_operands = 2 : i64, tpu.core_type = #tpu.core_type<tc>, window_params = [{transform_indices = @transform_0, window_bounds = array<i64: 8, 16, 2>}, {pipeline_mode = #tpu.pipeline_mode<synchronous>, transform_indices = @transform_1, window_bounds = array<i64: 2, 96>}, {pipeline_mode = #tpu.pipeline_mode<synchronous>, transform_indices = @transform_2, window_bounds = array<i64: 32, 96>}, {pipeline_mode = #tpu.pipeline_mode<synchronous>, transform_indices = @transform_3, window_bounds = array<i64: 32, 96>}, {pipeline_mode = #tpu.pipeline_mode<synchronous>, transform_indices = @transform_4, window_bounds = array<i64: 32, 96>}, {pipeline_mode = #tpu.pipeline_mode<synchronous>, transform_indices = @transform_5, window_bounds = array<i64: 1, 96>}, {pipeline_mode = #tpu.pipeline_mode<synchronous>, transform_indices = @transform_6, window_bounds = array<i64: 1, 96>}, {pipeline_mode = #tpu.pipeline_mode<synchronous>, transform_indices = @transform_7, window_bounds = array<i64: 1, 32>}, {pipeline_mode = #tpu.pipeline_mode<synchronous>, transform_indices = @transform_8, window_bounds = array<i64: 1, 32>}, {pipeline_mode = #tpu.pipeline_mode<synchronous>, transform_indices = @transform_9, window_bounds = array<i64: 32, 3>}, {pipeline_mode = #tpu.pipeline_mode<synchronous>, transform_indices = @transform_10, window_bounds = array<i64: 1, 3>}, {transform_indices = @transform_11, window_bounds = array<i64: 16, 3>}]} {
    %c0_i32 = arith.constant 0 : i32
    %0 = arith.cmpi eq, %arg1, %c0_i32 : i32
    %1 = arith.extui %0 : i1 to i32
    %c0_i32_0 = arith.constant 0 : i32
    %2 = arith.cmpi ne, %1, %c0_i32_0 : i32
    scf.if %2 {
      %cst_258 = arith.constant 0.000000e+00 : f32
      %534 = vector.broadcast %cst_258 : f32 to vector<16x32xf32>
      %c0_259 = arith.constant 0 : index
      %c0_260 = arith.constant 0 : index
      %535 = vector.load %arg14[%c0_259, %c0_260] : memref<16x32xf32, #tpu.memory_space<vmem>>, vector<16x32xf32>
      tpu.vector_store %arg14[%c0_259, %c0_260], %534 {strides = array<i32>} : memref<16x32xf32, #tpu.memory_space<vmem>>, vector<16x32xf32>,
      %cst_261 = arith.constant 0.000000e+00 : f32
      %536 = vector.broadcast %cst_261 : f32 to vector<16x32xf32>
      %c0_262 = arith.constant 0 : index
      %c0_263 = arith.constant 0 : index
      %537 = vector.load %arg15[%c0_262, %c0_263] : memref<16x32xf32, #tpu.memory_space<vmem>>, vector<16x32xf32>
      tpu.vector_store %arg15[%c0_262, %c0_263], %536 {strides = array<i32>} : memref<16x32xf32, #tpu.memory_space<vmem>>, vector<16x32xf32>,
    } else {
    }
    %c0_i32_1 = arith.constant 0 : i32
    %3 = arith.index_cast %c0_i32_1 : i32 to index
    %c0 = arith.constant 0 : index
    %c0_2 = arith.constant 0 : index
    %4 = vector.load %arg2[%3, %c0, %c0_2] : memref<8x16x2xbf16, #tpu.memory_space<vmem>>, vector<1x16x2xbf16>
    %5 = vector.shape_cast %4 : vector<1x16x2xbf16> to vector<16x2xbf16>
    %c0_3 = arith.constant 0 : index
    %c0_4 = arith.constant 0 : index
    %6 = vector.load %arg14[%c0_3, %c0_4] : memref<16x32xf32, #tpu.memory_space<vmem>>, vector<16x32xf32>
    %c0_5 = arith.constant 0 : index
    %c0_6 = arith.constant 0 : index
    %7 = vector.load %arg3[%c0_5, %c0_6] : memref<2x96xbf16, #tpu.memory_space<vmem>>, vector<2x96xbf16>
    %cst = arith.constant dense<0.000000e+00> : vector<16x96xf32>
    %8 = tpu.matmul %5, %7, %cst {dimension_numbers = #tpu.dot_dimension_numbers<[1], [0], [0], [1], [0, 0, 1, 1], [], []>} : vector<16x2xbf16>, vector<2x96xbf16>, vector<16x96xf32> -> vector<16x96xf32>
    %c0_7 = arith.constant 0 : index
    %c0_8 = arith.constant 0 : index
    %9 = vector.load %arg7[%c0_7, %c0_8] : memref<1x96xf32, #tpu.memory_space<vmem>>, vector<1x96xf32>
    %10 = vector.broadcast %9 : vector<1x96xf32> to vector<16x96xf32>
    %11 = arith.addf %8, %10 : vector<16x96xf32>
    %12 = arith.truncf %6 : vector<16x32xf32> to vector<16x32xbf16>
    %c0_9 = arith.constant 0 : index
    %c0_10 = arith.constant 0 : index
    %13 = vector.load %arg5[%c0_9, %c0_10] : memref<32x96xbf16, #tpu.memory_space<vmem>>, vector<32x96xbf16>
    %cst_11 = arith.constant dense<0.000000e+00> : vector<16x96xf32>
    %14 = tpu.matmul %12, %13, %cst_11 {dimension_numbers = #tpu.dot_dimension_numbers<[1], [0], [0], [1], [0, 0, 1, 1], [], []>} : vector<16x32xbf16>, vector<32x96xbf16>, vector<16x96xf32> -> vector<16x96xf32>
    %15 = vector.extract_strided_slice %11 {offsets = [0, 0], sizes = [16, 64], strides = [1, 1]} : vector<16x96xf32> to vector<16x64xf32>
    %16 = vector.extract_strided_slice %14 {offsets = [0, 0], sizes = [16, 64], strides = [1, 1]} : vector<16x96xf32> to vector<16x64xf32>
    %17 = arith.addf %15, %16 : vector<16x64xf32>
    %18 = arith.negf %17 : vector<16x64xf32>
    %19 = math.exp %18 : vector<16x64xf32>
    %cst_12 = arith.constant 1.000000e+00 : f32
    %20 = vector.broadcast %cst_12 : f32 to vector<16x64xf32>
    %21 = arith.addf %20, %19 : vector<16x64xf32>
    %22 = arith.divf %20, %21 : vector<16x64xf32>
    %23 = vector.extract_strided_slice %22 {offsets = [0, 0], sizes = [16, 32], strides = [1, 1]} : vector<16x64xf32> to vector<16x32xf32>
    %24 = vector.extract_strided_slice %22 {offsets = [0, 32], sizes = [16, 32], strides = [1, 1]} : vector<16x64xf32> to vector<16x32xf32>
    %25 = vector.extract_strided_slice %11 {offsets = [0, 64], sizes = [16, 32], strides = [1, 1]} : vector<16x96xf32> to vector<16x32xf32>
    %26 = vector.extract_strided_slice %14 {offsets = [0, 64], sizes = [16, 32], strides = [1, 1]} : vector<16x96xf32> to vector<16x32xf32>
    %c0_13 = arith.constant 0 : index
    %c0_14 = arith.constant 0 : index
    %27 = vector.load %arg9[%c0_13, %c0_14] : memref<1x32xf32, #tpu.memory_space<vmem>>, vector<1x32xf32>
    %28 = vector.broadcast %27 : vector<1x32xf32> to vector<16x32xf32>
    %29 = arith.addf %26, %28 : vector<16x32xf32>
    %30 = arith.mulf %23, %29 : vector<16x32xf32>
    %31 = arith.addf %25, %30 : vector<16x32xf32>
    %32 = math.tanh %31 : vector<16x32xf32>
    %33 = arith.subf %6, %32 : vector<16x32xf32>
    %34 = arith.mulf %24, %33 : vector<16x32xf32>
    %35 = arith.addf %32, %34 : vector<16x32xf32>
    %c0_15 = arith.constant 0 : index
    %c0_16 = arith.constant 0 : index
    %36 = vector.load %arg14[%c0_15, %c0_16] : memref<16x32xf32, #tpu.memory_space<vmem>>, vector<16x32xf32>
    tpu.vector_store %arg14[%c0_15, %c0_16], %35 {strides = array<i32>} : memref<16x32xf32, #tpu.memory_space<vmem>>, vector<16x32xf32>,
    %37 = arith.truncf %35 : vector<16x32xf32> to vector<16x32xbf16>
    %c0_17 = arith.constant 0 : index
    %c0_18 = arith.constant 0 : index
    %38 = vector.load %arg15[%c0_17, %c0_18] : memref<16x32xf32, #tpu.memory_space<vmem>>, vector<16x32xf32>
    %c0_19 = arith.constant 0 : index
    %c0_20 = arith.constant 0 : index
    %39 = vector.load %arg4[%c0_19, %c0_20] : memref<32x96xbf16, #tpu.memory_space<vmem>>, vector<32x96xbf16>
    %cst_21 = arith.constant dense<0.000000e+00> : vector<16x96xf32>
    %40 = tpu.matmul %37, %39, %cst_21 {dimension_numbers = #tpu.dot_dimension_numbers<[1], [0], [0], [1], [0, 0, 1, 1], [], []>} : vector<16x32xbf16>, vector<32x96xbf16>, vector<16x96xf32> -> vector<16x96xf32>
    %c0_22 = arith.constant 0 : index
    %c0_23 = arith.constant 0 : index
    %41 = vector.load %arg8[%c0_22, %c0_23] : memref<1x96xf32, #tpu.memory_space<vmem>>, vector<1x96xf32>
    %42 = vector.broadcast %41 : vector<1x96xf32> to vector<16x96xf32>
    %43 = arith.addf %40, %42 : vector<16x96xf32>
    %44 = arith.truncf %38 : vector<16x32xf32> to vector<16x32xbf16>
    %c0_24 = arith.constant 0 : index
    %c0_25 = arith.constant 0 : index
    %45 = vector.load %arg6[%c0_24, %c0_25] : memref<32x96xbf16, #tpu.memory_space<vmem>>, vector<32x96xbf16>
    %cst_26 = arith.constant dense<0.000000e+00> : vector<16x96xf32>
    %46 = tpu.matmul %44, %45, %cst_26 {dimension_numbers = #tpu.dot_dimension_numbers<[1], [0], [0], [1], [0, 0, 1, 1], [], []>} : vector<16x32xbf16>, vector<32x96xbf16>, vector<16x96xf32> -> vector<16x96xf32>
    %47 = vector.extract_strided_slice %43 {offsets = [0, 0], sizes = [16, 64], strides = [1, 1]} : vector<16x96xf32> to vector<16x64xf32>
    %48 = vector.extract_strided_slice %46 {offsets = [0, 0], sizes = [16, 64], strides = [1, 1]} : vector<16x96xf32> to vector<16x64xf32>
    %49 = arith.addf %47, %48 : vector<16x64xf32>
    %50 = arith.negf %49 : vector<16x64xf32>
    %51 = math.exp %50 : vector<16x64xf32>
    %cst_27 = arith.constant 1.000000e+00 : f32
    %52 = vector.broadcast %cst_27 : f32 to vector<16x64xf32>
    %53 = arith.addf %52, %51 : vector<16x64xf32>
    %54 = arith.divf %52, %53 : vector<16x64xf32>
    %55 = vector.extract_strided_slice %54 {offsets = [0, 0], sizes = [16, 32], strides = [1, 1]} : vector<16x64xf32> to vector<16x32xf32>
    %56 = vector.extract_strided_slice %54 {offsets = [0, 32], sizes = [16, 32], strides = [1, 1]} : vector<16x64xf32> to vector<16x32xf32>
    %57 = vector.extract_strided_slice %43 {offsets = [0, 64], sizes = [16, 32], strides = [1, 1]} : vector<16x96xf32> to vector<16x32xf32>
    %58 = vector.extract_strided_slice %46 {offsets = [0, 64], sizes = [16, 32], strides = [1, 1]} : vector<16x96xf32> to vector<16x32xf32>
    %c0_28 = arith.constant 0 : index
    %c0_29 = arith.constant 0 : index
    %59 = vector.load %arg10[%c0_28, %c0_29] : memref<1x32xf32, #tpu.memory_space<vmem>>, vector<1x32xf32>
    %60 = vector.broadcast %59 : vector<1x32xf32> to vector<16x32xf32>
    %61 = arith.addf %58, %60 : vector<16x32xf32>
    %62 = arith.mulf %55, %61 : vector<16x32xf32>
    %63 = arith.addf %57, %62 : vector<16x32xf32>
    %64 = math.tanh %63 : vector<16x32xf32>
    %65 = arith.subf %38, %64 : vector<16x32xf32>
    %66 = arith.mulf %56, %65 : vector<16x32xf32>
    %67 = arith.addf %64, %66 : vector<16x32xf32>
    %c0_30 = arith.constant 0 : index
    %c0_31 = arith.constant 0 : index
    %68 = vector.load %arg15[%c0_30, %c0_31] : memref<16x32xf32, #tpu.memory_space<vmem>>, vector<16x32xf32>
    tpu.vector_store %arg15[%c0_30, %c0_31], %67 {strides = array<i32>} : memref<16x32xf32, #tpu.memory_space<vmem>>, vector<16x32xf32>,
    %c1_i32 = arith.constant 1 : i32
    %69 = arith.index_cast %c1_i32 : i32 to index
    %c0_32 = arith.constant 0 : index
    %c0_33 = arith.constant 0 : index
    %70 = vector.load %arg2[%69, %c0_32, %c0_33] : memref<8x16x2xbf16, #tpu.memory_space<vmem>>, vector<1x16x2xbf16>
    %71 = vector.shape_cast %70 : vector<1x16x2xbf16> to vector<16x2xbf16>
    %c0_34 = arith.constant 0 : index
    %c0_35 = arith.constant 0 : index
    %72 = vector.load %arg14[%c0_34, %c0_35] : memref<16x32xf32, #tpu.memory_space<vmem>>, vector<16x32xf32>
    %c0_36 = arith.constant 0 : index
    %c0_37 = arith.constant 0 : index
    %73 = vector.load %arg3[%c0_36, %c0_37] : memref<2x96xbf16, #tpu.memory_space<vmem>>, vector<2x96xbf16>
    %cst_38 = arith.constant dense<0.000000e+00> : vector<16x96xf32>
    %74 = tpu.matmul %71, %73, %cst_38 {dimension_numbers = #tpu.dot_dimension_numbers<[1], [0], [0], [1], [0, 0, 1, 1], [], []>} : vector<16x2xbf16>, vector<2x96xbf16>, vector<16x96xf32> -> vector<16x96xf32>
    %c0_39 = arith.constant 0 : index
    %c0_40 = arith.constant 0 : index
    %75 = vector.load %arg7[%c0_39, %c0_40] : memref<1x96xf32, #tpu.memory_space<vmem>>, vector<1x96xf32>
    %76 = vector.broadcast %75 : vector<1x96xf32> to vector<16x96xf32>
    %77 = arith.addf %74, %76 : vector<16x96xf32>
    %78 = arith.truncf %72 : vector<16x32xf32> to vector<16x32xbf16>
    %c0_41 = arith.constant 0 : index
    %c0_42 = arith.constant 0 : index
    %79 = vector.load %arg5[%c0_41, %c0_42] : memref<32x96xbf16, #tpu.memory_space<vmem>>, vector<32x96xbf16>
    %cst_43 = arith.constant dense<0.000000e+00> : vector<16x96xf32>
    %80 = tpu.matmul %78, %79, %cst_43 {dimension_numbers = #tpu.dot_dimension_numbers<[1], [0], [0], [1], [0, 0, 1, 1], [], []>} : vector<16x32xbf16>, vector<32x96xbf16>, vector<16x96xf32> -> vector<16x96xf32>
    %81 = vector.extract_strided_slice %77 {offsets = [0, 0], sizes = [16, 64], strides = [1, 1]} : vector<16x96xf32> to vector<16x64xf32>
    %82 = vector.extract_strided_slice %80 {offsets = [0, 0], sizes = [16, 64], strides = [1, 1]} : vector<16x96xf32> to vector<16x64xf32>
    %83 = arith.addf %81, %82 : vector<16x64xf32>
    %84 = arith.negf %83 : vector<16x64xf32>
    %85 = math.exp %84 : vector<16x64xf32>
    %cst_44 = arith.constant 1.000000e+00 : f32
    %86 = vector.broadcast %cst_44 : f32 to vector<16x64xf32>
    %87 = arith.addf %86, %85 : vector<16x64xf32>
    %88 = arith.divf %86, %87 : vector<16x64xf32>
    %89 = vector.extract_strided_slice %88 {offsets = [0, 0], sizes = [16, 32], strides = [1, 1]} : vector<16x64xf32> to vector<16x32xf32>
    %90 = vector.extract_strided_slice %88 {offsets = [0, 32], sizes = [16, 32], strides = [1, 1]} : vector<16x64xf32> to vector<16x32xf32>
    %91 = vector.extract_strided_slice %77 {offsets = [0, 64], sizes = [16, 32], strides = [1, 1]} : vector<16x96xf32> to vector<16x32xf32>
    %92 = vector.extract_strided_slice %80 {offsets = [0, 64], sizes = [16, 32], strides = [1, 1]} : vector<16x96xf32> to vector<16x32xf32>
    %c0_45 = arith.constant 0 : index
    %c0_46 = arith.constant 0 : index
    %93 = vector.load %arg9[%c0_45, %c0_46] : memref<1x32xf32, #tpu.memory_space<vmem>>, vector<1x32xf32>
    %94 = vector.broadcast %93 : vector<1x32xf32> to vector<16x32xf32>
    %95 = arith.addf %92, %94 : vector<16x32xf32>
    %96 = arith.mulf %89, %95 : vector<16x32xf32>
    %97 = arith.addf %91, %96 : vector<16x32xf32>
    %98 = math.tanh %97 : vector<16x32xf32>
    %99 = arith.subf %72, %98 : vector<16x32xf32>
    %100 = arith.mulf %90, %99 : vector<16x32xf32>
    %101 = arith.addf %98, %100 : vector<16x32xf32>
    %c0_47 = arith.constant 0 : index
    %c0_48 = arith.constant 0 : index
    %102 = vector.load %arg14[%c0_47, %c0_48] : memref<16x32xf32, #tpu.memory_space<vmem>>, vector<16x32xf32>
    tpu.vector_store %arg14[%c0_47, %c0_48], %101 {strides = array<i32>} : memref<16x32xf32, #tpu.memory_space<vmem>>, vector<16x32xf32>,
    %103 = arith.truncf %101 : vector<16x32xf32> to vector<16x32xbf16>
    %c0_49 = arith.constant 0 : index
    %c0_50 = arith.constant 0 : index
    %104 = vector.load %arg15[%c0_49, %c0_50] : memref<16x32xf32, #tpu.memory_space<vmem>>, vector<16x32xf32>
    %c0_51 = arith.constant 0 : index
    %c0_52 = arith.constant 0 : index
    %105 = vector.load %arg4[%c0_51, %c0_52] : memref<32x96xbf16, #tpu.memory_space<vmem>>, vector<32x96xbf16>
    %cst_53 = arith.constant dense<0.000000e+00> : vector<16x96xf32>
    %106 = tpu.matmul %103, %105, %cst_53 {dimension_numbers = #tpu.dot_dimension_numbers<[1], [0], [0], [1], [0, 0, 1, 1], [], []>} : vector<16x32xbf16>, vector<32x96xbf16>, vector<16x96xf32> -> vector<16x96xf32>
    %c0_54 = arith.constant 0 : index
    %c0_55 = arith.constant 0 : index
    %107 = vector.load %arg8[%c0_54, %c0_55] : memref<1x96xf32, #tpu.memory_space<vmem>>, vector<1x96xf32>
    %108 = vector.broadcast %107 : vector<1x96xf32> to vector<16x96xf32>
    %109 = arith.addf %106, %108 : vector<16x96xf32>
    %110 = arith.truncf %104 : vector<16x32xf32> to vector<16x32xbf16>
    %c0_56 = arith.constant 0 : index
    %c0_57 = arith.constant 0 : index
    %111 = vector.load %arg6[%c0_56, %c0_57] : memref<32x96xbf16, #tpu.memory_space<vmem>>, vector<32x96xbf16>
    %cst_58 = arith.constant dense<0.000000e+00> : vector<16x96xf32>
    %112 = tpu.matmul %110, %111, %cst_58 {dimension_numbers = #tpu.dot_dimension_numbers<[1], [0], [0], [1], [0, 0, 1, 1], [], []>} : vector<16x32xbf16>, vector<32x96xbf16>, vector<16x96xf32> -> vector<16x96xf32>
    %113 = vector.extract_strided_slice %109 {offsets = [0, 0], sizes = [16, 64], strides = [1, 1]} : vector<16x96xf32> to vector<16x64xf32>
    %114 = vector.extract_strided_slice %112 {offsets = [0, 0], sizes = [16, 64], strides = [1, 1]} : vector<16x96xf32> to vector<16x64xf32>
    %115 = arith.addf %113, %114 : vector<16x64xf32>
    %116 = arith.negf %115 : vector<16x64xf32>
    %117 = math.exp %116 : vector<16x64xf32>
    %cst_59 = arith.constant 1.000000e+00 : f32
    %118 = vector.broadcast %cst_59 : f32 to vector<16x64xf32>
    %119 = arith.addf %118, %117 : vector<16x64xf32>
    %120 = arith.divf %118, %119 : vector<16x64xf32>
    %121 = vector.extract_strided_slice %120 {offsets = [0, 0], sizes = [16, 32], strides = [1, 1]} : vector<16x64xf32> to vector<16x32xf32>
    %122 = vector.extract_strided_slice %120 {offsets = [0, 32], sizes = [16, 32], strides = [1, 1]} : vector<16x64xf32> to vector<16x32xf32>
    %123 = vector.extract_strided_slice %109 {offsets = [0, 64], sizes = [16, 32], strides = [1, 1]} : vector<16x96xf32> to vector<16x32xf32>
    %124 = vector.extract_strided_slice %112 {offsets = [0, 64], sizes = [16, 32], strides = [1, 1]} : vector<16x96xf32> to vector<16x32xf32>
    %c0_60 = arith.constant 0 : index
    %c0_61 = arith.constant 0 : index
    %125 = vector.load %arg10[%c0_60, %c0_61] : memref<1x32xf32, #tpu.memory_space<vmem>>, vector<1x32xf32>
    %126 = vector.broadcast %125 : vector<1x32xf32> to vector<16x32xf32>
    %127 = arith.addf %124, %126 : vector<16x32xf32>
    %128 = arith.mulf %121, %127 : vector<16x32xf32>
    %129 = arith.addf %123, %128 : vector<16x32xf32>
    %130 = math.tanh %129 : vector<16x32xf32>
    %131 = arith.subf %104, %130 : vector<16x32xf32>
    %132 = arith.mulf %122, %131 : vector<16x32xf32>
    %133 = arith.addf %130, %132 : vector<16x32xf32>
    %c0_62 = arith.constant 0 : index
    %c0_63 = arith.constant 0 : index
    %134 = vector.load %arg15[%c0_62, %c0_63] : memref<16x32xf32, #tpu.memory_space<vmem>>, vector<16x32xf32>
    tpu.vector_store %arg15[%c0_62, %c0_63], %133 {strides = array<i32>} : memref<16x32xf32, #tpu.memory_space<vmem>>, vector<16x32xf32>,
    %c2_i32 = arith.constant 2 : i32
    %135 = arith.index_cast %c2_i32 : i32 to index
    %c0_64 = arith.constant 0 : index
    %c0_65 = arith.constant 0 : index
    %136 = vector.load %arg2[%135, %c0_64, %c0_65] : memref<8x16x2xbf16, #tpu.memory_space<vmem>>, vector<1x16x2xbf16>
    %137 = vector.shape_cast %136 : vector<1x16x2xbf16> to vector<16x2xbf16>
    %c0_66 = arith.constant 0 : index
    %c0_67 = arith.constant 0 : index
    %138 = vector.load %arg14[%c0_66, %c0_67] : memref<16x32xf32, #tpu.memory_space<vmem>>, vector<16x32xf32>
    %c0_68 = arith.constant 0 : index
    %c0_69 = arith.constant 0 : index
    %139 = vector.load %arg3[%c0_68, %c0_69] : memref<2x96xbf16, #tpu.memory_space<vmem>>, vector<2x96xbf16>
    %cst_70 = arith.constant dense<0.000000e+00> : vector<16x96xf32>
    %140 = tpu.matmul %137, %139, %cst_70 {dimension_numbers = #tpu.dot_dimension_numbers<[1], [0], [0], [1], [0, 0, 1, 1], [], []>} : vector<16x2xbf16>, vector<2x96xbf16>, vector<16x96xf32> -> vector<16x96xf32>
    %c0_71 = arith.constant 0 : index
    %c0_72 = arith.constant 0 : index
    %141 = vector.load %arg7[%c0_71, %c0_72] : memref<1x96xf32, #tpu.memory_space<vmem>>, vector<1x96xf32>
    %142 = vector.broadcast %141 : vector<1x96xf32> to vector<16x96xf32>
    %143 = arith.addf %140, %142 : vector<16x96xf32>
    %144 = arith.truncf %138 : vector<16x32xf32> to vector<16x32xbf16>
    %c0_73 = arith.constant 0 : index
    %c0_74 = arith.constant 0 : index
    %145 = vector.load %arg5[%c0_73, %c0_74] : memref<32x96xbf16, #tpu.memory_space<vmem>>, vector<32x96xbf16>
    %cst_75 = arith.constant dense<0.000000e+00> : vector<16x96xf32>
    %146 = tpu.matmul %144, %145, %cst_75 {dimension_numbers = #tpu.dot_dimension_numbers<[1], [0], [0], [1], [0, 0, 1, 1], [], []>} : vector<16x32xbf16>, vector<32x96xbf16>, vector<16x96xf32> -> vector<16x96xf32>
    %147 = vector.extract_strided_slice %143 {offsets = [0, 0], sizes = [16, 64], strides = [1, 1]} : vector<16x96xf32> to vector<16x64xf32>
    %148 = vector.extract_strided_slice %146 {offsets = [0, 0], sizes = [16, 64], strides = [1, 1]} : vector<16x96xf32> to vector<16x64xf32>
    %149 = arith.addf %147, %148 : vector<16x64xf32>
    %150 = arith.negf %149 : vector<16x64xf32>
    %151 = math.exp %150 : vector<16x64xf32>
    %cst_76 = arith.constant 1.000000e+00 : f32
    %152 = vector.broadcast %cst_76 : f32 to vector<16x64xf32>
    %153 = arith.addf %152, %151 : vector<16x64xf32>
    %154 = arith.divf %152, %153 : vector<16x64xf32>
    %155 = vector.extract_strided_slice %154 {offsets = [0, 0], sizes = [16, 32], strides = [1, 1]} : vector<16x64xf32> to vector<16x32xf32>
    %156 = vector.extract_strided_slice %154 {offsets = [0, 32], sizes = [16, 32], strides = [1, 1]} : vector<16x64xf32> to vector<16x32xf32>
    %157 = vector.extract_strided_slice %143 {offsets = [0, 64], sizes = [16, 32], strides = [1, 1]} : vector<16x96xf32> to vector<16x32xf32>
    %158 = vector.extract_strided_slice %146 {offsets = [0, 64], sizes = [16, 32], strides = [1, 1]} : vector<16x96xf32> to vector<16x32xf32>
    %c0_77 = arith.constant 0 : index
    %c0_78 = arith.constant 0 : index
    %159 = vector.load %arg9[%c0_77, %c0_78] : memref<1x32xf32, #tpu.memory_space<vmem>>, vector<1x32xf32>
    %160 = vector.broadcast %159 : vector<1x32xf32> to vector<16x32xf32>
    %161 = arith.addf %158, %160 : vector<16x32xf32>
    %162 = arith.mulf %155, %161 : vector<16x32xf32>
    %163 = arith.addf %157, %162 : vector<16x32xf32>
    %164 = math.tanh %163 : vector<16x32xf32>
    %165 = arith.subf %138, %164 : vector<16x32xf32>
    %166 = arith.mulf %156, %165 : vector<16x32xf32>
    %167 = arith.addf %164, %166 : vector<16x32xf32>
    %c0_79 = arith.constant 0 : index
    %c0_80 = arith.constant 0 : index
    %168 = vector.load %arg14[%c0_79, %c0_80] : memref<16x32xf32, #tpu.memory_space<vmem>>, vector<16x32xf32>
    tpu.vector_store %arg14[%c0_79, %c0_80], %167 {strides = array<i32>} : memref<16x32xf32, #tpu.memory_space<vmem>>, vector<16x32xf32>,
    %169 = arith.truncf %167 : vector<16x32xf32> to vector<16x32xbf16>
    %c0_81 = arith.constant 0 : index
    %c0_82 = arith.constant 0 : index
    %170 = vector.load %arg15[%c0_81, %c0_82] : memref<16x32xf32, #tpu.memory_space<vmem>>, vector<16x32xf32>
    %c0_83 = arith.constant 0 : index
    %c0_84 = arith.constant 0 : index
    %171 = vector.load %arg4[%c0_83, %c0_84] : memref<32x96xbf16, #tpu.memory_space<vmem>>, vector<32x96xbf16>
    %cst_85 = arith.constant dense<0.000000e+00> : vector<16x96xf32>
    %172 = tpu.matmul %169, %171, %cst_85 {dimension_numbers = #tpu.dot_dimension_numbers<[1], [0], [0], [1], [0, 0, 1, 1], [], []>} : vector<16x32xbf16>, vector<32x96xbf16>, vector<16x96xf32> -> vector<16x96xf32>
    %c0_86 = arith.constant 0 : index
    %c0_87 = arith.constant 0 : index
    %173 = vector.load %arg8[%c0_86, %c0_87] : memref<1x96xf32, #tpu.memory_space<vmem>>, vector<1x96xf32>
    %174 = vector.broadcast %173 : vector<1x96xf32> to vector<16x96xf32>
    %175 = arith.addf %172, %174 : vector<16x96xf32>
    %176 = arith.truncf %170 : vector<16x32xf32> to vector<16x32xbf16>
    %c0_88 = arith.constant 0 : index
    %c0_89 = arith.constant 0 : index
    %177 = vector.load %arg6[%c0_88, %c0_89] : memref<32x96xbf16, #tpu.memory_space<vmem>>, vector<32x96xbf16>
    %cst_90 = arith.constant dense<0.000000e+00> : vector<16x96xf32>
    %178 = tpu.matmul %176, %177, %cst_90 {dimension_numbers = #tpu.dot_dimension_numbers<[1], [0], [0], [1], [0, 0, 1, 1], [], []>} : vector<16x32xbf16>, vector<32x96xbf16>, vector<16x96xf32> -> vector<16x96xf32>
    %179 = vector.extract_strided_slice %175 {offsets = [0, 0], sizes = [16, 64], strides = [1, 1]} : vector<16x96xf32> to vector<16x64xf32>
    %180 = vector.extract_strided_slice %178 {offsets = [0, 0], sizes = [16, 64], strides = [1, 1]} : vector<16x96xf32> to vector<16x64xf32>
    %181 = arith.addf %179, %180 : vector<16x64xf32>
    %182 = arith.negf %181 : vector<16x64xf32>
    %183 = math.exp %182 : vector<16x64xf32>
    %cst_91 = arith.constant 1.000000e+00 : f32
    %184 = vector.broadcast %cst_91 : f32 to vector<16x64xf32>
    %185 = arith.addf %184, %183 : vector<16x64xf32>
    %186 = arith.divf %184, %185 : vector<16x64xf32>
    %187 = vector.extract_strided_slice %186 {offsets = [0, 0], sizes = [16, 32], strides = [1, 1]} : vector<16x64xf32> to vector<16x32xf32>
    %188 = vector.extract_strided_slice %186 {offsets = [0, 32], sizes = [16, 32], strides = [1, 1]} : vector<16x64xf32> to vector<16x32xf32>
    %189 = vector.extract_strided_slice %175 {offsets = [0, 64], sizes = [16, 32], strides = [1, 1]} : vector<16x96xf32> to vector<16x32xf32>
    %190 = vector.extract_strided_slice %178 {offsets = [0, 64], sizes = [16, 32], strides = [1, 1]} : vector<16x96xf32> to vector<16x32xf32>
    %c0_92 = arith.constant 0 : index
    %c0_93 = arith.constant 0 : index
    %191 = vector.load %arg10[%c0_92, %c0_93] : memref<1x32xf32, #tpu.memory_space<vmem>>, vector<1x32xf32>
    %192 = vector.broadcast %191 : vector<1x32xf32> to vector<16x32xf32>
    %193 = arith.addf %190, %192 : vector<16x32xf32>
    %194 = arith.mulf %187, %193 : vector<16x32xf32>
    %195 = arith.addf %189, %194 : vector<16x32xf32>
    %196 = math.tanh %195 : vector<16x32xf32>
    %197 = arith.subf %170, %196 : vector<16x32xf32>
    %198 = arith.mulf %188, %197 : vector<16x32xf32>
    %199 = arith.addf %196, %198 : vector<16x32xf32>
    %c0_94 = arith.constant 0 : index
    %c0_95 = arith.constant 0 : index
    %200 = vector.load %arg15[%c0_94, %c0_95] : memref<16x32xf32, #tpu.memory_space<vmem>>, vector<16x32xf32>
    tpu.vector_store %arg15[%c0_94, %c0_95], %199 {strides = array<i32>} : memref<16x32xf32, #tpu.memory_space<vmem>>, vector<16x32xf32>,
    %c3_i32 = arith.constant 3 : i32
    %201 = arith.index_cast %c3_i32 : i32 to index
    %c0_96 = arith.constant 0 : index
    %c0_97 = arith.constant 0 : index
    %202 = vector.load %arg2[%201, %c0_96, %c0_97] : memref<8x16x2xbf16, #tpu.memory_space<vmem>>, vector<1x16x2xbf16>
    %203 = vector.shape_cast %202 : vector<1x16x2xbf16> to vector<16x2xbf16>
    %c0_98 = arith.constant 0 : index
    %c0_99 = arith.constant 0 : index
    %204 = vector.load %arg14[%c0_98, %c0_99] : memref<16x32xf32, #tpu.memory_space<vmem>>, vector<16x32xf32>
    %c0_100 = arith.constant 0 : index
    %c0_101 = arith.constant 0 : index
    %205 = vector.load %arg3[%c0_100, %c0_101] : memref<2x96xbf16, #tpu.memory_space<vmem>>, vector<2x96xbf16>
    %cst_102 = arith.constant dense<0.000000e+00> : vector<16x96xf32>
    %206 = tpu.matmul %203, %205, %cst_102 {dimension_numbers = #tpu.dot_dimension_numbers<[1], [0], [0], [1], [0, 0, 1, 1], [], []>} : vector<16x2xbf16>, vector<2x96xbf16>, vector<16x96xf32> -> vector<16x96xf32>
    %c0_103 = arith.constant 0 : index
    %c0_104 = arith.constant 0 : index
    %207 = vector.load %arg7[%c0_103, %c0_104] : memref<1x96xf32, #tpu.memory_space<vmem>>, vector<1x96xf32>
    %208 = vector.broadcast %207 : vector<1x96xf32> to vector<16x96xf32>
    %209 = arith.addf %206, %208 : vector<16x96xf32>
    %210 = arith.truncf %204 : vector<16x32xf32> to vector<16x32xbf16>
    %c0_105 = arith.constant 0 : index
    %c0_106 = arith.constant 0 : index
    %211 = vector.load %arg5[%c0_105, %c0_106] : memref<32x96xbf16, #tpu.memory_space<vmem>>, vector<32x96xbf16>
    %cst_107 = arith.constant dense<0.000000e+00> : vector<16x96xf32>
    %212 = tpu.matmul %210, %211, %cst_107 {dimension_numbers = #tpu.dot_dimension_numbers<[1], [0], [0], [1], [0, 0, 1, 1], [], []>} : vector<16x32xbf16>, vector<32x96xbf16>, vector<16x96xf32> -> vector<16x96xf32>
    %213 = vector.extract_strided_slice %209 {offsets = [0, 0], sizes = [16, 64], strides = [1, 1]} : vector<16x96xf32> to vector<16x64xf32>
    %214 = vector.extract_strided_slice %212 {offsets = [0, 0], sizes = [16, 64], strides = [1, 1]} : vector<16x96xf32> to vector<16x64xf32>
    %215 = arith.addf %213, %214 : vector<16x64xf32>
    %216 = arith.negf %215 : vector<16x64xf32>
    %217 = math.exp %216 : vector<16x64xf32>
    %cst_108 = arith.constant 1.000000e+00 : f32
    %218 = vector.broadcast %cst_108 : f32 to vector<16x64xf32>
    %219 = arith.addf %218, %217 : vector<16x64xf32>
    %220 = arith.divf %218, %219 : vector<16x64xf32>
    %221 = vector.extract_strided_slice %220 {offsets = [0, 0], sizes = [16, 32], strides = [1, 1]} : vector<16x64xf32> to vector<16x32xf32>
    %222 = vector.extract_strided_slice %220 {offsets = [0, 32], sizes = [16, 32], strides = [1, 1]} : vector<16x64xf32> to vector<16x32xf32>
    %223 = vector.extract_strided_slice %209 {offsets = [0, 64], sizes = [16, 32], strides = [1, 1]} : vector<16x96xf32> to vector<16x32xf32>
    %224 = vector.extract_strided_slice %212 {offsets = [0, 64], sizes = [16, 32], strides = [1, 1]} : vector<16x96xf32> to vector<16x32xf32>
    %c0_109 = arith.constant 0 : index
    %c0_110 = arith.constant 0 : index
    %225 = vector.load %arg9[%c0_109, %c0_110] : memref<1x32xf32, #tpu.memory_space<vmem>>, vector<1x32xf32>
    %226 = vector.broadcast %225 : vector<1x32xf32> to vector<16x32xf32>
    %227 = arith.addf %224, %226 : vector<16x32xf32>
    %228 = arith.mulf %221, %227 : vector<16x32xf32>
    %229 = arith.addf %223, %228 : vector<16x32xf32>
    %230 = math.tanh %229 : vector<16x32xf32>
    %231 = arith.subf %204, %230 : vector<16x32xf32>
    %232 = arith.mulf %222, %231 : vector<16x32xf32>
    %233 = arith.addf %230, %232 : vector<16x32xf32>
    %c0_111 = arith.constant 0 : index
    %c0_112 = arith.constant 0 : index
    %234 = vector.load %arg14[%c0_111, %c0_112] : memref<16x32xf32, #tpu.memory_space<vmem>>, vector<16x32xf32>
    tpu.vector_store %arg14[%c0_111, %c0_112], %233 {strides = array<i32>} : memref<16x32xf32, #tpu.memory_space<vmem>>, vector<16x32xf32>,
    %235 = arith.truncf %233 : vector<16x32xf32> to vector<16x32xbf16>
    %c0_113 = arith.constant 0 : index
    %c0_114 = arith.constant 0 : index
    %236 = vector.load %arg15[%c0_113, %c0_114] : memref<16x32xf32, #tpu.memory_space<vmem>>, vector<16x32xf32>
    %c0_115 = arith.constant 0 : index
    %c0_116 = arith.constant 0 : index
    %237 = vector.load %arg4[%c0_115, %c0_116] : memref<32x96xbf16, #tpu.memory_space<vmem>>, vector<32x96xbf16>
    %cst_117 = arith.constant dense<0.000000e+00> : vector<16x96xf32>
    %238 = tpu.matmul %235, %237, %cst_117 {dimension_numbers = #tpu.dot_dimension_numbers<[1], [0], [0], [1], [0, 0, 1, 1], [], []>} : vector<16x32xbf16>, vector<32x96xbf16>, vector<16x96xf32> -> vector<16x96xf32>
    %c0_118 = arith.constant 0 : index
    %c0_119 = arith.constant 0 : index
    %239 = vector.load %arg8[%c0_118, %c0_119] : memref<1x96xf32, #tpu.memory_space<vmem>>, vector<1x96xf32>
    %240 = vector.broadcast %239 : vector<1x96xf32> to vector<16x96xf32>
    %241 = arith.addf %238, %240 : vector<16x96xf32>
    %242 = arith.truncf %236 : vector<16x32xf32> to vector<16x32xbf16>
    %c0_120 = arith.constant 0 : index
    %c0_121 = arith.constant 0 : index
    %243 = vector.load %arg6[%c0_120, %c0_121] : memref<32x96xbf16, #tpu.memory_space<vmem>>, vector<32x96xbf16>
    %cst_122 = arith.constant dense<0.000000e+00> : vector<16x96xf32>
    %244 = tpu.matmul %242, %243, %cst_122 {dimension_numbers = #tpu.dot_dimension_numbers<[1], [0], [0], [1], [0, 0, 1, 1], [], []>} : vector<16x32xbf16>, vector<32x96xbf16>, vector<16x96xf32> -> vector<16x96xf32>
    %245 = vector.extract_strided_slice %241 {offsets = [0, 0], sizes = [16, 64], strides = [1, 1]} : vector<16x96xf32> to vector<16x64xf32>
    %246 = vector.extract_strided_slice %244 {offsets = [0, 0], sizes = [16, 64], strides = [1, 1]} : vector<16x96xf32> to vector<16x64xf32>
    %247 = arith.addf %245, %246 : vector<16x64xf32>
    %248 = arith.negf %247 : vector<16x64xf32>
    %249 = math.exp %248 : vector<16x64xf32>
    %cst_123 = arith.constant 1.000000e+00 : f32
    %250 = vector.broadcast %cst_123 : f32 to vector<16x64xf32>
    %251 = arith.addf %250, %249 : vector<16x64xf32>
    %252 = arith.divf %250, %251 : vector<16x64xf32>
    %253 = vector.extract_strided_slice %252 {offsets = [0, 0], sizes = [16, 32], strides = [1, 1]} : vector<16x64xf32> to vector<16x32xf32>
    %254 = vector.extract_strided_slice %252 {offsets = [0, 32], sizes = [16, 32], strides = [1, 1]} : vector<16x64xf32> to vector<16x32xf32>
    %255 = vector.extract_strided_slice %241 {offsets = [0, 64], sizes = [16, 32], strides = [1, 1]} : vector<16x96xf32> to vector<16x32xf32>
    %256 = vector.extract_strided_slice %244 {offsets = [0, 64], sizes = [16, 32], strides = [1, 1]} : vector<16x96xf32> to vector<16x32xf32>
    %c0_124 = arith.constant 0 : index
    %c0_125 = arith.constant 0 : index
    %257 = vector.load %arg10[%c0_124, %c0_125] : memref<1x32xf32, #tpu.memory_space<vmem>>, vector<1x32xf32>
    %258 = vector.broadcast %257 : vector<1x32xf32> to vector<16x32xf32>
    %259 = arith.addf %256, %258 : vector<16x32xf32>
    %260 = arith.mulf %253, %259 : vector<16x32xf32>
    %261 = arith.addf %255, %260 : vector<16x32xf32>
    %262 = math.tanh %261 : vector<16x32xf32>
    %263 = arith.subf %236, %262 : vector<16x32xf32>
    %264 = arith.mulf %254, %263 : vector<16x32xf32>
    %265 = arith.addf %262, %264 : vector<16x32xf32>
    %c0_126 = arith.constant 0 : index
    %c0_127 = arith.constant 0 : index
    %266 = vector.load %arg15[%c0_126, %c0_127] : memref<16x32xf32, #tpu.memory_space<vmem>>, vector<16x32xf32>
    tpu.vector_store %arg15[%c0_126, %c0_127], %265 {strides = array<i32>} : memref<16x32xf32, #tpu.memory_space<vmem>>, vector<16x32xf32>,
    %c4_i32 = arith.constant 4 : i32
    %267 = arith.index_cast %c4_i32 : i32 to index
    %c0_128 = arith.constant 0 : index
    %c0_129 = arith.constant 0 : index
    %268 = vector.load %arg2[%267, %c0_128, %c0_129] : memref<8x16x2xbf16, #tpu.memory_space<vmem>>, vector<1x16x2xbf16>
    %269 = vector.shape_cast %268 : vector<1x16x2xbf16> to vector<16x2xbf16>
    %c0_130 = arith.constant 0 : index
    %c0_131 = arith.constant 0 : index
    %270 = vector.load %arg14[%c0_130, %c0_131] : memref<16x32xf32, #tpu.memory_space<vmem>>, vector<16x32xf32>
    %c0_132 = arith.constant 0 : index
    %c0_133 = arith.constant 0 : index
    %271 = vector.load %arg3[%c0_132, %c0_133] : memref<2x96xbf16, #tpu.memory_space<vmem>>, vector<2x96xbf16>
    %cst_134 = arith.constant dense<0.000000e+00> : vector<16x96xf32>
    %272 = tpu.matmul %269, %271, %cst_134 {dimension_numbers = #tpu.dot_dimension_numbers<[1], [0], [0], [1], [0, 0, 1, 1], [], []>} : vector<16x2xbf16>, vector<2x96xbf16>, vector<16x96xf32> -> vector<16x96xf32>
    %c0_135 = arith.constant 0 : index
    %c0_136 = arith.constant 0 : index
    %273 = vector.load %arg7[%c0_135, %c0_136] : memref<1x96xf32, #tpu.memory_space<vmem>>, vector<1x96xf32>
    %274 = vector.broadcast %273 : vector<1x96xf32> to vector<16x96xf32>
    %275 = arith.addf %272, %274 : vector<16x96xf32>
    %276 = arith.truncf %270 : vector<16x32xf32> to vector<16x32xbf16>
    %c0_137 = arith.constant 0 : index
    %c0_138 = arith.constant 0 : index
    %277 = vector.load %arg5[%c0_137, %c0_138] : memref<32x96xbf16, #tpu.memory_space<vmem>>, vector<32x96xbf16>
    %cst_139 = arith.constant dense<0.000000e+00> : vector<16x96xf32>
    %278 = tpu.matmul %276, %277, %cst_139 {dimension_numbers = #tpu.dot_dimension_numbers<[1], [0], [0], [1], [0, 0, 1, 1], [], []>} : vector<16x32xbf16>, vector<32x96xbf16>, vector<16x96xf32> -> vector<16x96xf32>
    %279 = vector.extract_strided_slice %275 {offsets = [0, 0], sizes = [16, 64], strides = [1, 1]} : vector<16x96xf32> to vector<16x64xf32>
    %280 = vector.extract_strided_slice %278 {offsets = [0, 0], sizes = [16, 64], strides = [1, 1]} : vector<16x96xf32> to vector<16x64xf32>
    %281 = arith.addf %279, %280 : vector<16x64xf32>
    %282 = arith.negf %281 : vector<16x64xf32>
    %283 = math.exp %282 : vector<16x64xf32>
    %cst_140 = arith.constant 1.000000e+00 : f32
    %284 = vector.broadcast %cst_140 : f32 to vector<16x64xf32>
    %285 = arith.addf %284, %283 : vector<16x64xf32>
    %286 = arith.divf %284, %285 : vector<16x64xf32>
    %287 = vector.extract_strided_slice %286 {offsets = [0, 0], sizes = [16, 32], strides = [1, 1]} : vector<16x64xf32> to vector<16x32xf32>
    %288 = vector.extract_strided_slice %286 {offsets = [0, 32], sizes = [16, 32], strides = [1, 1]} : vector<16x64xf32> to vector<16x32xf32>
    %289 = vector.extract_strided_slice %275 {offsets = [0, 64], sizes = [16, 32], strides = [1, 1]} : vector<16x96xf32> to vector<16x32xf32>
    %290 = vector.extract_strided_slice %278 {offsets = [0, 64], sizes = [16, 32], strides = [1, 1]} : vector<16x96xf32> to vector<16x32xf32>
    %c0_141 = arith.constant 0 : index
    %c0_142 = arith.constant 0 : index
    %291 = vector.load %arg9[%c0_141, %c0_142] : memref<1x32xf32, #tpu.memory_space<vmem>>, vector<1x32xf32>
    %292 = vector.broadcast %291 : vector<1x32xf32> to vector<16x32xf32>
    %293 = arith.addf %290, %292 : vector<16x32xf32>
    %294 = arith.mulf %287, %293 : vector<16x32xf32>
    %295 = arith.addf %289, %294 : vector<16x32xf32>
    %296 = math.tanh %295 : vector<16x32xf32>
    %297 = arith.subf %270, %296 : vector<16x32xf32>
    %298 = arith.mulf %288, %297 : vector<16x32xf32>
    %299 = arith.addf %296, %298 : vector<16x32xf32>
    %c0_143 = arith.constant 0 : index
    %c0_144 = arith.constant 0 : index
    %300 = vector.load %arg14[%c0_143, %c0_144] : memref<16x32xf32, #tpu.memory_space<vmem>>, vector<16x32xf32>
    tpu.vector_store %arg14[%c0_143, %c0_144], %299 {strides = array<i32>} : memref<16x32xf32, #tpu.memory_space<vmem>>, vector<16x32xf32>,
    %301 = arith.truncf %299 : vector<16x32xf32> to vector<16x32xbf16>
    %c0_145 = arith.constant 0 : index
    %c0_146 = arith.constant 0 : index
    %302 = vector.load %arg15[%c0_145, %c0_146] : memref<16x32xf32, #tpu.memory_space<vmem>>, vector<16x32xf32>
    %c0_147 = arith.constant 0 : index
    %c0_148 = arith.constant 0 : index
    %303 = vector.load %arg4[%c0_147, %c0_148] : memref<32x96xbf16, #tpu.memory_space<vmem>>, vector<32x96xbf16>
    %cst_149 = arith.constant dense<0.000000e+00> : vector<16x96xf32>
    %304 = tpu.matmul %301, %303, %cst_149 {dimension_numbers = #tpu.dot_dimension_numbers<[1], [0], [0], [1], [0, 0, 1, 1], [], []>} : vector<16x32xbf16>, vector<32x96xbf16>, vector<16x96xf32> -> vector<16x96xf32>
    %c0_150 = arith.constant 0 : index
    %c0_151 = arith.constant 0 : index
    %305 = vector.load %arg8[%c0_150, %c0_151] : memref<1x96xf32, #tpu.memory_space<vmem>>, vector<1x96xf32>
    %306 = vector.broadcast %305 : vector<1x96xf32> to vector<16x96xf32>
    %307 = arith.addf %304, %306 : vector<16x96xf32>
    %308 = arith.truncf %302 : vector<16x32xf32> to vector<16x32xbf16>
    %c0_152 = arith.constant 0 : index
    %c0_153 = arith.constant 0 : index
    %309 = vector.load %arg6[%c0_152, %c0_153] : memref<32x96xbf16, #tpu.memory_space<vmem>>, vector<32x96xbf16>
    %cst_154 = arith.constant dense<0.000000e+00> : vector<16x96xf32>
    %310 = tpu.matmul %308, %309, %cst_154 {dimension_numbers = #tpu.dot_dimension_numbers<[1], [0], [0], [1], [0, 0, 1, 1], [], []>} : vector<16x32xbf16>, vector<32x96xbf16>, vector<16x96xf32> -> vector<16x96xf32>
    %311 = vector.extract_strided_slice %307 {offsets = [0, 0], sizes = [16, 64], strides = [1, 1]} : vector<16x96xf32> to vector<16x64xf32>
    %312 = vector.extract_strided_slice %310 {offsets = [0, 0], sizes = [16, 64], strides = [1, 1]} : vector<16x96xf32> to vector<16x64xf32>
    %313 = arith.addf %311, %312 : vector<16x64xf32>
    %314 = arith.negf %313 : vector<16x64xf32>
    %315 = math.exp %314 : vector<16x64xf32>
    %cst_155 = arith.constant 1.000000e+00 : f32
    %316 = vector.broadcast %cst_155 : f32 to vector<16x64xf32>
    %317 = arith.addf %316, %315 : vector<16x64xf32>
    %318 = arith.divf %316, %317 : vector<16x64xf32>
    %319 = vector.extract_strided_slice %318 {offsets = [0, 0], sizes = [16, 32], strides = [1, 1]} : vector<16x64xf32> to vector<16x32xf32>
    %320 = vector.extract_strided_slice %318 {offsets = [0, 32], sizes = [16, 32], strides = [1, 1]} : vector<16x64xf32> to vector<16x32xf32>
    %321 = vector.extract_strided_slice %307 {offsets = [0, 64], sizes = [16, 32], strides = [1, 1]} : vector<16x96xf32> to vector<16x32xf32>
    %322 = vector.extract_strided_slice %310 {offsets = [0, 64], sizes = [16, 32], strides = [1, 1]} : vector<16x96xf32> to vector<16x32xf32>
    %c0_156 = arith.constant 0 : index
    %c0_157 = arith.constant 0 : index
    %323 = vector.load %arg10[%c0_156, %c0_157] : memref<1x32xf32, #tpu.memory_space<vmem>>, vector<1x32xf32>
    %324 = vector.broadcast %323 : vector<1x32xf32> to vector<16x32xf32>
    %325 = arith.addf %322, %324 : vector<16x32xf32>
    %326 = arith.mulf %319, %325 : vector<16x32xf32>
    %327 = arith.addf %321, %326 : vector<16x32xf32>
    %328 = math.tanh %327 : vector<16x32xf32>
    %329 = arith.subf %302, %328 : vector<16x32xf32>
    %330 = arith.mulf %320, %329 : vector<16x32xf32>
    %331 = arith.addf %328, %330 : vector<16x32xf32>
    %c0_158 = arith.constant 0 : index
    %c0_159 = arith.constant 0 : index
    %332 = vector.load %arg15[%c0_158, %c0_159] : memref<16x32xf32, #tpu.memory_space<vmem>>, vector<16x32xf32>
    tpu.vector_store %arg15[%c0_158, %c0_159], %331 {strides = array<i32>} : memref<16x32xf32, #tpu.memory_space<vmem>>, vector<16x32xf32>,
    %c5_i32 = arith.constant 5 : i32
    %333 = arith.index_cast %c5_i32 : i32 to index
    %c0_160 = arith.constant 0 : index
    %c0_161 = arith.constant 0 : index
    %334 = vector.load %arg2[%333, %c0_160, %c0_161] : memref<8x16x2xbf16, #tpu.memory_space<vmem>>, vector<1x16x2xbf16>
    %335 = vector.shape_cast %334 : vector<1x16x2xbf16> to vector<16x2xbf16>
    %c0_162 = arith.constant 0 : index
    %c0_163 = arith.constant 0 : index
    %336 = vector.load %arg14[%c0_162, %c0_163] : memref<16x32xf32, #tpu.memory_space<vmem>>, vector<16x32xf32>
    %c0_164 = arith.constant 0 : index
    %c0_165 = arith.constant 0 : index
    %337 = vector.load %arg3[%c0_164, %c0_165] : memref<2x96xbf16, #tpu.memory_space<vmem>>, vector<2x96xbf16>
    %cst_166 = arith.constant dense<0.000000e+00> : vector<16x96xf32>
    %338 = tpu.matmul %335, %337, %cst_166 {dimension_numbers = #tpu.dot_dimension_numbers<[1], [0], [0], [1], [0, 0, 1, 1], [], []>} : vector<16x2xbf16>, vector<2x96xbf16>, vector<16x96xf32> -> vector<16x96xf32>
    %c0_167 = arith.constant 0 : index
    %c0_168 = arith.constant 0 : index
    %339 = vector.load %arg7[%c0_167, %c0_168] : memref<1x96xf32, #tpu.memory_space<vmem>>, vector<1x96xf32>
    %340 = vector.broadcast %339 : vector<1x96xf32> to vector<16x96xf32>
    %341 = arith.addf %338, %340 : vector<16x96xf32>
    %342 = arith.truncf %336 : vector<16x32xf32> to vector<16x32xbf16>
    %c0_169 = arith.constant 0 : index
    %c0_170 = arith.constant 0 : index
    %343 = vector.load %arg5[%c0_169, %c0_170] : memref<32x96xbf16, #tpu.memory_space<vmem>>, vector<32x96xbf16>
    %cst_171 = arith.constant dense<0.000000e+00> : vector<16x96xf32>
    %344 = tpu.matmul %342, %343, %cst_171 {dimension_numbers = #tpu.dot_dimension_numbers<[1], [0], [0], [1], [0, 0, 1, 1], [], []>} : vector<16x32xbf16>, vector<32x96xbf16>, vector<16x96xf32> -> vector<16x96xf32>
    %345 = vector.extract_strided_slice %341 {offsets = [0, 0], sizes = [16, 64], strides = [1, 1]} : vector<16x96xf32> to vector<16x64xf32>
    %346 = vector.extract_strided_slice %344 {offsets = [0, 0], sizes = [16, 64], strides = [1, 1]} : vector<16x96xf32> to vector<16x64xf32>
    %347 = arith.addf %345, %346 : vector<16x64xf32>
    %348 = arith.negf %347 : vector<16x64xf32>
    %349 = math.exp %348 : vector<16x64xf32>
    %cst_172 = arith.constant 1.000000e+00 : f32
    %350 = vector.broadcast %cst_172 : f32 to vector<16x64xf32>
    %351 = arith.addf %350, %349 : vector<16x64xf32>
    %352 = arith.divf %350, %351 : vector<16x64xf32>
    %353 = vector.extract_strided_slice %352 {offsets = [0, 0], sizes = [16, 32], strides = [1, 1]} : vector<16x64xf32> to vector<16x32xf32>
    %354 = vector.extract_strided_slice %352 {offsets = [0, 32], sizes = [16, 32], strides = [1, 1]} : vector<16x64xf32> to vector<16x32xf32>
    %355 = vector.extract_strided_slice %341 {offsets = [0, 64], sizes = [16, 32], strides = [1, 1]} : vector<16x96xf32> to vector<16x32xf32>
    %356 = vector.extract_strided_slice %344 {offsets = [0, 64], sizes = [16, 32], strides = [1, 1]} : vector<16x96xf32> to vector<16x32xf32>
    %c0_173 = arith.constant 0 : index
    %c0_174 = arith.constant 0 : index
    %357 = vector.load %arg9[%c0_173, %c0_174] : memref<1x32xf32, #tpu.memory_space<vmem>>, vector<1x32xf32>
    %358 = vector.broadcast %357 : vector<1x32xf32> to vector<16x32xf32>
    %359 = arith.addf %356, %358 : vector<16x32xf32>
    %360 = arith.mulf %353, %359 : vector<16x32xf32>
    %361 = arith.addf %355, %360 : vector<16x32xf32>
    %362 = math.tanh %361 : vector<16x32xf32>
    %363 = arith.subf %336, %362 : vector<16x32xf32>
    %364 = arith.mulf %354, %363 : vector<16x32xf32>
    %365 = arith.addf %362, %364 : vector<16x32xf32>
    %c0_175 = arith.constant 0 : index
    %c0_176 = arith.constant 0 : index
    %366 = vector.load %arg14[%c0_175, %c0_176] : memref<16x32xf32, #tpu.memory_space<vmem>>, vector<16x32xf32>
    tpu.vector_store %arg14[%c0_175, %c0_176], %365 {strides = array<i32>} : memref<16x32xf32, #tpu.memory_space<vmem>>, vector<16x32xf32>,
    %367 = arith.truncf %365 : vector<16x32xf32> to vector<16x32xbf16>
    %c0_177 = arith.constant 0 : index
    %c0_178 = arith.constant 0 : index
    %368 = vector.load %arg15[%c0_177, %c0_178] : memref<16x32xf32, #tpu.memory_space<vmem>>, vector<16x32xf32>
    %c0_179 = arith.constant 0 : index
    %c0_180 = arith.constant 0 : index
    %369 = vector.load %arg4[%c0_179, %c0_180] : memref<32x96xbf16, #tpu.memory_space<vmem>>, vector<32x96xbf16>
    %cst_181 = arith.constant dense<0.000000e+00> : vector<16x96xf32>
    %370 = tpu.matmul %367, %369, %cst_181 {dimension_numbers = #tpu.dot_dimension_numbers<[1], [0], [0], [1], [0, 0, 1, 1], [], []>} : vector<16x32xbf16>, vector<32x96xbf16>, vector<16x96xf32> -> vector<16x96xf32>
    %c0_182 = arith.constant 0 : index
    %c0_183 = arith.constant 0 : index
    %371 = vector.load %arg8[%c0_182, %c0_183] : memref<1x96xf32, #tpu.memory_space<vmem>>, vector<1x96xf32>
    %372 = vector.broadcast %371 : vector<1x96xf32> to vector<16x96xf32>
    %373 = arith.addf %370, %372 : vector<16x96xf32>
    %374 = arith.truncf %368 : vector<16x32xf32> to vector<16x32xbf16>
    %c0_184 = arith.constant 0 : index
    %c0_185 = arith.constant 0 : index
    %375 = vector.load %arg6[%c0_184, %c0_185] : memref<32x96xbf16, #tpu.memory_space<vmem>>, vector<32x96xbf16>
    %cst_186 = arith.constant dense<0.000000e+00> : vector<16x96xf32>
    %376 = tpu.matmul %374, %375, %cst_186 {dimension_numbers = #tpu.dot_dimension_numbers<[1], [0], [0], [1], [0, 0, 1, 1], [], []>} : vector<16x32xbf16>, vector<32x96xbf16>, vector<16x96xf32> -> vector<16x96xf32>
    %377 = vector.extract_strided_slice %373 {offsets = [0, 0], sizes = [16, 64], strides = [1, 1]} : vector<16x96xf32> to vector<16x64xf32>
    %378 = vector.extract_strided_slice %376 {offsets = [0, 0], sizes = [16, 64], strides = [1, 1]} : vector<16x96xf32> to vector<16x64xf32>
    %379 = arith.addf %377, %378 : vector<16x64xf32>
    %380 = arith.negf %379 : vector<16x64xf32>
    %381 = math.exp %380 : vector<16x64xf32>
    %cst_187 = arith.constant 1.000000e+00 : f32
    %382 = vector.broadcast %cst_187 : f32 to vector<16x64xf32>
    %383 = arith.addf %382, %381 : vector<16x64xf32>
    %384 = arith.divf %382, %383 : vector<16x64xf32>
    %385 = vector.extract_strided_slice %384 {offsets = [0, 0], sizes = [16, 32], strides = [1, 1]} : vector<16x64xf32> to vector<16x32xf32>
    %386 = vector.extract_strided_slice %384 {offsets = [0, 32], sizes = [16, 32], strides = [1, 1]} : vector<16x64xf32> to vector<16x32xf32>
    %387 = vector.extract_strided_slice %373 {offsets = [0, 64], sizes = [16, 32], strides = [1, 1]} : vector<16x96xf32> to vector<16x32xf32>
    %388 = vector.extract_strided_slice %376 {offsets = [0, 64], sizes = [16, 32], strides = [1, 1]} : vector<16x96xf32> to vector<16x32xf32>
    %c0_188 = arith.constant 0 : index
    %c0_189 = arith.constant 0 : index
    %389 = vector.load %arg10[%c0_188, %c0_189] : memref<1x32xf32, #tpu.memory_space<vmem>>, vector<1x32xf32>
    %390 = vector.broadcast %389 : vector<1x32xf32> to vector<16x32xf32>
    %391 = arith.addf %388, %390 : vector<16x32xf32>
    %392 = arith.mulf %385, %391 : vector<16x32xf32>
    %393 = arith.addf %387, %392 : vector<16x32xf32>
    %394 = math.tanh %393 : vector<16x32xf32>
    %395 = arith.subf %368, %394 : vector<16x32xf32>
    %396 = arith.mulf %386, %395 : vector<16x32xf32>
    %397 = arith.addf %394, %396 : vector<16x32xf32>
    %c0_190 = arith.constant 0 : index
    %c0_191 = arith.constant 0 : index
    %398 = vector.load %arg15[%c0_190, %c0_191] : memref<16x32xf32, #tpu.memory_space<vmem>>, vector<16x32xf32>
    tpu.vector_store %arg15[%c0_190, %c0_191], %397 {strides = array<i32>} : memref<16x32xf32, #tpu.memory_space<vmem>>, vector<16x32xf32>,
    %c6_i32 = arith.constant 6 : i32
    %399 = arith.index_cast %c6_i32 : i32 to index
    %c0_192 = arith.constant 0 : index
    %c0_193 = arith.constant 0 : index
    %400 = vector.load %arg2[%399, %c0_192, %c0_193] : memref<8x16x2xbf16, #tpu.memory_space<vmem>>, vector<1x16x2xbf16>
    %401 = vector.shape_cast %400 : vector<1x16x2xbf16> to vector<16x2xbf16>
    %c0_194 = arith.constant 0 : index
    %c0_195 = arith.constant 0 : index
    %402 = vector.load %arg14[%c0_194, %c0_195] : memref<16x32xf32, #tpu.memory_space<vmem>>, vector<16x32xf32>
    %c0_196 = arith.constant 0 : index
    %c0_197 = arith.constant 0 : index
    %403 = vector.load %arg3[%c0_196, %c0_197] : memref<2x96xbf16, #tpu.memory_space<vmem>>, vector<2x96xbf16>
    %cst_198 = arith.constant dense<0.000000e+00> : vector<16x96xf32>
    %404 = tpu.matmul %401, %403, %cst_198 {dimension_numbers = #tpu.dot_dimension_numbers<[1], [0], [0], [1], [0, 0, 1, 1], [], []>} : vector<16x2xbf16>, vector<2x96xbf16>, vector<16x96xf32> -> vector<16x96xf32>
    %c0_199 = arith.constant 0 : index
    %c0_200 = arith.constant 0 : index
    %405 = vector.load %arg7[%c0_199, %c0_200] : memref<1x96xf32, #tpu.memory_space<vmem>>, vector<1x96xf32>
    %406 = vector.broadcast %405 : vector<1x96xf32> to vector<16x96xf32>
    %407 = arith.addf %404, %406 : vector<16x96xf32>
    %408 = arith.truncf %402 : vector<16x32xf32> to vector<16x32xbf16>
    %c0_201 = arith.constant 0 : index
    %c0_202 = arith.constant 0 : index
    %409 = vector.load %arg5[%c0_201, %c0_202] : memref<32x96xbf16, #tpu.memory_space<vmem>>, vector<32x96xbf16>
    %cst_203 = arith.constant dense<0.000000e+00> : vector<16x96xf32>
    %410 = tpu.matmul %408, %409, %cst_203 {dimension_numbers = #tpu.dot_dimension_numbers<[1], [0], [0], [1], [0, 0, 1, 1], [], []>} : vector<16x32xbf16>, vector<32x96xbf16>, vector<16x96xf32> -> vector<16x96xf32>
    %411 = vector.extract_strided_slice %407 {offsets = [0, 0], sizes = [16, 64], strides = [1, 1]} : vector<16x96xf32> to vector<16x64xf32>
    %412 = vector.extract_strided_slice %410 {offsets = [0, 0], sizes = [16, 64], strides = [1, 1]} : vector<16x96xf32> to vector<16x64xf32>
    %413 = arith.addf %411, %412 : vector<16x64xf32>
    %414 = arith.negf %413 : vector<16x64xf32>
    %415 = math.exp %414 : vector<16x64xf32>
    %cst_204 = arith.constant 1.000000e+00 : f32
    %416 = vector.broadcast %cst_204 : f32 to vector<16x64xf32>
    %417 = arith.addf %416, %415 : vector<16x64xf32>
    %418 = arith.divf %416, %417 : vector<16x64xf32>
    %419 = vector.extract_strided_slice %418 {offsets = [0, 0], sizes = [16, 32], strides = [1, 1]} : vector<16x64xf32> to vector<16x32xf32>
    %420 = vector.extract_strided_slice %418 {offsets = [0, 32], sizes = [16, 32], strides = [1, 1]} : vector<16x64xf32> to vector<16x32xf32>
    %421 = vector.extract_strided_slice %407 {offsets = [0, 64], sizes = [16, 32], strides = [1, 1]} : vector<16x96xf32> to vector<16x32xf32>
    %422 = vector.extract_strided_slice %410 {offsets = [0, 64], sizes = [16, 32], strides = [1, 1]} : vector<16x96xf32> to vector<16x32xf32>
    %c0_205 = arith.constant 0 : index
    %c0_206 = arith.constant 0 : index
    %423 = vector.load %arg9[%c0_205, %c0_206] : memref<1x32xf32, #tpu.memory_space<vmem>>, vector<1x32xf32>
    %424 = vector.broadcast %423 : vector<1x32xf32> to vector<16x32xf32>
    %425 = arith.addf %422, %424 : vector<16x32xf32>
    %426 = arith.mulf %419, %425 : vector<16x32xf32>
    %427 = arith.addf %421, %426 : vector<16x32xf32>
    %428 = math.tanh %427 : vector<16x32xf32>
    %429 = arith.subf %402, %428 : vector<16x32xf32>
    %430 = arith.mulf %420, %429 : vector<16x32xf32>
    %431 = arith.addf %428, %430 : vector<16x32xf32>
    %c0_207 = arith.constant 0 : index
    %c0_208 = arith.constant 0 : index
    %432 = vector.load %arg14[%c0_207, %c0_208] : memref<16x32xf32, #tpu.memory_space<vmem>>, vector<16x32xf32>
    tpu.vector_store %arg14[%c0_207, %c0_208], %431 {strides = array<i32>} : memref<16x32xf32, #tpu.memory_space<vmem>>, vector<16x32xf32>,
    %433 = arith.truncf %431 : vector<16x32xf32> to vector<16x32xbf16>
    %c0_209 = arith.constant 0 : index
    %c0_210 = arith.constant 0 : index
    %434 = vector.load %arg15[%c0_209, %c0_210] : memref<16x32xf32, #tpu.memory_space<vmem>>, vector<16x32xf32>
    %c0_211 = arith.constant 0 : index
    %c0_212 = arith.constant 0 : index
    %435 = vector.load %arg4[%c0_211, %c0_212] : memref<32x96xbf16, #tpu.memory_space<vmem>>, vector<32x96xbf16>
    %cst_213 = arith.constant dense<0.000000e+00> : vector<16x96xf32>
    %436 = tpu.matmul %433, %435, %cst_213 {dimension_numbers = #tpu.dot_dimension_numbers<[1], [0], [0], [1], [0, 0, 1, 1], [], []>} : vector<16x32xbf16>, vector<32x96xbf16>, vector<16x96xf32> -> vector<16x96xf32>
    %c0_214 = arith.constant 0 : index
    %c0_215 = arith.constant 0 : index
    %437 = vector.load %arg8[%c0_214, %c0_215] : memref<1x96xf32, #tpu.memory_space<vmem>>, vector<1x96xf32>
    %438 = vector.broadcast %437 : vector<1x96xf32> to vector<16x96xf32>
    %439 = arith.addf %436, %438 : vector<16x96xf32>
    %440 = arith.truncf %434 : vector<16x32xf32> to vector<16x32xbf16>
    %c0_216 = arith.constant 0 : index
    %c0_217 = arith.constant 0 : index
    %441 = vector.load %arg6[%c0_216, %c0_217] : memref<32x96xbf16, #tpu.memory_space<vmem>>, vector<32x96xbf16>
    %cst_218 = arith.constant dense<0.000000e+00> : vector<16x96xf32>
    %442 = tpu.matmul %440, %441, %cst_218 {dimension_numbers = #tpu.dot_dimension_numbers<[1], [0], [0], [1], [0, 0, 1, 1], [], []>} : vector<16x32xbf16>, vector<32x96xbf16>, vector<16x96xf32> -> vector<16x96xf32>
    %443 = vector.extract_strided_slice %439 {offsets = [0, 0], sizes = [16, 64], strides = [1, 1]} : vector<16x96xf32> to vector<16x64xf32>
    %444 = vector.extract_strided_slice %442 {offsets = [0, 0], sizes = [16, 64], strides = [1, 1]} : vector<16x96xf32> to vector<16x64xf32>
    %445 = arith.addf %443, %444 : vector<16x64xf32>
    %446 = arith.negf %445 : vector<16x64xf32>
    %447 = math.exp %446 : vector<16x64xf32>
    %cst_219 = arith.constant 1.000000e+00 : f32
    %448 = vector.broadcast %cst_219 : f32 to vector<16x64xf32>
    %449 = arith.addf %448, %447 : vector<16x64xf32>
    %450 = arith.divf %448, %449 : vector<16x64xf32>
    %451 = vector.extract_strided_slice %450 {offsets = [0, 0], sizes = [16, 32], strides = [1, 1]} : vector<16x64xf32> to vector<16x32xf32>
    %452 = vector.extract_strided_slice %450 {offsets = [0, 32], sizes = [16, 32], strides = [1, 1]} : vector<16x64xf32> to vector<16x32xf32>
    %453 = vector.extract_strided_slice %439 {offsets = [0, 64], sizes = [16, 32], strides = [1, 1]} : vector<16x96xf32> to vector<16x32xf32>
    %454 = vector.extract_strided_slice %442 {offsets = [0, 64], sizes = [16, 32], strides = [1, 1]} : vector<16x96xf32> to vector<16x32xf32>
    %c0_220 = arith.constant 0 : index
    %c0_221 = arith.constant 0 : index
    %455 = vector.load %arg10[%c0_220, %c0_221] : memref<1x32xf32, #tpu.memory_space<vmem>>, vector<1x32xf32>
    %456 = vector.broadcast %455 : vector<1x32xf32> to vector<16x32xf32>
    %457 = arith.addf %454, %456 : vector<16x32xf32>
    %458 = arith.mulf %451, %457 : vector<16x32xf32>
    %459 = arith.addf %453, %458 : vector<16x32xf32>
    %460 = math.tanh %459 : vector<16x32xf32>
    %461 = arith.subf %434, %460 : vector<16x32xf32>
    %462 = arith.mulf %452, %461 : vector<16x32xf32>
    %463 = arith.addf %460, %462 : vector<16x32xf32>
    %c0_222 = arith.constant 0 : index
    %c0_223 = arith.constant 0 : index
    %464 = vector.load %arg15[%c0_222, %c0_223] : memref<16x32xf32, #tpu.memory_space<vmem>>, vector<16x32xf32>
    tpu.vector_store %arg15[%c0_222, %c0_223], %463 {strides = array<i32>} : memref<16x32xf32, #tpu.memory_space<vmem>>, vector<16x32xf32>,
    %c7_i32 = arith.constant 7 : i32
    %465 = arith.index_cast %c7_i32 : i32 to index
    %c0_224 = arith.constant 0 : index
    %c0_225 = arith.constant 0 : index
    %466 = vector.load %arg2[%465, %c0_224, %c0_225] : memref<8x16x2xbf16, #tpu.memory_space<vmem>>, vector<1x16x2xbf16>
    %467 = vector.shape_cast %466 : vector<1x16x2xbf16> to vector<16x2xbf16>
    %c0_226 = arith.constant 0 : index
    %c0_227 = arith.constant 0 : index
    %468 = vector.load %arg14[%c0_226, %c0_227] : memref<16x32xf32, #tpu.memory_space<vmem>>, vector<16x32xf32>
    %c0_228 = arith.constant 0 : index
    %c0_229 = arith.constant 0 : index
    %469 = vector.load %arg3[%c0_228, %c0_229] : memref<2x96xbf16, #tpu.memory_space<vmem>>, vector<2x96xbf16>
    %cst_230 = arith.constant dense<0.000000e+00> : vector<16x96xf32>
    %470 = tpu.matmul %467, %469, %cst_230 {dimension_numbers = #tpu.dot_dimension_numbers<[1], [0], [0], [1], [0, 0, 1, 1], [], []>} : vector<16x2xbf16>, vector<2x96xbf16>, vector<16x96xf32> -> vector<16x96xf32>
    %c0_231 = arith.constant 0 : index
    %c0_232 = arith.constant 0 : index
    %471 = vector.load %arg7[%c0_231, %c0_232] : memref<1x96xf32, #tpu.memory_space<vmem>>, vector<1x96xf32>
    %472 = vector.broadcast %471 : vector<1x96xf32> to vector<16x96xf32>
    %473 = arith.addf %470, %472 : vector<16x96xf32>
    %474 = arith.truncf %468 : vector<16x32xf32> to vector<16x32xbf16>
    %c0_233 = arith.constant 0 : index
    %c0_234 = arith.constant 0 : index
    %475 = vector.load %arg5[%c0_233, %c0_234] : memref<32x96xbf16, #tpu.memory_space<vmem>>, vector<32x96xbf16>
    %cst_235 = arith.constant dense<0.000000e+00> : vector<16x96xf32>
    %476 = tpu.matmul %474, %475, %cst_235 {dimension_numbers = #tpu.dot_dimension_numbers<[1], [0], [0], [1], [0, 0, 1, 1], [], []>} : vector<16x32xbf16>, vector<32x96xbf16>, vector<16x96xf32> -> vector<16x96xf32>
    %477 = vector.extract_strided_slice %473 {offsets = [0, 0], sizes = [16, 64], strides = [1, 1]} : vector<16x96xf32> to vector<16x64xf32>
    %478 = vector.extract_strided_slice %476 {offsets = [0, 0], sizes = [16, 64], strides = [1, 1]} : vector<16x96xf32> to vector<16x64xf32>
    %479 = arith.addf %477, %478 : vector<16x64xf32>
    %480 = arith.negf %479 : vector<16x64xf32>
    %481 = math.exp %480 : vector<16x64xf32>
    %cst_236 = arith.constant 1.000000e+00 : f32
    %482 = vector.broadcast %cst_236 : f32 to vector<16x64xf32>
    %483 = arith.addf %482, %481 : vector<16x64xf32>
    %484 = arith.divf %482, %483 : vector<16x64xf32>
    %485 = vector.extract_strided_slice %484 {offsets = [0, 0], sizes = [16, 32], strides = [1, 1]} : vector<16x64xf32> to vector<16x32xf32>
    %486 = vector.extract_strided_slice %484 {offsets = [0, 32], sizes = [16, 32], strides = [1, 1]} : vector<16x64xf32> to vector<16x32xf32>
    %487 = vector.extract_strided_slice %473 {offsets = [0, 64], sizes = [16, 32], strides = [1, 1]} : vector<16x96xf32> to vector<16x32xf32>
    %488 = vector.extract_strided_slice %476 {offsets = [0, 64], sizes = [16, 32], strides = [1, 1]} : vector<16x96xf32> to vector<16x32xf32>
    %c0_237 = arith.constant 0 : index
    %c0_238 = arith.constant 0 : index
    %489 = vector.load %arg9[%c0_237, %c0_238] : memref<1x32xf32, #tpu.memory_space<vmem>>, vector<1x32xf32>
    %490 = vector.broadcast %489 : vector<1x32xf32> to vector<16x32xf32>
    %491 = arith.addf %488, %490 : vector<16x32xf32>
    %492 = arith.mulf %485, %491 : vector<16x32xf32>
    %493 = arith.addf %487, %492 : vector<16x32xf32>
    %494 = math.tanh %493 : vector<16x32xf32>
    %495 = arith.subf %468, %494 : vector<16x32xf32>
    %496 = arith.mulf %486, %495 : vector<16x32xf32>
    %497 = arith.addf %494, %496 : vector<16x32xf32>
    %c0_239 = arith.constant 0 : index
    %c0_240 = arith.constant 0 : index
    %498 = vector.load %arg14[%c0_239, %c0_240] : memref<16x32xf32, #tpu.memory_space<vmem>>, vector<16x32xf32>
    tpu.vector_store %arg14[%c0_239, %c0_240], %497 {strides = array<i32>} : memref<16x32xf32, #tpu.memory_space<vmem>>, vector<16x32xf32>,
    %499 = arith.truncf %497 : vector<16x32xf32> to vector<16x32xbf16>
    %c0_241 = arith.constant 0 : index
    %c0_242 = arith.constant 0 : index
    %500 = vector.load %arg15[%c0_241, %c0_242] : memref<16x32xf32, #tpu.memory_space<vmem>>, vector<16x32xf32>
    %c0_243 = arith.constant 0 : index
    %c0_244 = arith.constant 0 : index
    %501 = vector.load %arg4[%c0_243, %c0_244] : memref<32x96xbf16, #tpu.memory_space<vmem>>, vector<32x96xbf16>
    %cst_245 = arith.constant dense<0.000000e+00> : vector<16x96xf32>
    %502 = tpu.matmul %499, %501, %cst_245 {dimension_numbers = #tpu.dot_dimension_numbers<[1], [0], [0], [1], [0, 0, 1, 1], [], []>} : vector<16x32xbf16>, vector<32x96xbf16>, vector<16x96xf32> -> vector<16x96xf32>
    %c0_246 = arith.constant 0 : index
    %c0_247 = arith.constant 0 : index
    %503 = vector.load %arg8[%c0_246, %c0_247] : memref<1x96xf32, #tpu.memory_space<vmem>>, vector<1x96xf32>
    %504 = vector.broadcast %503 : vector<1x96xf32> to vector<16x96xf32>
    %505 = arith.addf %502, %504 : vector<16x96xf32>
    %506 = arith.truncf %500 : vector<16x32xf32> to vector<16x32xbf16>
    %c0_248 = arith.constant 0 : index
    %c0_249 = arith.constant 0 : index
    %507 = vector.load %arg6[%c0_248, %c0_249] : memref<32x96xbf16, #tpu.memory_space<vmem>>, vector<32x96xbf16>
    %cst_250 = arith.constant dense<0.000000e+00> : vector<16x96xf32>
    %508 = tpu.matmul %506, %507, %cst_250 {dimension_numbers = #tpu.dot_dimension_numbers<[1], [0], [0], [1], [0, 0, 1, 1], [], []>} : vector<16x32xbf16>, vector<32x96xbf16>, vector<16x96xf32> -> vector<16x96xf32>
    %509 = vector.extract_strided_slice %505 {offsets = [0, 0], sizes = [16, 64], strides = [1, 1]} : vector<16x96xf32> to vector<16x64xf32>
    %510 = vector.extract_strided_slice %508 {offsets = [0, 0], sizes = [16, 64], strides = [1, 1]} : vector<16x96xf32> to vector<16x64xf32>
    %511 = arith.addf %509, %510 : vector<16x64xf32>
    %512 = arith.negf %511 : vector<16x64xf32>
    %513 = math.exp %512 : vector<16x64xf32>
    %cst_251 = arith.constant 1.000000e+00 : f32
    %514 = vector.broadcast %cst_251 : f32 to vector<16x64xf32>
    %515 = arith.addf %514, %513 : vector<16x64xf32>
    %516 = arith.divf %514, %515 : vector<16x64xf32>
    %517 = vector.extract_strided_slice %516 {offsets = [0, 0], sizes = [16, 32], strides = [1, 1]} : vector<16x64xf32> to vector<16x32xf32>
    %518 = vector.extract_strided_slice %516 {offsets = [0, 32], sizes = [16, 32], strides = [1, 1]} : vector<16x64xf32> to vector<16x32xf32>
    %519 = vector.extract_strided_slice %505 {offsets = [0, 64], sizes = [16, 32], strides = [1, 1]} : vector<16x96xf32> to vector<16x32xf32>
    %520 = vector.extract_strided_slice %508 {offsets = [0, 64], sizes = [16, 32], strides = [1, 1]} : vector<16x96xf32> to vector<16x32xf32>
    %c0_252 = arith.constant 0 : index
    %c0_253 = arith.constant 0 : index
    %521 = vector.load %arg10[%c0_252, %c0_253] : memref<1x32xf32, #tpu.memory_space<vmem>>, vector<1x32xf32>
    %522 = vector.broadcast %521 : vector<1x32xf32> to vector<16x32xf32>
    %523 = arith.addf %520, %522 : vector<16x32xf32>
    %524 = arith.mulf %517, %523 : vector<16x32xf32>
    %525 = arith.addf %519, %524 : vector<16x32xf32>
    %526 = math.tanh %525 : vector<16x32xf32>
    %527 = arith.subf %500, %526 : vector<16x32xf32>
    %528 = arith.mulf %518, %527 : vector<16x32xf32>
    %529 = arith.addf %526, %528 : vector<16x32xf32>
    %c0_254 = arith.constant 0 : index
    %c0_255 = arith.constant 0 : index
    %530 = vector.load %arg15[%c0_254, %c0_255] : memref<16x32xf32, #tpu.memory_space<vmem>>, vector<16x32xf32>
    tpu.vector_store %arg15[%c0_254, %c0_255], %529 {strides = array<i32>} : memref<16x32xf32, #tpu.memory_space<vmem>>, vector<16x32xf32>,
    %c8_i32 = arith.constant 8 : i32
    %c0_i32_256 = arith.constant 0 : i32
    %531 = arith.cmpi eq, %arg1, %c0_i32_256 : i32
    %532 = arith.extui %531 : i1 to i32
    %c0_i32_257 = arith.constant 0 : i32
    %533 = arith.cmpi ne, %532, %c0_i32_257 : i32
    scf.if %533 {
      %c0_258 = arith.constant 0 : index
      %c0_259 = arith.constant 0 : index
      %534 = vector.load %arg15[%c0_258, %c0_259] : memref<16x32xf32, #tpu.memory_space<vmem>>, vector<16x32xf32>
      %535 = arith.truncf %534 : vector<16x32xf32> to vector<16x32xbf16>
      %c0_260 = arith.constant 0 : index
      %c0_261 = arith.constant 0 : index
      %536 = vector.load %arg11[%c0_260, %c0_261] : memref<32x3xbf16, #tpu.memory_space<vmem>>, vector<32x3xbf16>
      %cst_262 = arith.constant dense<0.000000e+00> : vector<16x3xf32>
      %537 = tpu.matmul %535, %536, %cst_262 {dimension_numbers = #tpu.dot_dimension_numbers<[1], [0], [0], [1], [0, 0, 1, 1], [], []>} : vector<16x32xbf16>, vector<32x3xbf16>, vector<16x3xf32> -> vector<16x3xf32>
      %c0_263 = arith.constant 0 : index
      %c0_264 = arith.constant 0 : index
      %538 = vector.load %arg12[%c0_263, %c0_264] : memref<1x3xf32, #tpu.memory_space<vmem>>, vector<1x3xf32>
      %539 = vector.broadcast %538 : vector<1x3xf32> to vector<16x3xf32>
      %540 = arith.addf %537, %539 : vector<16x3xf32>
      %c0_265 = arith.constant 0 : index
      %c0_266 = arith.constant 0 : index
      %541 = vector.load %arg13[%c0_265, %c0_266] : memref<16x3xf32, #tpu.memory_space<vmem>>, vector<16x3xf32>
      tpu.vector_store %arg13[%c0_265, %c0_266], %540 {strides = array<i32>} : memref<16x3xf32, #tpu.memory_space<vmem>>, vector<16x3xf32>,
    } else {
    }
    return
  }
  func.func @transform_0(%arg0: i32, %arg1: i32) -> (i32, i32, i32) {
    %c0_i32 = arith.constant 0 : i32
    %c0_i32_0 = arith.constant 0 : i32
    return %arg1, %arg0, %c0_i32 : i32, i32, i32
  }
  func.func @transform_1(%arg0: i32, %arg1: i32) -> (i32, i32) {
    %c0_i32 = arith.constant 0 : i32
    %c0_i32_0 = arith.constant 0 : i32
    %c0_i32_1 = arith.constant 0 : i32
    return %c0_i32, %c0_i32_0 : i32, i32
  }
  func.func @transform_2(%arg0: i32, %arg1: i32) -> (i32, i32) {
    %c0_i32 = arith.constant 0 : i32
    %c0_i32_0 = arith.constant 0 : i32
    %c0_i32_1 = arith.constant 0 : i32
    return %c0_i32, %c0_i32_0 : i32, i32
  }
  func.func @transform_3(%arg0: i32, %arg1: i32) -> (i32, i32) {
    %c0_i32 = arith.constant 0 : i32
    %c0_i32_0 = arith.constant 0 : i32
    %c0_i32_1 = arith.constant 0 : i32
    return %c0_i32, %c0_i32_0 : i32, i32
  }
  func.func @transform_4(%arg0: i32, %arg1: i32) -> (i32, i32) {
    %c0_i32 = arith.constant 0 : i32
    %c0_i32_0 = arith.constant 0 : i32
    %c0_i32_1 = arith.constant 0 : i32
    return %c0_i32, %c0_i32_0 : i32, i32
  }
  func.func @transform_5(%arg0: i32, %arg1: i32) -> (i32, i32) {
    %c0_i32 = arith.constant 0 : i32
    %c0_i32_0 = arith.constant 0 : i32
    %c0_i32_1 = arith.constant 0 : i32
    return %c0_i32, %c0_i32_0 : i32, i32
  }
  func.func @transform_6(%arg0: i32, %arg1: i32) -> (i32, i32) {
    %c0_i32 = arith.constant 0 : i32
    %c0_i32_0 = arith.constant 0 : i32
    %c0_i32_1 = arith.constant 0 : i32
    return %c0_i32, %c0_i32_0 : i32, i32
  }
  func.func @transform_7(%arg0: i32, %arg1: i32) -> (i32, i32) {
    %c0_i32 = arith.constant 0 : i32
    %c0_i32_0 = arith.constant 0 : i32
    %c0_i32_1 = arith.constant 0 : i32
    return %c0_i32, %c0_i32_0 : i32, i32
  }
  func.func @transform_8(%arg0: i32, %arg1: i32) -> (i32, i32) {
    %c0_i32 = arith.constant 0 : i32
    %c0_i32_0 = arith.constant 0 : i32
    %c0_i32_1 = arith.constant 0 : i32
    return %c0_i32, %c0_i32_0 : i32, i32
  }
  func.func @transform_9(%arg0: i32, %arg1: i32) -> (i32, i32) {
    %c0_i32 = arith.constant 0 : i32
    %c0_i32_0 = arith.constant 0 : i32
    %c0_i32_1 = arith.constant 0 : i32
    return %c0_i32, %c0_i32_0 : i32, i32
  }
  func.func @transform_10(%arg0: i32, %arg1: i32) -> (i32, i32) {
    %c0_i32 = arith.constant 0 : i32
    %c0_i32_0 = arith.constant 0 : i32
    %c0_i32_1 = arith.constant 0 : i32
    return %c0_i32, %c0_i32_0 : i32, i32
  }
  func.func @transform_11(%arg0: i32, %arg1: i32) -> (i32, i32) {
    %c0_i32 = arith.constant 0 : i32
    %c0_i32_0 = arith.constant 0 : i32
    return %arg0, %c0_i32 : i32, i32
  }
}

</mosaic_0001>

<bundles_post_ra>
// kernel: _lambda_.1
= control target key start
LH: loop header
LB: loop body
LE: loop exit
PB: predicated region body
PF: predicated region fallthrough
CT: control target
= control target key end

     0   :  { %s5065_s17 = smov 0   ;;  %s5067_s18 = smov 0   ;;  %s5993_s0 = inlined_call_operand.vmem [shape: bf16[8,32,2], index: 0, kind: input, shape index: {}]   ;;  %s5994_s1 = inlined_call_operand.vmem [shape: bf16[2,96], index: 1, kind: input, shape index: {}]   ;;  %s5995_s2 = inlined_call_operand.vmem [shape: bf16[32,96], index: 2, kind: input, shape index: {}]   ;;  %s5996_s3 = inlined_call_operand.vmem [shape: bf16[32,96], index: 3, kind: input, shape index: {}]   ;;  %s5997_s4 = inlined_call_operand.vmem [shape: bf16[32,96], index: 4, kind: input, shape index: {}]   ;;  %s5998_s5 = inlined_call_operand.vmem [shape: f32[1,96], index: 5, kind: input, shape index: {}]   ;;  %s5999_s6 = inlined_call_operand.vmem [shape: f32[1,96], index: 6, kind: input, shape index: {}]   ;;  %s6000_s7 = inlined_call_operand.vmem [shape: f32[1,32], index: 7, kind: input, shape index: {}]   ;;  %s6001_s8 = inlined_call_operand.vmem [shape: f32[1,32], index: 8, kind: input, shape index: {}]   ;;  %s6002_s9 = inlined_call_operand.vmem [shape: bf16[32,3], index: 9, kind: input, shape index: {}]   ;;  %s6003_s10 = inlined_call_operand.vmem [shape: f32[1,3], index: 10, kind: input, shape index: {}]   ;;  %s6004_s11 = inlined_call_operand.vmem [shape: f32[32,3], index: 11, kind: output, shape index: {}]  }
   0x1   :  { %s5069_s19 = smov 0   ;;  %s5071_s20 = smov 0  }
   0x2   :  { %s5073_s21 = smov 0  }
   0x3 LB: > { %s33_s22 = sadd.s32 1, %s4995_s20  ;;  %p49_p1 = scmp.ne.s32.totalorder %s4987_s18, %s4983_s17  ;;  %s4999_s21 = sphi %s5073_s21, %s21_s21   ;;  %s4995_s20 = sphi %s5071_s20, %s6008_s20   ;;  %s4991_s19 = sphi %s5069_s19, %s6007_s19   ;;  %s4987_s18 = sphi %s5067_s18, %s6006_s18   ;;  %s4983_s17 = sphi %s5065_s17, %s6005_s17  }
   0x4   : > { %p35_p0 = scmp.ge.s32.totalorder %s33_s22, 2  ;;  %p50_p2 = scmp.eq.s32.totalorder %s4999_s21, 0 }
   0x5   : > { %s42_s24 = sadd.s32 1, %s4987_s18  ;;  %p4146_p5 = scmp.ge.s32.totalorder %s4999_s21, 2 }
   0x6   : > { %s6010_s22 = smov (%p35_p0, %s33_s22), 0  ;;  %p51_p3 = por %p50_p2, %p49_p1 }
   0x7   : > { %s38_s23 = ssub.s32 %s4995_s20, %s6010_s22  ;;  %341 = sbr.rel (%p4146_p5) target bundleno = 22 (0x16), region = 56 }
   0x8   : > { %p40_p4 = scmp.eq.s32.totalorder %s38_s23, 0 }
   0xa   : > { %s5100_s25 = scalar_select %p40_p4, %s4987_s18, %s42_s24  }
   0xe   : > { %344 = sbr.rel (!%p51_p3) target bundleno = 22 (0x16), region = 60  ;;  %s346_s26 = sand.u32 (%p51_p3), 1, %s4987_s18  }
   0xf   : > { %s4326_s27 = sshll.u32 (%p51_p3), %s4995_s20, 3  ;;  %s4147_s28 = sshll.u32 (%p51_p3), %s346_s26, 6 }
  0x10   : > { %s354_s12 = scalar_lea.vmem (%p51_p3), %s5993_s0, %s4326_s27  ;;  %s348_s13 = scalar_lea.vmem (%p51_p3), [#allocation4], %s4147_s28 }
  0x11   : > { %v370_v0 = vld [vmem:[%s354_s12] sm:$0xff] (%p51_p3)   ;;  %v374_v1 = vld [vmem:[%s354_s12 + $0x10] sm:$0xff] (%p51_p3)  }
  0x12   : > { %v378_v2 = vld [vmem:[%s354_s12 + $0x20] sm:$0xff] (%p51_p3)   ;;  %371 = vst [vmem:[%s348_s13] sm:$0xff] (%p51_p3), %v370_v0   ;;  %375 = vst [vmem:[%s348_s13 + $0x8] sm:$0xff] (%p51_p3), %v374_v1   ;;  %v382_v3 = vld [vmem:[%s354_s12 + $0x30] sm:$0xff] (%p51_p3)  }
  0x13   : > { %379 = vst [vmem:[%s348_s13 + $0x10] sm:$0xff] (%p51_p3), %v378_v2   ;;  %v386_v4 = vld [vmem:[%s354_s12 + $0x40] sm:$0xff] (%p51_p3)   ;;  %v390_v5 = vld [vmem:[%s354_s12 + $0x50] sm:$0xff] (%p51_p3)   ;;  %383 = vst [vmem:[%s348_s13 + $0x18] sm:$0xff] (%p51_p3), %v382_v3  }
  0x14   : > { %387 = vst [vmem:[%s348_s13 + $0x20] sm:$0xff] (%p51_p3), %v386_v4   ;;  %391 = vst [vmem:[%s348_s13 + $0x28] sm:$0xff] (%p51_p3), %v390_v5   ;;  %v394_v6 = vld [vmem:[%s354_s12 + $0x60] sm:$0xff] (%p51_p3)   ;;  %v398_v7 = vld [vmem:[%s354_s12 + $0x70] sm:$0xff] (%p51_p3)  }
  0x15   : > { %395 = vst [vmem:[%s348_s13 + $0x30] sm:$0xff] %v394_v6   ;;  %399 = vst [vmem:[%s348_s13 + $0x38] sm:$0xff] %v398_v7  }
  0x16 PF: > { %p4150_p6 = scmp.ge.s32.totalorder %s4999_s21, 1  ;;  %p455_p7 = scmp.lt.s32.totalorder %s4999_s21, 3 }
  0x18   : > { %p456_p8 = pnand %p4150_p6, %p455_p7 }
  0x19   : > { %v4710_v8 = vld [vmem:[%s5996_s3] sm:$0xff] (!%p456_p8)   ;;  %v5001_v9 = vmov (!%p456_p8), 0.0   ;;  %vm540_vm0 = vcmask (!%p456_p8), 1040384   ;;  %vm5002_vm1 = vmmov (!%p456_p8), 0   ;;  %v4711_v12 = vld [vmem:[%s5996_s3 + $0x8] sm:$0xff] (!%p456_p8)   ;;  %s462_s27 = sand.u32 (!%p456_p8), 1, %s4983_s17  }
  0x1a   : > { %459 = sbr.rel (%p456_p8) target bundleno = 8592 (0x2190), region = 101  ;;  %4424 = vmatprep.subr.bf16.mxu1 (!%p456_p8), %v5001_v9  ;;  %4418 = vmatprep.subr.bf16.mxu0 (!%p456_p8), %v5001_v9  ;;  %v523_v10 = vld [vmem:[%s5994_s1] sm:$0x1] (!%p456_p8)  ;;  %s4151_s28 = sshll.u32 (!%p456_p8), %s462_s27, 6  ;;  %vm514_vm2 = vcmask (!%p456_p8), 261120   ;;  %vm536_vm3 = vcmask (!%p456_p8), 15360  }
  0x1b   : > { %4425 = vmatpush3.bf16.msra.mxu1 (!%p456_p8), %v4710_v8  ;;  %v542_v11 = vsel (!%p456_p8), %vm540_vm0, %v523_v10, 0  ;;  %4420 = vmatprep.mubr.msk.bf16.mxu0 (!%p456_p8), %vm5002_vm1, %v5001_v9  ;;  %v5129_v13 = vld [vmem:[%s6000_s7] ss:$0 sm:$0xff] (!%p456_p8)  ;;  %515 = vst.msk [vmem:[#allocation2] sm:$0xff] (!%p456_p8), %vm514_vm2, %v5001_v9  ;;  %516 = vst.msk [vmem:[#allocation2 + $0x8] sm:$0xff] (!%p456_p8), %vm514_vm2, %v5001_v9  ;;  %s5003_s17 = smov (!%p456_p8), 64  }
  0x1c   : > { %4419 = vmatpush3.bf16.msra.mxu0 (!%p456_p8), %v542_v11  ;;  %4426 = vmatprep.subr.bf16.mxu1 (!%p456_p8), %v5001_v9  ;;  %517 = vst.msk [vmem:[#allocation3] sm:$0xff] (!%p456_p8), %vm514_vm2, %v5001_v9  ;;  %518 = vst.msk [vmem:[#allocation3 + $0x8] sm:$0xff] (!%p456_p8), %vm514_vm2, %v5001_v9  ;;  %s5143_s12 = scalar_lea.vmem (!%p456_p8), [#allocation4], %s4151_s28  ;;  %v5159_v29 = vld [vmem:[%s5998_s5] ss:$0 sm:$0xff] (!%p456_p8)  ;;  %s5004_s15 = smov (!%p456_p8), 32  }
  0x1d   : > { %4428 = vmatprep.mubr.msk.bf16.mxu1 (!%p456_p8), %vm5002_vm1, %v5001_v9  ;;  %667 = vrot.lane.b32.xlu0 (!%p456_p8), %v5129_v13, %s5003_s17  ;;  %v4712_v14 = vld [vmem:[%s5143_s12] sm:$0xff] (!%p456_p8)   ;;  %v4714_v58 = vld [vmem:[%s5997_s4 + $0x8] sm:$0xff] (!%p456_p8)   ;;  %vm4066_vm4 = vcmask (!%p456_p8), 23552  }
  0x1e   : > { %4432 = vmatprep.subr.bf16.mxu0 (!%p456_p8), %v5001_v9  ;;  %v4713_v56 = vld [vmem:[%s5997_s4] sm:$0xff] (!%p456_p8)   ;;  %v4716_v2 = vld [vmem:[%s5995_s2 + $0x8] sm:$0xff] (!%p456_p8)  }
  0x1f   : > { %4427 = vmatpush3.bf16.msra.mxu1 (!%p456_p8), %v4711_v12  ;;  %4421 = vmatmul.mubr.msk.bf16.vlgmr.msra.gmra.mrb[0].mxu0 (!%p456_p8), %vm536_vm3, %v4712_v14  ;;  %v4715_v57 = vld [vmem:[%s5995_s2] sm:$0xff] (!%p456_p8)   ;;  %v4718_v4 = vld [vmem:[%s5996_s3 + $0x8] sm:$0xff] (!%p456_p8)  }
  0x20   : > { %4440 = vmatprep.subr.bf16.mxu1 (!%p456_p8), %v5001_v9  ;;  %4436 = vmatprep.mubr.msk.bf16.mxu0 (!%p456_p8), %vm5002_vm1, %v5001_v9  ;;  %v4717_v3 = vld [vmem:[%s5996_s3] sm:$0xff] (!%p456_p8)  }
  0x21   : > { %4433 = vmatpush3.bf16.msra.mxu0 %v4715_v57  ;;  %v5209_v11 = vld [vmem:[%s6001_s8] ss:$0 sm:$0xff] }
  0x22   : > { %v521_v15 = vld [vmem:[#allocation2] sm:$0xff]  ;;  %v522_v16 = vld [vmem:[#allocation2 + $0x8] sm:$0xff]  ;;  %4434 = vmatprep.subr.bf16.mxu0 %v5001_v9 }
  0x23   : > { %v585_v17 = vpack.c.bf16 %v522_v16, %v521_v15  ;;  %v5178_v59 = vld [vmem:[#allocation3] sm:$0xff]  ;;  %v5180_v60 = vld [vmem:[#allocation3 + $0x8] sm:$0xff] }
  0x24   : > { %v807_v63 = vpack.c.bf16 %v5180_v60, %v5178_v59 }
  0x25   : > { %4429 = vmatmul.mubr.msk.bf16.vlgmr.msra.gmra.mrb[0].mxu1 %vm514_vm2, %v585_v17  ;;  %4435 = vmatpush3.bf16.msra.mxu0 %v4716_v2 }
  0x26   : > { %4444 = vmatprep.mubr.msk.bf16.mxu1 %vm5002_vm1, %v5001_v9  ;;  %4441 = vmatpush3.bf16.msra.mxu1 %v4713_v56 }
  0x27   : > { %4442 = vmatprep.subr.bf16.mxu1 %v5001_v9  ;;  %4448 = vmatprep.subr.bf16.mxu0 %v5001_v9 }
  0x2a   : > { %4443 = vmatpush3.bf16.msra.mxu1 %v4714_v58 }
  0x2b   : > { %4454 = vmatprep.subr.bf16.mxu1 %v5001_v9 }
  0x2d   : > { %4445 = vmatmul.mubr.msk.bf16.vlgmr.msra.gmra.mrb[4].mxu1 %vm514_vm2, %v807_v63 }
  0x2e   : > { %4458 = vmatprep.mubr.msk.bf16.mxu1 %vm5002_vm1, %v5001_v9  ;;  %4455 = vmatpush3.bf16.msra.mxu1 %v4717_v3 }
  0x2f   : > { %4456 = vmatprep.subr.bf16.mxu1 %v5001_v9 }
  0x32   : > { %4457 = vmatpush3.bf16.msra.mxu1 %v4718_v4 }
  0x33   : > { %4470 = vmatprep.subr.bf16.mxu1 %v5001_v9 }
  0x8f   : > { %v668_v22 = vpop.permute.xlu0 %667 }
  0xf2   : > { %v578_v18 = vpop.f32.mrb[0].mxu0 }
  0xf3   : > { %v4422_v19 = vpop.f32.mrb[1].mxu0  ;;  %v579_v30 = vadd.f32 %v5159_v29, %v578_v18  ;;  %v960_v18 = vld [vmem:[%s5994_s1] sm:$0x1] }
  0xf4   : > { %v581_v20 = vpop.f32.mrb[2].mxu0 }
  0xf5   : > { %v4423_v21 = vpop.f32.mrb[3].mxu0  ;;  %v582_v31 = vadd.f32 %v5159_v29, %v581_v20  ;;  %v977_v20 = vsel %vm540_vm0, %v960_v18, 0 }
  0xf8   : > { %v640_v23 = vpop.f32.mrb[0].mxu1 }
  0xf9   : > { %v670_v24 = vadd.f32 %v668_v22, %v640_v23  ;;  %v4430_v25 = vpop.f32.mrb[1].mxu1  ;;  %v647_v32 = vadd.f32 %v640_v23, %v579_v30 }
  0xfa   : > { %v643_v26 = vpop.f32.mrb[2].mxu1  ;;  %v4719_v25 = vld [vmem:[%s5143_s12 + $0x8] sm:$0xff]  }
  0xfb   : > { %674 = vrot.lane.b32.xlu0 %v670_v24, %s5003_s17  ;;  %v4431_v27 = vpop.f32.mrb[3].mxu1  ;;  %v671_v28 = vadd.f32 %v668_v22, %v643_v26  ;;  %v648_v33 = vadd.f32 %v643_v26, %v582_v31  ;;  %v4160_v34 = vmul.f32 -1.442695, %v647_v32 }
  0xfd   : > { %676 = vrot.lane.b32.xlu1 %v671_v28, %s5003_s17  ;;  %v4161_v35 = vmul.f32 -1.442695, %v648_v33  ;;  %4768 = vpow2.f32 %v4160_v34 }
  0xff   : > { %4770 = vpow2.f32 %v4161_v35 }
 0x100   : > { %v861_v12 = vpop.f32.mrb[4].mxu1 }
 0x101   : > { %v4446_v14 = vpop.f32.mrb[5].mxu1 }
 0x107   : > { %v4769_v36 = vpop.eup %4768 }
 0x108   : > { %v655_v38 = vadd.f32 1.0, %v4769_v36 }
 0x109   : > { %v4771_v37 = vpop.eup %4770 }
 0x10a   : > { %v656_v39 = vadd.f32 1.0, %v4771_v37  ;;  %4772 = vrcp.f32 %v655_v38 }
 0x10c   : > { %4774 = vrcp.f32 %v656_v39 }
 0x114   : > { %v4773_v40 = vpop.eup %4772 }
 0x116   : > { %v4775_v43 = vpop.eup %4774 }
 0x16d   : > { %v675_v41 = vpop.permute.xlu0 %674 }
 0x16e   : > { %v680_v42 = vmul.f32 %v4773_v40, %v675_v41 }
 0x16f   : > { %v677_v44 = vpop.permute.xlu1 %676 }
 0x170   : > { %v681_v45 = vmul.f32 %v4775_v43, %v677_v44  ;;  %684 = vrot.lane.b32.xlu1 %v680_v42, %s5003_s17 }
 0x172   : > { %686 = vrot.lane.b32.xlu0 %v681_v45, %s5003_s17 }
 0x1e2   : > { %v685_v46 = vpop.permute.xlu1 %684 }
 0x1e3   : > { %v690_v47 = vadd.f32 %v685_v46, %v579_v30  ;;  %v5244_v30 = vld [vmem:[%s5999_s6] ss:$0 sm:$0xff] }
 0x1e4   : > { %v687_v48 = vpop.permute.xlu0 %686 }
 0x1e5   : > { %4776 = vtanh.f32 %v690_v47  ;;  %v691_v49 = vadd.f32 %v687_v48, %v582_v31 }
 0x1e7   : > { %4778 = vtanh.f32 %v691_v49 }
 0x1ef   : > { %v4777_v50 = vpop.eup %4776 }
 0x1f0   : > { %696 = vrot.lane.b32.xlu1 %v4777_v50, %s5003_s17 }
 0x1f1   : > { %v4779_v51 = vpop.eup %4778 }
 0x1f2   : > { %698 = vrot.lane.b32.xlu0 %v4779_v51, %s5003_s17 }
 0x262   : > { %v697_v52 = vpop.permute.xlu1 %696 }
 0x263   : > { %v702_v53 = vsub.f32 %v521_v15, %v697_v52  ;;  %v864_v15 = vpop.f32.mrb[6].mxu1 }
 0x264   : > { %v699_v54 = vpop.permute.xlu0 %698 }
 0x265   : > { %v703_v55 = vsub.f32 %v522_v16, %v699_v54  ;;  %706 = vrot.lane.b32.xlu1 %v702_v53, %s5004_s15  ;;  %v4447_v16 = vpop.f32.mrb[7].mxu1 }
 0x267   : > { %708 = vrot.lane.b32.xlu0 %v703_v55, %s5004_s15 }
 0x2d7   : > { %v707_v61 = vpop.permute.xlu1 %706 }
 0x2d8   : > { %v712_v62 = vmul.f32 %v4773_v40, %v707_v61 }
 0x2d9   : > { %v709_v0 = vpop.permute.xlu0 %708 }
 0x2da   : > { %v713_v1 = vmul.f32 %v4775_v43, %v709_v0  ;;  %716 = vrot.lane.b32.xlu1 %v712_v62, %s5004_s15 }
 0x2dc   : > { %718 = vrot.lane.b32.xlu0 %v713_v1, %s5004_s15 }
 0x34c   : > { %v717_v5 = vpop.permute.xlu1 %716 }
 0x34d   : > { %v722_v6 = vadd.f32 %v4777_v50, %v717_v5 }
 0x34e   : > { %v719_v7 = vpop.permute.xlu0 %718 }
 0x34f   : > { %v723_v8 = vadd.f32 %v4779_v51, %v719_v7  ;;  %726 = vrot.lane.b32.xlu1 %v722_v6, %s5003_s17 }
 0x351   : > { %v734_v10 = vpack.c.bf16 %v723_v8, %v722_v6  ;;  %728 = vrot.lane.b32.xlu0 %v723_v8, %s5003_s17 }
 0x353   : > { %749 = vrot.lane.b32.xlu1 %v734_v10, %s5003_s17 }
 0x355   : > { %888 = vrot.lane.b32.xlu0 %v5209_v11, %s5003_s17 }
 0x357   : > { %1101 = vrot.lane.b32.xlu1 %v5129_v13, %s5003_s17 }
 0x3c1   : > { %v727_v17 = vpop.permute.xlu1 %726 }
 0x3c2   : > { %732 = vst.msk [vmem:[#allocation2] sm:$0xff] %vm514_vm2, %v727_v17 }
 0x3c3   : > { %v729_v19 = vpop.permute.xlu0 %728 }
 0x3c4   : > { %733 = vst.msk [vmem:[#allocation2 + $0x8] sm:$0xff] %vm514_vm2, %v729_v19 }
 0x3c5   : > { %v750_v21 = vpop.permute.xlu1 %749 }
 0x3c6   : > { %4437 = vmatmul.mubr.msk.bf16.vlgmr.msra.gmra.mrb[4].mxu0 %vm514_vm2, %v750_v21 }
 0x3c7   : > { %4449 = vmatpush3.bf16.msra.mxu0 %v977_v20  ;;  %4450 = vmatprep.mubr.msk.bf16.mxu0 %vm5002_vm1, %v5001_v9  ;;  %v889_v22 = vpop.permute.xlu0 %888 }
 0x3c8   : > { %v891_v23 = vadd.f32 %v889_v22, %v861_v12  ;;  %v892_v24 = vadd.f32 %v889_v22, %v864_v15  ;;  %4462 = vmatprep.subr.bf16.mxu0 %v5001_v9 }
 0x3c9   : > { %v5229_v26 = vld [vmem:[#allocation2] sm:$0xff]  ;;  %v1102_v40 = vpop.permute.xlu1 %1101 }
 0x3ca   : > { %895 = vrot.lane.b32.xlu0 %v891_v23, %s5003_s17  ;;  %897 = vrot.lane.b32.xlu1 %v892_v24, %s5003_s17 }
 0x3cb   : > { %v5231_v27 = vld [vmem:[#allocation2 + $0x8] sm:$0xff] }
 0x3cc   : > { %v1020_v28 = vpack.c.bf16 %v5231_v27, %v5229_v26 }
 0x3ce   : > { %4451 = vmatmul.mubr.msk.bf16.vlgmr.msra.gmra.mrb[8].mxu0 %vm536_vm3, %v4719_v25  ;;  %4459 = vmatmul.mubr.msk.bf16.vlgmr.msra.gmra.mrb[8].mxu1 %vm514_vm2, %v1020_v28 }
 0x3cf   : > { %4474 = vmatprep.mubr.msk.bf16.mxu1 %vm5002_vm1, %v5001_v9  ;;  %4466 = vmatprep.mubr.msk.bf16.mxu0 %vm5002_vm1, %v5001_v9 }
 0x43c   : > { %v896_v56 = vpop.permute.xlu0 %895  ;;  %v898_v62 = vpop.permute.xlu1 %897 }
 0x499   : > { %v800_v31 = vpop.f32.mrb[4].mxu0 }
 0x49a   : > { %v801_v32 = vadd.f32 %v5244_v30, %v800_v31  ;;  %v4438_v33 = vpop.f32.mrb[5].mxu0 }
 0x49b   : > { %v803_v34 = vpop.f32.mrb[6].mxu0 }
 0x49c   : > { %v868_v35 = vadd.f32 %v861_v12, %v801_v32  ;;  %v804_v36 = vadd.f32 %v5244_v30, %v803_v34  ;;  %v4439_v37 = vpop.f32.mrb[7].mxu0 }
 0x49e   : > { %v4170_v38 = vmul.f32 -1.442695, %v868_v35  ;;  %v869_v39 = vadd.f32 %v864_v15, %v804_v36 }
 0x4a0   : > { %4780 = vpow2.f32 %v4170_v38  ;;  %v4171_v41 = vmul.f32 -1.442695, %v869_v39 }
 0x4a1   : > { %v1074_v42 = vpop.f32.mrb[8].mxu1  ;;  %v1013_v43 = vpop.f32.mrb[8].mxu0 }
 0x4a2   : > { %4782 = vpow2.f32 %v4171_v41  ;;  %v1104_v44 = vadd.f32 %v1102_v40, %v1074_v42  ;;  %v4452_v45 = vpop.f32.mrb[9].mxu0  ;;  %v4460_v46 = vpop.f32.mrb[9].mxu1  ;;  %v1014_v0 = vadd.f32 %v5159_v29, %v1013_v43 }
 0x4a3   : > { %v1016_v47 = vpop.f32.mrb[10].mxu0  ;;  %v1077_v48 = vpop.f32.mrb[10].mxu1 }
 0x4a4   : > { %v1105_v49 = vadd.f32 %v1102_v40, %v1077_v48  ;;  %v4461_v50 = vpop.f32.mrb[11].mxu1  ;;  %1108 = vrot.lane.b32.xlu0 %v1104_v44, %s5003_s17  ;;  %v4453_v51 = vpop.f32.mrb[11].mxu0  ;;  %v1017_v1 = vadd.f32 %v5159_v29, %v1016_v47  ;;  %v1081_v2 = vadd.f32 %v1074_v42, %v1014_v0 }
 0x4a6   : > { %1110 = vrot.lane.b32.xlu1 %v1105_v49, %s5003_s17  ;;  %v1082_v3 = vadd.f32 %v1077_v48, %v1017_v1  ;;  %v4181_v4 = vmul.f32 -1.442695, %v1081_v2  ;;  %v4724_v2 = vld [vmem:[%s5996_s3] sm:$0xff]  }
 0x4a8   : > { %v4182_v5 = vmul.f32 -1.442695, %v1082_v3 }
 0x4aa   : > { %v4781_v52 = vpop.eup %4780 }
 0x4ab   : > { %v876_v53 = vadd.f32 1.0, %v4781_v52  ;;  %v4722_v52 = vld [vmem:[%s5995_s2] sm:$0xff]  }
 0x4ac   : > { %v4783_v54 = vpop.eup %4782  ;;  %4463 = vmatpush3.bf16.msra.mxu0 %v4722_v52 }
 0x4ad   : > { %4784 = vrcp.f32 %v876_v53  ;;  %v877_v55 = vadd.f32 1.0, %v4783_v54  ;;  %4464 = vmatprep.subr.bf16.mxu0 %v5001_v9  ;;  %v4723_v54 = vld [vmem:[%s5995_s2 + $0x8] sm:$0xff]  }
 0x4af   : > { %4786 = vrcp.f32 %v877_v55 }
 0x4b0   : > { %4788 = vpow2.f32 %v4181_v4  ;;  %4465 = vmatpush3.bf16.msra.mxu0 %v4723_v54 }
 0x4b1   : > { %4790 = vpow2.f32 %v4182_v5  ;;  %4478 = vmatprep.subr.bf16.mxu0 %v5001_v9  ;;  %v1394_v5 = vld [vmem:[%s5994_s1] sm:$0x1] }
 0x4b7   : > { %v4785_v57 = vpop.eup %4784 }
 0x4b8   : > { %v901_v58 = vmul.f32 %v4785_v57, %v896_v56 }
 0x4b9   : > { %v4787_v61 = vpop.eup %4786 }
 0x4ba   : > { %v902_v63 = vmul.f32 %v4787_v61, %v898_v62  ;;  %905 = vrot.lane.b32.xlu0 %v901_v58, %s5003_s17  ;;  %v4789_v6 = vpop.eup %4788 }
 0x4bb   : > { %v4791_v7 = vpop.eup %4790  ;;  %v1089_v8 = vadd.f32 1.0, %v4789_v6 }
 0x4bc   : > { %907 = vrot.lane.b32.xlu1 %v902_v63, %s5003_s17  ;;  %v1090_v10 = vadd.f32 1.0, %v4791_v7  ;;  %v1411_v7 = vsel %vm540_vm0, %v1394_v5, 0 }
 0x4bd   : > { %4792 = vrcp.f32 %v1089_v8 }
 0x4be   : > { %4794 = vrcp.f32 %v1090_v10  ;;  %v4726_v10 = vld [vmem:[%s5143_s12 + $0x10] sm:$0xff]  }
 0x4c7   : > { %v4793_v12 = vpop.eup %4792 }
 0x4c8   : > { %v4795_v16 = vpop.eup %4794 }
 0x516   : > { %v1109_v14 = vpop.permute.xlu0 %1108 }
 0x517   : > { %v1114_v15 = vmul.f32 %v4793_v12, %v1109_v14 }
 0x518   : > { %v1111_v17 = vpop.permute.xlu1 %1110 }
 0x519   : > { %v1115_v18 = vmul.f32 %v4795_v16, %v1111_v17  ;;  %1118 = vrot.lane.b32.xlu0 %v1114_v15, %s5003_s17 }
 0x51b   : > { %1120 = vrot.lane.b32.xlu1 %v1115_v18, %s5003_s17 }
 0x52c   : > { %v906_v19 = vpop.permute.xlu0 %905 }
 0x52d   : > { %v911_v20 = vadd.f32 %v906_v19, %v801_v32 }
 0x52e   : > { %v908_v21 = vpop.permute.xlu1 %907 }
 0x52f   : > { %4796 = vtanh.f32 %v911_v20  ;;  %v912_v22 = vadd.f32 %v908_v21, %v804_v36 }
 0x531   : > { %4798 = vtanh.f32 %v912_v22 }
 0x539   : > { %v4797_v23 = vpop.eup %4796 }
 0x53a   : > { %917 = vrot.lane.b32.xlu0 %v4797_v23, %s5003_s17 }
 0x53b   : > { %v4799_v24 = vpop.eup %4798 }
 0x53c   : > { %919 = vrot.lane.b32.xlu1 %v4799_v24, %s5003_s17 }
 0x58b   : > { %v1119_v25 = vpop.permute.xlu0 %1118 }
 0x58c   : > { %v1124_v28 = vadd.f32 %v1119_v25, %v1014_v0 }
 0x58d   : > { %v1121_v31 = vpop.permute.xlu1 %1120 }
 0x58e   : > { %4800 = vtanh.f32 %v1124_v28  ;;  %v1125_v33 = vadd.f32 %v1121_v31, %v1017_v1 }
 0x590   : > { %4802 = vtanh.f32 %v1125_v33 }
 0x598   : > { %v4801_v34 = vpop.eup %4800 }
 0x599   : > { %1130 = vrot.lane.b32.xlu0 %v4801_v34, %s5003_s17 }
 0x59a   : > { %v4803_v32 = vpop.eup %4802 }
 0x59b   : > { %1132 = vrot.lane.b32.xlu1 %v4803_v32, %s5003_s17 }
 0x5ac   : > { %v918_v35 = vpop.permute.xlu0 %917 }
 0x5ad   : > { %v923_v36 = vsub.f32 %v5178_v59, %v918_v35 }
 0x5ae   : > { %v920_v37 = vpop.permute.xlu1 %919 }
 0x5af   : > { %v924_v38 = vsub.f32 %v5180_v60, %v920_v37  ;;  %927 = vrot.lane.b32.xlu0 %v923_v36, %s5004_s15 }
 0x5b1   : > { %929 = vrot.lane.b32.xlu1 %v924_v38, %s5004_s15 }
 0x60b   : > { %v1131_v39 = vpop.permute.xlu0 %1130 }
 0x60c   : > { %v1136_v40 = vsub.f32 %v5229_v26, %v1131_v39  ;;  %v4720_v26 = vld [vmem:[%s5997_s4] sm:$0xff]  }
 0x60d   : > { %v1133_v41 = vpop.permute.xlu1 %1132  ;;  %4471 = vmatpush3.bf16.msra.mxu1 %v4720_v26 }
 0x60e   : > { %v1137_v42 = vsub.f32 %v5231_v27, %v1133_v41  ;;  %1140 = vrot.lane.b32.xlu0 %v1136_v40, %s5004_s15  ;;  %v4721_v27 = vld [vmem:[%s5997_s4 + $0x8] sm:$0xff]   ;;  %4472 = vmatprep.subr.bf16.mxu1 %v5001_v9 }
 0x610   : > { %1142 = vrot.lane.b32.xlu1 %v1137_v42, %s5004_s15 }
 0x611   : > { %4473 = vmatpush3.bf16.msra.mxu1 %v4721_v27 }
 0x612   : > { %4484 = vmatprep.subr.bf16.mxu1 %v5001_v9 }
 0x621   : > { %v928_v43 = vpop.permute.xlu0 %927 }
 0x622   : > { %v933_v44 = vmul.f32 %v4785_v57, %v928_v43 }
 0x623   : > { %v930_v59 = vpop.permute.xlu1 %929 }
 0x624   : > { %v934_v45 = vmul.f32 %v4787_v61, %v930_v59  ;;  %937 = vrot.lane.b32.xlu0 %v933_v44, %s5004_s15 }
 0x626   : > { %939 = vrot.lane.b32.xlu1 %v934_v45, %s5004_s15 }
 0x680   : > { %v1141_v60 = vpop.permute.xlu0 %1140 }
 0x681   : > { %v1146_v46 = vmul.f32 %v4793_v12, %v1141_v60 }
 0x682   : > { %v1143_v47 = vpop.permute.xlu1 %1142 }
 0x683   : > { %v1147_v48 = vmul.f32 %v4795_v16, %v1143_v47  ;;  %1150 = vrot.lane.b32.xlu0 %v1146_v46, %s5004_s15 }
 0x685   : > { %1152 = vrot.lane.b32.xlu1 %v1147_v48, %s5004_s15 }
 0x696   : > { %v938_v49 = vpop.permute.xlu0 %937 }
 0x697   : > { %v943_v50 = vadd.f32 %v4797_v23, %v938_v49 }
 0x698   : > { %v940_v51 = vpop.permute.xlu1 %939 }
 0x699   : > { %v944_v53 = vadd.f32 %v4799_v24, %v940_v51  ;;  %947 = vrot.lane.b32.xlu0 %v943_v50, %s5003_s17 }
 0x69b   : > { %949 = vrot.lane.b32.xlu1 %v944_v53, %s5003_s17 }
 0x6f5   : > { %v1151_v55 = vpop.permute.xlu0 %1150 }
 0x6f6   : > { %v1156_v56 = vadd.f32 %v4801_v34, %v1151_v55 }
 0x6f7   : > { %v1153_v57 = vpop.permute.xlu1 %1152 }
 0x6f8   : > { %v1157_v58 = vadd.f32 %v4803_v32, %v1153_v57  ;;  %1160 = vrot.lane.b32.xlu0 %v1156_v56, %s5003_s17 }
 0x6fa   : > { %v1168_v61 = vpack.c.bf16 %v1157_v58, %v1156_v56  ;;  %1162 = vrot.lane.b32.xlu1 %v1157_v58, %s5003_s17 }
 0x6fc   : > { %1183 = vrot.lane.b32.xlu0 %v1168_v61, %s5003_s17 }
 0x6fe   : > { %1322 = vrot.lane.b32.xlu1 %v5209_v11, %s5003_s17 }
 0x700   : > { %1535 = vrot.lane.b32.xlu0 %v5129_v13, %s5003_s17  ;;  %v4725_v13 = vld [vmem:[%s5996_s3 + $0x8] sm:$0xff]  }
 0x70b   : > { %v948_v62 = vpop.permute.xlu0 %947 }
 0x70c   : > { %953 = vst.msk [vmem:[#allocation3] sm:$0xff] %vm514_vm2, %v948_v62 }
 0x70d   : > { %v950_v63 = vpop.permute.xlu1 %949 }
 0x70e   : > { %954 = vst.msk [vmem:[#allocation3 + $0x8] sm:$0xff] %vm514_vm2, %v950_v63 }
 0x713   : > { %v5299_v0 = vld [vmem:[#allocation3] sm:$0xff] }
 0x715   : > { %v5301_v1 = vld [vmem:[#allocation3 + $0x8] sm:$0xff] }
 0x716   : > { %v1241_v3 = vpack.c.bf16 %v5301_v1, %v5299_v0 }
 0x718   : > { %4475 = vmatmul.mubr.msk.bf16.vlgmr.msra.gmra.mrb[12].mxu1 %vm514_vm2, %v1241_v3 }
 0x719   : > { %4485 = vmatpush3.bf16.msra.mxu1 %v4724_v2  ;;  %4488 = vmatprep.mubr.msk.bf16.mxu1 %vm5002_vm1, %v5001_v9 }
 0x71a   : > { %4486 = vmatprep.subr.bf16.mxu1 %v5001_v9 }
 0x71d   : > { %4487 = vmatpush3.bf16.msra.mxu1 %v4725_v13 }
 0x71e   : > { %4500 = vmatprep.subr.bf16.mxu1 %v5001_v9 }
 0x76a   : > { %v1161_v4 = vpop.permute.xlu0 %1160 }
 0x76b   : > { %1166 = vst.msk [vmem:[#allocation2] sm:$0xff] %vm514_vm2, %v1161_v4 }
 0x76c   : > { %v1163_v6 = vpop.permute.xlu1 %1162 }
 0x76d   : > { %1167 = vst.msk [vmem:[#allocation2 + $0x8] sm:$0xff] %vm514_vm2, %v1163_v6 }
 0x76e   : > { %v1184_v8 = vpop.permute.xlu0 %1183 }
 0x76f   : > { %4467 = vmatmul.mubr.msk.bf16.vlgmr.msra.gmra.mrb[12].mxu0 %vm514_vm2, %v1184_v8 }
 0x770   : > { %4479 = vmatpush3.bf16.msra.mxu0 %v1411_v7  ;;  %4480 = vmatprep.mubr.msk.bf16.mxu0 %vm5002_vm1, %v5001_v9  ;;  %v1323_v16 = vpop.permute.xlu1 %1322 }
 0x771   : > { %4492 = vmatprep.subr.bf16.mxu0 %v5001_v9 }
 0x772   : > { %v5327_v12 = vld [vmem:[#allocation2] sm:$0xff]  ;;  %v1536_v36 = vpop.permute.xlu0 %1535 }
 0x774   : > { %v5329_v14 = vld [vmem:[#allocation2 + $0x8] sm:$0xff] }
 0x775   : > { %v1454_v15 = vpack.c.bf16 %v5329_v14, %v5327_v12 }
 0x777   : > { %4481 = vmatmul.mubr.msk.bf16.vlgmr.msra.gmra.mrb[16].mxu0 %vm536_vm3, %v4726_v10  ;;  %4489 = vmatmul.mubr.msk.bf16.vlgmr.msra.gmra.mrb[16].mxu1 %vm514_vm2, %v1454_v15 }
 0x778   : > { %4504 = vmatprep.mubr.msk.bf16.mxu1 %vm5002_vm1, %v5001_v9  ;;  %4496 = vmatprep.mubr.msk.bf16.mxu0 %vm5002_vm1, %v5001_v9 }
 0x7eb   : > { %v1295_v17 = vpop.f32.mrb[12].mxu1 }
 0x7ec   : > { %v1325_v18 = vadd.f32 %v1323_v16, %v1295_v17  ;;  %v4476_v19 = vpop.f32.mrb[13].mxu1 }
 0x7ed   : > { %v1298_v20 = vpop.f32.mrb[14].mxu1 }
 0x7ee   : > { %v1326_v21 = vadd.f32 %v1323_v16, %v1298_v20  ;;  %v4477_v22 = vpop.f32.mrb[15].mxu1  ;;  %1329 = vrot.lane.b32.xlu1 %v1325_v18, %s5003_s17 }
 0x7f0   : > { %1331 = vrot.lane.b32.xlu0 %v1326_v21, %s5003_s17 }
 0x842   : > { %v1234_v23 = vpop.f32.mrb[12].mxu0 }
 0x843   : > { %v1235_v24 = vadd.f32 %v5244_v30, %v1234_v23  ;;  %v4468_v25 = vpop.f32.mrb[13].mxu0 }
 0x844   : > { %v1237_v28 = vpop.f32.mrb[14].mxu0 }
 0x845   : > { %v1302_v31 = vadd.f32 %v1295_v17, %v1235_v24  ;;  %v1238_v33 = vadd.f32 %v5244_v30, %v1237_v28  ;;  %v4469_v34 = vpop.f32.mrb[15].mxu0 }
 0x847   : > { %v4191_v32 = vmul.f32 -1.442695, %v1302_v31  ;;  %v1303_v35 = vadd.f32 %v1298_v20, %v1238_v33 }
 0x849   : > { %4804 = vpow2.f32 %v4191_v32  ;;  %v4192_v37 = vmul.f32 -1.442695, %v1303_v35 }
 0x84a   : > { %v1447_v38 = vpop.f32.mrb[16].mxu0  ;;  %v1508_v39 = vpop.f32.mrb[16].mxu1 }
 0x84b   : > { %4806 = vpow2.f32 %v4192_v37  ;;  %v1538_v40 = vadd.f32 %v1536_v36, %v1508_v39  ;;  %v4482_v41 = vpop.f32.mrb[17].mxu0  ;;  %v4490_v42 = vpop.f32.mrb[17].mxu1  ;;  %v1448_v54 = vadd.f32 %v5159_v29, %v1447_v38 }
 0x84c   : > { %v1450_v43 = vpop.f32.mrb[18].mxu0  ;;  %v1511_v44 = vpop.f32.mrb[18].mxu1 }
 0x84d   : > { %v1539_v59 = vadd.f32 %v1536_v36, %v1511_v44  ;;  %v4491_v45 = vpop.f32.mrb[19].mxu1  ;;  %1542 = vrot.lane.b32.xlu1 %v1538_v40, %s5003_s17  ;;  %v4483_v60 = vpop.f32.mrb[19].mxu0  ;;  %v1451_v55 = vadd.f32 %v5159_v29, %v1450_v43  ;;  %v1515_v56 = vadd.f32 %v1508_v39, %v1448_v54  ;;  %v4728_v43 = vld [vmem:[%s5997_s4 + $0x8] sm:$0xff]  }
 0x84e   : > { %v4729_v60 = vld [vmem:[%s5995_s2] sm:$0xff]  }
 0x84f   : > { %1544 = vrot.lane.b32.xlu0 %v1539_v59, %s5003_s17  ;;  %v1516_v57 = vadd.f32 %v1511_v44, %v1451_v55  ;;  %v4202_v58 = vmul.f32 -1.442695, %v1515_v56  ;;  %4493 = vmatpush3.bf16.msra.mxu0 %v4729_v60 }
 0x850   : > { %4494 = vmatprep.subr.bf16.mxu0 %v5001_v9 }
 0x851   : > { %v4203_v61 = vmul.f32 -1.442695, %v1516_v57  ;;  %v4732_v57 = vld [vmem:[%s5996_s3 + $0x8] sm:$0xff]  }
 0x853   : > { %v4805_v46 = vpop.eup %4804 }
 0x854   : > { %v1310_v47 = vadd.f32 1.0, %v4805_v46 }
 0x855   : > { %v4807_v48 = vpop.eup %4806 }
 0x856   : > { %4808 = vrcp.f32 %v1310_v47  ;;  %v1311_v26 = vadd.f32 1.0, %v4807_v48  ;;  %v4730_v47 = vld [vmem:[%s5995_s2 + $0x8] sm:$0xff]  }
 0x857   : > { %4495 = vmatpush3.bf16.msra.mxu0 %v4730_v47 }
 0x858   : > { %4810 = vrcp.f32 %v1311_v26  ;;  %4508 = vmatprep.subr.bf16.mxu0 %v5001_v9 }
 0x859   : > { %4812 = vpow2.f32 %v4202_v58 }
 0x85a   : > { %4814 = vpow2.f32 %v4203_v61  ;;  %v1828_v61 = vld [vmem:[%s5994_s1] sm:$0x1] }
 0x860   : > { %v5345_v27 = vpop.eup %4808  ;;  %v1330_v49 = vpop.permute.xlu1 %1329 }
 0x861   : > { %v1335_v50 = vmul.f32 %v5345_v27, %v1330_v49 }
 0x862   : > { %v4811_v51 = vpop.eup %4810  ;;  %v1332_v52 = vpop.permute.xlu0 %1331 }
 0x863   : > { %v1336_v53 = vmul.f32 %v4811_v51, %v1332_v52  ;;  %1339 = vrot.lane.b32.xlu1 %v1335_v50, %s5003_s17  ;;  %v4813_v62 = vpop.eup %4812 }
 0x864   : > { %v4815_v63 = vpop.eup %4814  ;;  %v1523_v2 = vadd.f32 1.0, %v4813_v62 }
 0x865   : > { %1341 = vrot.lane.b32.xlu0 %v1336_v53, %s5003_s17  ;;  %v1524_v3 = vadd.f32 1.0, %v4815_v63  ;;  %v1845_v63 = vsel %vm540_vm0, %v1828_v61, 0 }
 0x866   : > { %4816 = vrcp.f32 %v1523_v2 }
 0x867   : > { %4818 = vrcp.f32 %v1524_v3  ;;  %v4733_v3 = vld [vmem:[%s5143_s12 + $0x18] sm:$0xff]  }
 0x870   : > { %v4817_v13 = vpop.eup %4816 }
 0x871   : > { %v4819_v6 = vpop.eup %4818 }
 0x8bf   : > { %v1543_v4 = vpop.permute.xlu1 %1542 }
 0x8c0   : > { %v1548_v5 = vmul.f32 %v4817_v13, %v1543_v4 }
 0x8c1   : > { %v1545_v7 = vpop.permute.xlu0 %1544 }
 0x8c2   : > { %v1549_v8 = vmul.f32 %v4819_v6, %v1545_v7  ;;  %1552 = vrot.lane.b32.xlu1 %v1548_v5, %s5003_s17 }
 0x8c4   : > { %1554 = vrot.lane.b32.xlu0 %v1549_v8, %s5003_s17 }
 0x8d5   : > { %v1340_v10 = vpop.permute.xlu1 %1339 }
 0x8d6   : > { %v1345_v15 = vadd.f32 %v1340_v10, %v1235_v24 }
 0x8d7   : > { %v1342_v16 = vpop.permute.xlu0 %1341 }
 0x8d8   : > { %4820 = vtanh.f32 %v1345_v15  ;;  %v1346_v17 = vadd.f32 %v1342_v16, %v1238_v33 }
 0x8da   : > { %4822 = vtanh.f32 %v1346_v17 }
 0x8e2   : > { %v4821_v18 = vpop.eup %4820 }
 0x8e3   : > { %1351 = vrot.lane.b32.xlu1 %v4821_v18, %s5003_s17 }
 0x8e4   : > { %v4823_v19 = vpop.eup %4822 }
 0x8e5   : > { %1353 = vrot.lane.b32.xlu0 %v4823_v19, %s5003_s17 }
 0x934   : > { %v1553_v20 = vpop.permute.xlu1 %1552 }
 0x935   : > { %v1558_v21 = vadd.f32 %v1553_v20, %v1448_v54 }
 0x936   : > { %v1555_v22 = vpop.permute.xlu0 %1554 }
 0x937   : > { %4824 = vtanh.f32 %v1558_v21  ;;  %v1559_v23 = vadd.f32 %v1555_v22, %v1451_v55 }
 0x939   : > { %4826 = vtanh.f32 %v1559_v23 }
 0x941   : > { %v4825_v25 = vpop.eup %4824 }
 0x942   : > { %1564 = vrot.lane.b32.xlu1 %v4825_v25, %s5003_s17 }
 0x943   : > { %v4827_v24 = vpop.eup %4826 }
 0x944   : > { %1566 = vrot.lane.b32.xlu0 %v4827_v24, %s5003_s17 }
 0x955   : > { %v1352_v28 = vpop.permute.xlu1 %1351 }
 0x956   : > { %v1357_v31 = vsub.f32 %v5299_v0, %v1352_v28 }
 0x957   : > { %v1354_v33 = vpop.permute.xlu0 %1353 }
 0x958   : > { %v1358_v34 = vsub.f32 %v5301_v1, %v1354_v33  ;;  %1361 = vrot.lane.b32.xlu1 %v1357_v31, %s5004_s15 }
 0x95a   : > { %1363 = vrot.lane.b32.xlu0 %v1358_v34, %s5004_s15 }
 0x9b4   : > { %v1565_v32 = vpop.permute.xlu1 %1564 }
 0x9b5   : > { %v1570_v35 = vsub.f32 %v5327_v12, %v1565_v32 }
 0x9b6   : > { %v1567_v36 = vpop.permute.xlu0 %1566 }
 0x9b7   : > { %v1571_v37 = vsub.f32 %v5329_v14, %v1567_v36  ;;  %1574 = vrot.lane.b32.xlu1 %v1570_v35, %s5004_s15  ;;  %v4727_v14 = vld [vmem:[%s5997_s4] sm:$0xff]  }
 0x9b8   : > { %4501 = vmatpush3.bf16.msra.mxu1 %v4727_v14 }
 0x9b9   : > { %1576 = vrot.lane.b32.xlu0 %v1571_v37, %s5004_s15  ;;  %4502 = vmatprep.subr.bf16.mxu1 %v5001_v9 }
 0x9bc   : > { %4503 = vmatpush3.bf16.msra.mxu1 %v4728_v43 }
 0x9bd   : > { %4514 = vmatprep.subr.bf16.mxu1 %v5001_v9 }
 0x9ca   : > { %v1362_v38 = vpop.permute.xlu1 %1361 }
 0x9cb   : > { %v1367_v0 = vmul.f32 %v5345_v27, %v1362_v38 }
 0x9cc   : > { %v1364_v39 = vpop.permute.xlu0 %1363 }
 0x9cd   : > { %v1368_v40 = vmul.f32 %v4811_v51, %v1364_v39  ;;  %1371 = vrot.lane.b32.xlu1 %v1367_v0, %s5004_s15  ;;  %v4960_v51 = vld [vmem:[%s6000_s7] ss:$0 sm:$0xff] }
 0x9cf   : > { %1373 = vrot.lane.b32.xlu0 %v1368_v40, %s5004_s15 }
 0xa29   : > { %v1575_v1 = vpop.permute.xlu1 %1574 }
 0xa2a   : > { %v1580_v41 = vmul.f32 %v4817_v13, %v1575_v1 }
 0xa2b   : > { %v1577_v42 = vpop.permute.xlu0 %1576 }
 0xa2c   : > { %v1581_v12 = vmul.f32 %v4819_v6, %v1577_v42  ;;  %1584 = vrot.lane.b32.xlu1 %v1580_v41, %s5004_s15 }
 0xa2e   : > { %1586 = vrot.lane.b32.xlu0 %v1581_v12, %s5004_s15 }
 0xa3f   : > { %v1372_v44 = vpop.permute.xlu1 %1371 }
 0xa40   : > { %v1377_v59 = vadd.f32 %v4821_v18, %v1372_v44 }
 0xa41   : > { %v1374_v45 = vpop.permute.xlu0 %1373 }
 0xa42   : > { %v1378_v46 = vadd.f32 %v4823_v19, %v1374_v45  ;;  %1381 = vrot.lane.b32.xlu1 %v1377_v59, %s5003_s17 }
 0xa44   : > { %1383 = vrot.lane.b32.xlu0 %v1378_v46, %s5003_s17 }
 0xa9e   : > { %v1585_v48 = vpop.permute.xlu1 %1584 }
 0xa9f   : > { %v1590_v26 = vadd.f32 %v4825_v25, %v1585_v48 }
 0xaa0   : > { %v1587_v27 = vpop.permute.xlu0 %1586 }
 0xaa1   : > { %v1591_v49 = vadd.f32 %v4827_v24, %v1587_v27  ;;  %1594 = vrot.lane.b32.xlu1 %v1590_v26, %s5003_s17 }
 0xaa3   : > { %v1602_v50 = vpack.c.bf16 %v1591_v49, %v1590_v26  ;;  %1596 = vrot.lane.b32.xlu0 %v1591_v49, %s5003_s17 }
 0xaa5   : > { %1617 = vrot.lane.b32.xlu1 %v1602_v50, %s5003_s17 }
 0xaa7   : > { %1756 = vrot.lane.b32.xlu0 %v5209_v11, %s5003_s17  ;;  %v4731_v11 = vld [vmem:[%s5996_s3] sm:$0xff]  }
 0xaa9   : > { %1969 = vrot.lane.b32.xlu1 %v4960_v51, %s5003_s17 }
 0xab4   : > { %v1382_v52 = vpop.permute.xlu1 %1381 }
 0xab5   : > { %1387 = vst.msk [vmem:[#allocation3] sm:$0xff] %vm514_vm2, %v1382_v52 }
 0xab6   : > { %v1384_v53 = vpop.permute.xlu0 %1383 }
 0xab7   : > { %1388 = vst.msk [vmem:[#allocation3 + $0x8] sm:$0xff] %vm514_vm2, %v1384_v53 }
 0xabc   : > { %v5400_v54 = vld [vmem:[#allocation3] sm:$0xff] }
 0xabe   : > { %v5402_v55 = vld [vmem:[#allocation3 + $0x8] sm:$0xff] }
 0xabf   : > { %v1675_v56 = vpack.c.bf16 %v5402_v55, %v5400_v54 }
 0xac1   : > { %4505 = vmatmul.mubr.msk.bf16.vlgmr.msra.gmra.mrb[20].mxu1 %vm514_vm2, %v1675_v56 }
 0xac2   : > { %4515 = vmatpush3.bf16.msra.mxu1 %v4731_v11  ;;  %4518 = vmatprep.mubr.msk.bf16.mxu1 %vm5002_vm1, %v5001_v9 }
 0xac3   : > { %4516 = vmatprep.subr.bf16.mxu1 %v5001_v9 }
 0xac6   : > { %4517 = vmatpush3.bf16.msra.mxu1 %v4732_v57 }
 0xac7   : > { %4530 = vmatprep.subr.bf16.mxu1 %v5001_v9 }
 0xb13   : > { %v1595_v58 = vpop.permute.xlu1 %1594 }
 0xb14   : > { %1600 = vst.msk [vmem:[#allocation2] sm:$0xff] %vm514_vm2, %v1595_v58 }
 0xb15   : > { %v1597_v62 = vpop.permute.xlu0 %1596 }
 0xb16   : > { %1601 = vst.msk [vmem:[#allocation2 + $0x8] sm:$0xff] %vm514_vm2, %v1597_v62 }
 0xb17   : > { %v1618_v2 = vpop.permute.xlu1 %1617 }
 0xb18   : > { %4497 = vmatmul.mubr.msk.bf16.vlgmr.msra.gmra.mrb[20].mxu0 %vm514_vm2, %v1618_v2 }
 0xb19   : > { %4509 = vmatpush3.bf16.msra.mxu0 %v1845_v63  ;;  %4510 = vmatprep.mubr.msk.bf16.mxu0 %vm5002_vm1, %v5001_v9  ;;  %v1757_v6 = vpop.permute.xlu0 %1756 }
 0xb1a   : > { %4522 = vmatprep.subr.bf16.mxu0 %v5001_v9 }
 0xb1b   : > { %v5428_v13 = vld [vmem:[#allocation2] sm:$0xff]  ;;  %v1970_v31 = vpop.permute.xlu1 %1969 }
 0xb1d   : > { %v5430_v4 = vld [vmem:[#allocation2 + $0x8] sm:$0xff] }
 0xb1e   : > { %v1888_v5 = vpack.c.bf16 %v5430_v4, %v5428_v13 }
 0xb20   : > { %4511 = vmatmul.mubr.msk.bf16.vlgmr.msra.gmra.mrb[24].mxu0 %vm536_vm3, %v4733_v3  ;;  %4519 = vmatmul.mubr.msk.bf16.vlgmr.msra.gmra.mrb[24].mxu1 %vm514_vm2, %v1888_v5 }
 0xb21   : > { %4534 = vmatprep.mubr.msk.bf16.mxu1 %vm5002_vm1, %v5001_v9  ;;  %4526 = vmatprep.mubr.msk.bf16.mxu0 %vm5002_vm1, %v5001_v9 }
 0xb94   : > { %v1729_v7 = vpop.f32.mrb[20].mxu1 }
 0xb95   : > { %v1759_v8 = vadd.f32 %v1757_v6, %v1729_v7  ;;  %v4506_v10 = vpop.f32.mrb[21].mxu1 }
 0xb96   : > { %v1732_v15 = vpop.f32.mrb[22].mxu1 }
 0xb97   : > { %v1760_v16 = vadd.f32 %v1757_v6, %v1732_v15  ;;  %v4507_v17 = vpop.f32.mrb[23].mxu1  ;;  %1763 = vrot.lane.b32.xlu0 %v1759_v8, %s5003_s17 }
 0xb99   : > { %1765 = vrot.lane.b32.xlu1 %v1760_v16, %s5003_s17 }
 0xbeb   : > { %v1668_v18 = vpop.f32.mrb[20].mxu0 }
 0xbec   : > { %v1669_v19 = vadd.f32 %v5244_v30, %v1668_v18  ;;  %v4498_v20 = vpop.f32.mrb[21].mxu0 }
 0xbed   : > { %v1671_v21 = vpop.f32.mrb[22].mxu0 }
 0xbee   : > { %v1736_v22 = vadd.f32 %v1729_v7, %v1669_v19  ;;  %v1672_v23 = vadd.f32 %v5244_v30, %v1671_v21  ;;  %v4499_v25 = vpop.f32.mrb[23].mxu0 }
 0xbf0   : > { %v4212_v24 = vmul.f32 -1.442695, %v1736_v22  ;;  %v1737_v28 = vadd.f32 %v1732_v15, %v1672_v23 }
 0xbf2   : > { %4828 = vpow2.f32 %v4212_v24  ;;  %v4213_v33 = vmul.f32 -1.442695, %v1737_v28 }
 0xbf3   : > { %v1881_v34 = vpop.f32.mrb[24].mxu0  ;;  %v1942_v32 = vpop.f32.mrb[24].mxu1 }
 0xbf4   : > { %4830 = vpow2.f32 %v4213_v33  ;;  %v1972_v35 = vadd.f32 %v1970_v31, %v1942_v32  ;;  %v4512_v36 = vpop.f32.mrb[25].mxu0  ;;  %v4520_v37 = vpop.f32.mrb[25].mxu1  ;;  %v1882_v46 = vadd.f32 %v5159_v29, %v1881_v34 }
 0xbf5   : > { %v1884_v38 = vpop.f32.mrb[26].mxu0  ;;  %v1945_v0 = vpop.f32.mrb[26].mxu1 }
 0xbf6   : > { %v1973_v39 = vadd.f32 %v1970_v31, %v1945_v0  ;;  %v4521_v40 = vpop.f32.mrb[27].mxu1  ;;  %1976 = vrot.lane.b32.xlu0 %v1972_v35, %s5003_s17  ;;  %v4513_v1 = vpop.f32.mrb[27].mxu0  ;;  %v1885_v47 = vadd.f32 %v5159_v29, %v1884_v38  ;;  %v1949_v48 = vadd.f32 %v1942_v32, %v1882_v46  ;;  %v4735_v35 = vld [vmem:[%s5997_s4 + $0x8] sm:$0xff]  }
 0xbf7   : > { %v4737_v40 = vld [vmem:[%s5995_s2 + $0x8] sm:$0xff]  }
 0xbf8   : > { %1978 = vrot.lane.b32.xlu1 %v1973_v39, %s5003_s17  ;;  %v1950_v26 = vadd.f32 %v1945_v0, %v1885_v47  ;;  %v4223_v27 = vmul.f32 -1.442695, %v1949_v48  ;;  %v4736_v0 = vld [vmem:[%s5995_s2] sm:$0xff]   ;;  %v4739_v48 = vld [vmem:[%s5996_s3 + $0x8] sm:$0xff]  }
 0xbf9   : > { %4523 = vmatpush3.bf16.msra.mxu0 %v4736_v0 }
 0xbfa   : > { %v4224_v49 = vmul.f32 -1.442695, %v1950_v26  ;;  %4524 = vmatprep.subr.bf16.mxu0 %v5001_v9 }
 0xbfc   : > { %v4829_v30 = vpop.eup %4828 }
 0xbfd   : > { %v1744_v41 = vadd.f32 1.0, %v4829_v30  ;;  %4525 = vmatpush3.bf16.msra.mxu0 %v4737_v40  ;;  %v5571_v40 = vld [vmem:[%s5998_s5] ss:$0 sm:$0xff] }
 0xbfe   : > { %v4831_v42 = vpop.eup %4830  ;;  %4538 = vmatprep.subr.bf16.mxu0 %v5001_v9 }
 0xbff   : > { %4832 = vrcp.f32 %v1744_v41  ;;  %v1745_v12 = vadd.f32 1.0, %v4831_v42 }
 0xc01   : > { %4834 = vrcp.f32 %v1745_v12 }
 0xc02   : > { %4836 = vpow2.f32 %v4223_v27  ;;  %v2262_v27 = vld [vmem:[%s5994_s1] sm:$0x1] }
 0xc03   : > { %4838 = vpow2.f32 %v4224_v49 }
 0xc09   : > { %v5446_v14 = vpop.eup %4832  ;;  %v1764_v43 = vpop.permute.xlu0 %1763 }
 0xc0a   : > { %v1769_v44 = vmul.f32 %v5446_v14, %v1764_v43  ;;  %v5501_v43 = vld [vmem:[%s6000_s7] ss:$0 sm:$0xff] }
 0xc0b   : > { %v4835_v59 = vpop.eup %4834  ;;  %v1766_v45 = vpop.permute.xlu1 %1765 }
 0xc0c   : > { %v1770_v60 = vmul.f32 %v4835_v59, %v1766_v45  ;;  %1773 = vrot.lane.b32.xlu0 %v1769_v44, %s5003_s17  ;;  %v4837_v50 = vpop.eup %4836 }
 0xc0d   : > { %v4839_v51 = vpop.eup %4838  ;;  %v1957_v52 = vadd.f32 1.0, %v4837_v50  ;;  %v2279_v50 = vsel %vm540_vm0, %v2262_v27, 0 }
 0xc0e   : > { %1775 = vrot.lane.b32.xlu1 %v1770_v60, %s5003_s17  ;;  %v1958_v53 = vadd.f32 1.0, %v4839_v51 }
 0xc0f   : > { %4840 = vrcp.f32 %v1957_v52  ;;  %v4740_v52 = vld [vmem:[%s5143_s12 + $0x20] sm:$0xff]  }
 0xc10   : > { %4842 = vrcp.f32 %v1958_v53 }
 0xc19   : > { %v4841_v11 = vpop.eup %4840 }
 0xc1a   : > { %v4843_v58 = vpop.eup %4842 }
 0xc68   : > { %v1977_v56 = vpop.permute.xlu0 %1976 }
 0xc69   : > { %v1982_v57 = vmul.f32 %v4841_v11, %v1977_v56 }
 0xc6a   : > { %v1979_v61 = vpop.permute.xlu1 %1978 }
 0xc6b   : > { %v1983_v62 = vmul.f32 %v4843_v58, %v1979_v61  ;;  %1986 = vrot.lane.b32.xlu0 %v1982_v57, %s5003_s17 }
 0xc6d   : > { %1988 = vrot.lane.b32.xlu1 %v1983_v62, %s5003_s17 }
 0xc7e   : > { %v1774_v29 = vpop.permute.xlu0 %1773 }
 0xc7f   : > { %v1779_v63 = vadd.f32 %v1774_v29, %v1669_v19 }
 0xc80   : > { %v1776_v2 = vpop.permute.xlu1 %1775 }
 0xc81   : > { %4844 = vtanh.f32 %v1779_v63  ;;  %v1780_v3 = vadd.f32 %v1776_v2, %v1672_v23 }
 0xc83   : > { %4846 = vtanh.f32 %v1780_v3  ;;  %v5554_v3 = vld [vmem:[%s5999_s6] ss:$0 sm:$0xff] }
 0xc8b   : > { %v4845_v5 = vpop.eup %4844 }
 0xc8c   : > { %1785 = vrot.lane.b32.xlu0 %v4845_v5, %s5003_s17 }
 0xc8d   : > { %v4847_v6 = vpop.eup %4846 }
 0xc8e   : > { %1787 = vrot.lane.b32.xlu1 %v4847_v6, %s5003_s17 }
 0xcdd   : > { %v1987_v7 = vpop.permute.xlu0 %1986 }
 0xcde   : > { %v1992_v8 = vadd.f32 %v1987_v7, %v1882_v46  ;;  %v4738_v46 = vld [vmem:[%s5996_s3] sm:$0xff]  }
 0xcdf   : > { %v1989_v10 = vpop.permute.xlu1 %1988 }
 0xce0   : > { %4848 = vtanh.f32 %v1992_v8  ;;  %v1993_v15 = vadd.f32 %v1989_v10, %v1885_v47 }
 0xce2   : > { %4850 = vtanh.f32 %v1993_v15 }
 0xcea   : > { %v4849_v16 = vpop.eup %4848 }
 0xceb   : > { %1998 = vrot.lane.b32.xlu0 %v4849_v16, %s5003_s17 }
 0xcec   : > { %v4851_v17 = vpop.eup %4850 }
 0xced   : > { %2000 = vrot.lane.b32.xlu1 %v4851_v17, %s5003_s17 }
 0xcfe   : > { %v1786_v18 = vpop.permute.xlu0 %1785 }
 0xcff   : > { %v1791_v19 = vsub.f32 %v5400_v54, %v1786_v18 }
 0xd00   : > { %v1788_v20 = vpop.permute.xlu1 %1787 }
 0xd01   : > { %v1792_v21 = vsub.f32 %v5402_v55, %v1788_v20  ;;  %1795 = vrot.lane.b32.xlu0 %v1791_v19, %s5004_s15 }
 0xd03   : > { %1797 = vrot.lane.b32.xlu1 %v1792_v21, %s5004_s15 }
 0xd5d   : > { %v1999_v22 = vpop.permute.xlu0 %1998 }
 0xd5e   : > { %v2004_v23 = vsub.f32 %v5428_v13, %v1999_v22 }
 0xd5f   : > { %v2001_v25 = vpop.permute.xlu1 %2000 }
 0xd60   : > { %v2005_v24 = vsub.f32 %v5430_v4, %v2001_v25  ;;  %2008 = vrot.lane.b32.xlu0 %v2004_v23, %s5004_s15  ;;  %v4734_v4 = vld [vmem:[%s5997_s4] sm:$0xff]  }
 0xd61   : > { %4531 = vmatpush3.bf16.msra.mxu1 %v4734_v4 }
 0xd62   : > { %2010 = vrot.lane.b32.xlu1 %v2005_v24, %s5004_s15  ;;  %4532 = vmatprep.subr.bf16.mxu1 %v5001_v9 }
 0xd65   : > { %4533 = vmatpush3.bf16.msra.mxu1 %v4735_v35 }
 0xd66   : > { %4544 = vmatprep.subr.bf16.mxu1 %v5001_v9 }
 0xd73   : > { %v1796_v28 = vpop.permute.xlu0 %1795 }
 0xd74   : > { %v1801_v54 = vmul.f32 %v5446_v14, %v1796_v28  ;;  %v5495_v14 = vld [vmem:[%s6001_s8] ss:$0 sm:$0xff] }
 0xd75   : > { %v1798_v31 = vpop.permute.xlu1 %1797 }
 0xd76   : > { %v1802_v33 = vmul.f32 %v4835_v59, %v1798_v31  ;;  %1805 = vrot.lane.b32.xlu0 %v1801_v54, %s5004_s15 }
 0xd78   : > { %1807 = vrot.lane.b32.xlu1 %v1802_v33, %s5004_s15 }
 0xdd2   : > { %v2009_v55 = vpop.permute.xlu0 %2008 }
 0xdd3   : > { %v2014_v34 = vmul.f32 %v4841_v11, %v2009_v55 }
 0xdd4   : > { %v2011_v32 = vpop.permute.xlu1 %2010 }
 0xdd5   : > { %v2015_v13 = vmul.f32 %v4843_v58, %v2011_v32  ;;  %2018 = vrot.lane.b32.xlu0 %v2014_v34, %s5004_s15 }
 0xdd7   : > { %2020 = vrot.lane.b32.xlu1 %v2015_v13, %s5004_s15 }
 0xde8   : > { %v1806_v36 = vpop.permute.xlu0 %1805 }
 0xde9   : > { %v1811_v37 = vadd.f32 %v4845_v5, %v1806_v36 }
 0xdea   : > { %v1808_v38 = vpop.permute.xlu1 %1807 }
 0xdeb   : > { %v1812_v39 = vadd.f32 %v4847_v6, %v1808_v38  ;;  %1815 = vrot.lane.b32.xlu0 %v1811_v37, %s5003_s17 }
 0xded   : > { %1817 = vrot.lane.b32.xlu1 %v1812_v39, %s5003_s17 }
 0xe47   : > { %v2019_v1 = vpop.permute.xlu0 %2018 }
 0xe48   : > { %v2024_v30 = vadd.f32 %v4849_v16, %v2019_v1 }
 0xe49   : > { %v2021_v41 = vpop.permute.xlu1 %2020 }
 0xe4a   : > { %v2025_v42 = vadd.f32 %v4851_v17, %v2021_v41  ;;  %2028 = vrot.lane.b32.xlu0 %v2024_v30, %s5003_s17 }
 0xe4c   : > { %v2036_v12 = vpack.c.bf16 %v2025_v42, %v2024_v30  ;;  %2030 = vrot.lane.b32.xlu1 %v2025_v42, %s5003_s17 }
 0xe4e   : > { %2051 = vrot.lane.b32.xlu0 %v2036_v12, %s5003_s17 }
 0xe50   : > { %2190 = vrot.lane.b32.xlu1 %v5495_v14, %s5003_s17 }
 0xe52   : > { %2403 = vrot.lane.b32.xlu0 %v5501_v43, %s5003_s17 }
 0xe5d   : > { %v1816_v44 = vpop.permute.xlu0 %1815 }
 0xe5e   : > { %1821 = vst.msk [vmem:[#allocation3] sm:$0xff] %vm514_vm2, %v1816_v44 }
 0xe5f   : > { %v1818_v59 = vpop.permute.xlu1 %1817 }
 0xe60   : > { %1822 = vst.msk [vmem:[#allocation3 + $0x8] sm:$0xff] %vm514_vm2, %v1818_v59 }
 0xe65   : > { %v5509_v45 = vld [vmem:[#allocation3] sm:$0xff] }
 0xe67   : > { %v5511_v60 = vld [vmem:[#allocation3 + $0x8] sm:$0xff] }
 0xe68   : > { %v2109_v47 = vpack.c.bf16 %v5511_v60, %v5509_v45 }
 0xe6a   : > { %4535 = vmatmul.mubr.msk.bf16.vlgmr.msra.gmra.mrb[28].mxu1 %vm514_vm2, %v2109_v47 }
 0xe6b   : > { %4545 = vmatpush3.bf16.msra.mxu1 %v4738_v46  ;;  %4548 = vmatprep.mubr.msk.bf16.mxu1 %vm5002_vm1, %v5001_v9 }
 0xe6c   : > { %4546 = vmatprep.subr.bf16.mxu1 %v5001_v9 }
 0xe6f   : > { %4547 = vmatpush3.bf16.msra.mxu1 %v4739_v48 }
 0xe70   : > { %4560 = vmatprep.subr.bf16.mxu1 %v5001_v9 }
 0xebc   : > { %v2029_v26 = vpop.permute.xlu0 %2028 }
 0xebd   : > { %2034 = vst.msk [vmem:[#allocation2] sm:$0xff] %vm514_vm2, %v2029_v26 }
 0xebe   : > { %v2031_v49 = vpop.permute.xlu1 %2030 }
 0xebf   : > { %2035 = vst.msk [vmem:[#allocation2 + $0x8] sm:$0xff] %vm514_vm2, %v2031_v49 }
 0xec0   : > { %v2052_v51 = vpop.permute.xlu0 %2051 }
 0xec1   : > { %4527 = vmatmul.mubr.msk.bf16.vlgmr.msra.gmra.mrb[28].mxu0 %vm514_vm2, %v2052_v51 }
 0xec2   : > { %4539 = vmatpush3.bf16.msra.mxu0 %v2279_v50  ;;  %4540 = vmatprep.mubr.msk.bf16.mxu0 %vm5002_vm1, %v5001_v9  ;;  %v2191_v57 = vpop.permute.xlu1 %2190 }
 0xec3   : > { %4552 = vmatprep.subr.bf16.mxu0 %v5001_v9 }
 0xec4   : > { %v5537_v53 = vld [vmem:[#allocation2] sm:$0xff]  ;;  %v2404_v19 = vpop.permute.xlu0 %2403 }
 0xec6   : > { %v5539_v11 = vld [vmem:[#allocation2 + $0x8] sm:$0xff] }
 0xec7   : > { %v2322_v56 = vpack.c.bf16 %v5539_v11, %v5537_v53 }
 0xec9   : > { %4541 = vmatmul.mubr.msk.bf16.vlgmr.msra.gmra.mrb[32].mxu0 %vm536_vm3, %v4740_v52  ;;  %4549 = vmatmul.mubr.msk.bf16.vlgmr.msra.gmra.mrb[32].mxu1 %vm514_vm2, %v2322_v56 }
 0xeca   : > { %4564 = vmatprep.mubr.msk.bf16.mxu1 %vm5002_vm1, %v5001_v9  ;;  %4556 = vmatprep.mubr.msk.bf16.mxu0 %vm5002_vm1, %v5001_v9 }
 0xf3d   : > { %v2163_v58 = vpop.f32.mrb[28].mxu1 }
 0xf3e   : > { %v2193_v61 = vadd.f32 %v2191_v57, %v2163_v58  ;;  %v4536_v62 = vpop.f32.mrb[29].mxu1 }
 0xf3f   : > { %v2166_v29 = vpop.f32.mrb[30].mxu1 }
 0xf40   : > { %v2194_v63 = vadd.f32 %v2191_v57, %v2166_v29  ;;  %v4537_v2 = vpop.f32.mrb[31].mxu1  ;;  %2197 = vrot.lane.b32.xlu1 %v2193_v61, %s5003_s17 }
 0xf42   : > { %2199 = vrot.lane.b32.xlu0 %v2194_v63, %s5003_s17 }
 0xf94   : > { %v2102_v5 = vpop.f32.mrb[28].mxu0 }
 0xf95   : > { %v2103_v6 = vadd.f32 %v5554_v3, %v2102_v5  ;;  %v4528_v7 = vpop.f32.mrb[29].mxu0 }
 0xf96   : > { %v2105_v8 = vpop.f32.mrb[30].mxu0 }
 0xf97   : > { %v2170_v10 = vadd.f32 %v2163_v58, %v2103_v6  ;;  %v2106_v15 = vadd.f32 %v5554_v3, %v2105_v8  ;;  %v4529_v16 = vpop.f32.mrb[31].mxu0 }
 0xf99   : > { %v4233_v17 = vmul.f32 -1.442695, %v2170_v10  ;;  %v2171_v18 = vadd.f32 %v2166_v29, %v2106_v15 }
 0xf9b   : > { %4852 = vpow2.f32 %v4233_v17  ;;  %v4234_v20 = vmul.f32 -1.442695, %v2171_v18 }
 0xf9c   : > { %v2315_v21 = vpop.f32.mrb[32].mxu0  ;;  %v2376_v22 = vpop.f32.mrb[32].mxu1 }
 0xf9d   : > { %4854 = vpow2.f32 %v4234_v20  ;;  %v2406_v23 = vadd.f32 %v2404_v19, %v2376_v22  ;;  %v4542_v25 = vpop.f32.mrb[33].mxu0  ;;  %v4550_v24 = vpop.f32.mrb[33].mxu1  ;;  %v2316_v1 = vadd.f32 %v5571_v40, %v2315_v21 }
 0xf9e   : > { %v2318_v28 = vpop.f32.mrb[34].mxu0  ;;  %v2379_v54 = vpop.f32.mrb[34].mxu1 }
 0xf9f   : > { %v2407_v31 = vadd.f32 %v2404_v19, %v2379_v54  ;;  %v4551_v33 = vpop.f32.mrb[35].mxu1  ;;  %2410 = vrot.lane.b32.xlu1 %v2406_v23, %s5003_s17  ;;  %v4543_v55 = vpop.f32.mrb[35].mxu0  ;;  %v2319_v30 = vadd.f32 %v5571_v40, %v2318_v28  ;;  %v2383_v41 = vadd.f32 %v2376_v22, %v2316_v1 }
 0xfa1   : > { %2412 = vrot.lane.b32.xlu0 %v2407_v31, %s5003_s17  ;;  %v2384_v42 = vadd.f32 %v2379_v54, %v2319_v30  ;;  %v4244_v12 = vmul.f32 -1.442695, %v2383_v41  ;;  %v4742_v54 = vld [vmem:[%s5997_s4 + $0x8] sm:$0xff]   ;;  %v4745_v41 = vld [vmem:[%s5996_s3] sm:$0xff]  }
 0xfa3   : > { %v4245_v44 = vmul.f32 -1.442695, %v2384_v42 }
 0xfa5   : > { %v4853_v34 = vpop.eup %4852 }
 0xfa6   : > { %v2178_v32 = vadd.f32 1.0, %v4853_v34  ;;  %v4743_v34 = vld [vmem:[%s5995_s2] sm:$0xff]  }
 0xfa7   : > { %v4855_v13 = vpop.eup %4854  ;;  %4553 = vmatpush3.bf16.msra.mxu0 %v4743_v34 }
 0xfa8   : > { %4856 = vrcp.f32 %v2178_v32  ;;  %v2179_v4 = vadd.f32 1.0, %v4855_v13  ;;  %4554 = vmatprep.subr.bf16.mxu0 %v5001_v9  ;;  %v4744_v13 = vld [vmem:[%s5995_s2 + $0x8] sm:$0xff]  }
 0xfaa   : > { %4858 = vrcp.f32 %v2179_v4 }
 0xfab   : > { %4860 = vpow2.f32 %v4244_v12  ;;  %4555 = vmatpush3.bf16.msra.mxu0 %v4744_v13  ;;  %v4746_v12 = vld [vmem:[%s5996_s3 + $0x8] sm:$0xff]  }
 0xfac   : > { %4862 = vpow2.f32 %v4245_v44  ;;  %4568 = vmatprep.subr.bf16.mxu0 %v5001_v9 }
 0xfb2   : > { %v5560_v35 = vpop.eup %4856  ;;  %v2198_v36 = vpop.permute.xlu1 %2197 }
 0xfb3   : > { %v2203_v37 = vmul.f32 %v5560_v35, %v2198_v36 }
 0xfb4   : > { %v5563_v38 = vpop.eup %4858  ;;  %v2200_v0 = vpop.permute.xlu0 %2199 }
 0xfb5   : > { %v2204_v39 = vmul.f32 %v5563_v38, %v2200_v0  ;;  %2207 = vrot.lane.b32.xlu1 %v2203_v37, %s5003_s17  ;;  %v4861_v59 = vpop.eup %4860 }
 0xfb6   : > { %v4863_v46 = vpop.eup %4862  ;;  %v2391_v47 = vadd.f32 1.0, %v4861_v59  ;;  %v2696_v59 = vld [vmem:[%s5994_s1] sm:$0x1] }
 0xfb7   : > { %2209 = vrot.lane.b32.xlu0 %v2204_v39, %s5003_s17  ;;  %v2392_v48 = vadd.f32 1.0, %v4863_v46 }
 0xfb8   : > { %4864 = vrcp.f32 %v2391_v47  ;;  %v2713_v47 = vsel %vm540_vm0, %v2696_v59, 0 }
 0xfb9   : > { %4866 = vrcp.f32 %v2392_v48 }
 0xfc2   : > { %v4865_v26 = vpop.eup %4864 }
 0xfc3   : > { %v4867_v50 = vpop.eup %4866 }
0x1011   : > { %v2411_v27 = vpop.permute.xlu1 %2410 }
0x1012   : > { %v2416_v49 = vmul.f32 %v4865_v26, %v2411_v27 }
0x1013   : > { %v2413_v51 = vpop.permute.xlu0 %2412 }
0x1014   : > { %v2417_v52 = vmul.f32 %v4867_v50, %v2413_v51  ;;  %2420 = vrot.lane.b32.xlu1 %v2416_v49, %s5003_s17 }
0x1016   : > { %2422 = vrot.lane.b32.xlu0 %v2417_v52, %s5003_s17 }
0x1027   : > { %v2208_v56 = vpop.permute.xlu1 %2207 }
0x1028   : > { %v2213_v57 = vadd.f32 %v2208_v56, %v2103_v6 }
0x1029   : > { %v2210_v58 = vpop.permute.xlu0 %2209 }
0x102a   : > { %4868 = vtanh.f32 %v2213_v57  ;;  %v2214_v61 = vadd.f32 %v2210_v58, %v2106_v15 }
0x102c   : > { %4870 = vtanh.f32 %v2214_v61 }
0x1034   : > { %v4869_v62 = vpop.eup %4868 }
0x1035   : > { %2219 = vrot.lane.b32.xlu1 %v4869_v62, %s5003_s17 }
0x1036   : > { %v4871_v29 = vpop.eup %4870 }
0x1037   : > { %2221 = vrot.lane.b32.xlu0 %v4871_v29, %s5003_s17 }
0x1086   : > { %v2421_v63 = vpop.permute.xlu1 %2420 }
0x1087   : > { %v2426_v2 = vadd.f32 %v2421_v63, %v2316_v1 }
0x1088   : > { %v2423_v5 = vpop.permute.xlu0 %2422 }
0x1089   : > { %4872 = vtanh.f32 %v2426_v2  ;;  %v2427_v7 = vadd.f32 %v2423_v5, %v2319_v30 }
0x108b   : > { %4874 = vtanh.f32 %v2427_v7 }
0x1093   : > { %v4873_v8 = vpop.eup %4872 }
0x1094   : > { %2432 = vrot.lane.b32.xlu1 %v4873_v8, %s5003_s17 }
0x1095   : > { %v4875_v6 = vpop.eup %4874 }
0x1096   : > { %2434 = vrot.lane.b32.xlu0 %v4875_v6, %s5003_s17 }
0x10a7   : > { %v2220_v10 = vpop.permute.xlu1 %2219 }
0x10a8   : > { %v2225_v15 = vsub.f32 %v5509_v45, %v2220_v10 }
0x10a9   : > { %v2222_v16 = vpop.permute.xlu0 %2221 }
0x10aa   : > { %v2226_v17 = vsub.f32 %v5511_v60, %v2222_v16  ;;  %2229 = vrot.lane.b32.xlu1 %v2225_v15, %s5004_s15 }
0x10ac   : > { %2231 = vrot.lane.b32.xlu0 %v2226_v17, %s5004_s15 }
0x1106   : > { %v2433_v18 = vpop.permute.xlu1 %2432 }
0x1107   : > { %v2438_v19 = vsub.f32 %v5537_v53, %v2433_v18 }
0x1108   : > { %v2435_v20 = vpop.permute.xlu0 %2434 }
0x1109   : > { %v2439_v21 = vsub.f32 %v5539_v11, %v2435_v20  ;;  %2442 = vrot.lane.b32.xlu1 %v2438_v19, %s5004_s15  ;;  %v4741_v11 = vld [vmem:[%s5997_s4] sm:$0xff]  }
0x110a   : > { %4561 = vmatpush3.bf16.msra.mxu1 %v4741_v11 }
0x110b   : > { %2444 = vrot.lane.b32.xlu0 %v2439_v21, %s5004_s15  ;;  %4562 = vmatprep.subr.bf16.mxu1 %v5001_v9 }
0x110e   : > { %4563 = vmatpush3.bf16.msra.mxu1 %v4742_v54 }
0x110f   : > { %4574 = vmatprep.subr.bf16.mxu1 %v5001_v9 }
0x111c   : > { %v2230_v22 = vpop.permute.xlu1 %2229 }
0x111d   : > { %v2235_v45 = vmul.f32 %v5560_v35, %v2230_v22 }
0x111e   : > { %v2232_v23 = vpop.permute.xlu0 %2231 }
0x111f   : > { %v2236_v60 = vmul.f32 %v5563_v38, %v2232_v23  ;;  %2239 = vrot.lane.b32.xlu1 %v2235_v45, %s5004_s15 }
0x1121   : > { %2241 = vrot.lane.b32.xlu0 %v2236_v60, %s5004_s15 }
0x117b   : > { %v2443_v25 = vpop.permute.xlu1 %2442 }
0x117c   : > { %v2448_v24 = vmul.f32 %v4865_v26, %v2443_v25  ;;  %v4747_v26 = vld [vmem:[%s5143_s12 + $0x28] sm:$0xff]  }
0x117d   : > { %v2445_v53 = vpop.permute.xlu0 %2444 }
0x117e   : > { %v2449_v28 = vmul.f32 %v4867_v50, %v2445_v53  ;;  %2452 = vrot.lane.b32.xlu1 %v2448_v24, %s5004_s15 }
0x1180   : > { %2454 = vrot.lane.b32.xlu0 %v2449_v28, %s5004_s15 }
0x1191   : > { %v2240_v31 = vpop.permute.xlu1 %2239 }
0x1192   : > { %v2245_v33 = vadd.f32 %v4869_v62, %v2240_v31 }
0x1193   : > { %v2242_v55 = vpop.permute.xlu0 %2241 }
0x1194   : > { %v2246_v32 = vadd.f32 %v4871_v29, %v2242_v55  ;;  %2249 = vrot.lane.b32.xlu1 %v2245_v33, %s5003_s17 }
0x1196   : > { %2251 = vrot.lane.b32.xlu0 %v2246_v32, %s5003_s17 }
0x11f0   : > { %v2453_v4 = vpop.permute.xlu1 %2452 }
0x11f1   : > { %v2458_v35 = vadd.f32 %v4873_v8, %v2453_v4 }
0x11f2   : > { %v2455_v36 = vpop.permute.xlu0 %2454 }
0x11f3   : > { %v2459_v37 = vadd.f32 %v4875_v6, %v2455_v36  ;;  %2462 = vrot.lane.b32.xlu1 %v2458_v35, %s5003_s17 }
0x11f5   : > { %v2470_v38 = vpack.c.bf16 %v2459_v37, %v2458_v35  ;;  %2464 = vrot.lane.b32.xlu0 %v2459_v37, %s5003_s17 }
0x11f7   : > { %2485 = vrot.lane.b32.xlu1 %v2470_v38, %s5003_s17 }
0x11f9   : > { %2624 = vrot.lane.b32.xlu0 %v5495_v14, %s5003_s17 }
0x11fb   : > { %2837 = vrot.lane.b32.xlu1 %v5501_v43, %s5003_s17 }
0x1206   : > { %v2250_v0 = vpop.permute.xlu1 %2249 }
0x1207   : > { %2255 = vst.msk [vmem:[#allocation3] sm:$0xff] %vm514_vm2, %v2250_v0 }
0x1208   : > { %v2252_v39 = vpop.permute.xlu0 %2251 }
0x1209   : > { %2256 = vst.msk [vmem:[#allocation3 + $0x8] sm:$0xff] %vm514_vm2, %v2252_v39 }
0x120e   : > { %v5622_v1 = vld [vmem:[#allocation3] sm:$0xff] }
0x1210   : > { %v5624_v30 = vld [vmem:[#allocation3 + $0x8] sm:$0xff] }
0x1211   : > { %v2543_v42 = vpack.c.bf16 %v5624_v30, %v5622_v1 }
0x1213   : > { %4565 = vmatmul.mubr.msk.bf16.vlgmr.msra.gmra.mrb[36].mxu1 %vm514_vm2, %v2543_v42 }
0x1214   : > { %4575 = vmatpush3.bf16.msra.mxu1 %v4745_v41  ;;  %4578 = vmatprep.mubr.msk.bf16.mxu1 %vm5002_vm1, %v5001_v9 }
0x1215   : > { %4576 = vmatprep.subr.bf16.mxu1 %v5001_v9 }
0x1218   : > { %4577 = vmatpush3.bf16.msra.mxu1 %v4746_v12 }
0x1219   : > { %4590 = vmatprep.subr.bf16.mxu1 %v5001_v9 }
0x1265   : > { %v2463_v44 = vpop.permute.xlu1 %2462 }
0x1266   : > { %2468 = vst.msk [vmem:[#allocation2] sm:$0xff] %vm514_vm2, %v2463_v44 }
0x1267   : > { %v2465_v46 = vpop.permute.xlu0 %2464 }
0x1268   : > { %2469 = vst.msk [vmem:[#allocation2 + $0x8] sm:$0xff] %vm514_vm2, %v2465_v46 }
0x1269   : > { %v2486_v48 = vpop.permute.xlu1 %2485 }
0x126a   : > { %4557 = vmatmul.mubr.msk.bf16.vlgmr.msra.gmra.mrb[36].mxu0 %vm514_vm2, %v2486_v48 }
0x126b   : > { %4569 = vmatpush3.bf16.msra.mxu0 %v2713_v47  ;;  %4570 = vmatprep.mubr.msk.bf16.mxu0 %vm5002_vm1, %v5001_v9  ;;  %v2625_v51 = vpop.permute.xlu0 %2624 }
0x126c   : > { %4582 = vmatprep.subr.bf16.mxu0 %v5001_v9 }
0x126d   : > { %v5650_v27 = vld [vmem:[#allocation2] sm:$0xff]  ;;  %v2838_v16 = vpop.permute.xlu1 %2837 }
0x126f   : > { %v5652_v49 = vld [vmem:[#allocation2 + $0x8] sm:$0xff] }
0x1270   : > { %v2756_v50 = vpack.c.bf16 %v5652_v49, %v5650_v27 }
0x1272   : > { %4571 = vmatmul.mubr.msk.bf16.vlgmr.msra.gmra.mrb[40].mxu0 %vm536_vm3, %v4747_v26  ;;  %4579 = vmatmul.mubr.msk.bf16.vlgmr.msra.gmra.mrb[40].mxu1 %vm514_vm2, %v2756_v50 }
0x1273   : > { %4594 = vmatprep.mubr.msk.bf16.mxu1 %vm5002_vm1, %v5001_v9  ;;  %4586 = vmatprep.mubr.msk.bf16.mxu0 %vm5002_vm1, %v5001_v9 }
0x12e6   : > { %v2597_v52 = vpop.f32.mrb[36].mxu1 }
0x12e7   : > { %v2627_v56 = vadd.f32 %v2625_v51, %v2597_v52  ;;  %v4566_v57 = vpop.f32.mrb[37].mxu1 }
0x12e8   : > { %v2600_v58 = vpop.f32.mrb[38].mxu1 }
0x12e9   : > { %v2628_v61 = vadd.f32 %v2625_v51, %v2600_v58  ;;  %v4567_v62 = vpop.f32.mrb[39].mxu1  ;;  %2631 = vrot.lane.b32.xlu0 %v2627_v56, %s5003_s17 }
0x12eb   : > { %2633 = vrot.lane.b32.xlu1 %v2628_v61, %s5003_s17 }
0x133d   : > { %v2536_v29 = vpop.f32.mrb[36].mxu0 }
0x133e   : > { %v2537_v63 = vadd.f32 %v5554_v3, %v2536_v29  ;;  %v4558_v2 = vpop.f32.mrb[37].mxu0 }
0x133f   : > { %v2539_v5 = vpop.f32.mrb[38].mxu0 }
0x1340   : > { %v2604_v7 = vadd.f32 %v2597_v52, %v2537_v63  ;;  %v2540_v8 = vadd.f32 %v5554_v3, %v2539_v5  ;;  %v4559_v6 = vpop.f32.mrb[39].mxu0 }
0x1342   : > { %v4254_v10 = vmul.f32 -1.442695, %v2604_v7  ;;  %v2605_v15 = vadd.f32 %v2600_v58, %v2540_v8 }
0x1344   : > { %4876 = vpow2.f32 %v4254_v10  ;;  %v4255_v17 = vmul.f32 -1.442695, %v2605_v15 }
0x1345   : > { %v2749_v18 = vpop.f32.mrb[40].mxu0  ;;  %v2810_v19 = vpop.f32.mrb[40].mxu1 }
0x1346   : > { %4878 = vpow2.f32 %v4255_v17  ;;  %v2840_v20 = vadd.f32 %v2838_v16, %v2810_v19  ;;  %v4572_v21 = vpop.f32.mrb[41].mxu0  ;;  %v4580_v22 = vpop.f32.mrb[41].mxu1  ;;  %v2750_v4 = vadd.f32 %v5571_v40, %v2749_v18 }
0x1347   : > { %v2752_v45 = vpop.f32.mrb[42].mxu0  ;;  %v2813_v23 = vpop.f32.mrb[42].mxu1 }
0x1348   : > { %v2841_v60 = vadd.f32 %v2838_v16, %v2813_v23  ;;  %v4581_v25 = vpop.f32.mrb[43].mxu1  ;;  %2844 = vrot.lane.b32.xlu0 %v2840_v20, %s5003_s17  ;;  %v4573_v24 = vpop.f32.mrb[43].mxu0  ;;  %v2753_v35 = vadd.f32 %v5571_v40, %v2752_v45  ;;  %v2817_v36 = vadd.f32 %v2810_v19, %v2750_v4 }
0x134a   : > { %2846 = vrot.lane.b32.xlu1 %v2841_v60, %s5003_s17  ;;  %v2818_v37 = vadd.f32 %v2813_v23, %v2753_v35  ;;  %v4265_v38 = vmul.f32 -1.442695, %v2817_v36  ;;  %v4749_v23 = vld [vmem:[%s5997_s4 + $0x8] sm:$0xff]   ;;  %v4752_v36 = vld [vmem:[%s5996_s3] sm:$0xff]  }
0x134c   : > { %v4266_v0 = vmul.f32 -1.442695, %v2818_v37 }
0x134e   : > { %v4877_v53 = vpop.eup %4876 }
0x134f   : > { %v2612_v28 = vadd.f32 1.0, %v4877_v53  ;;  %v4750_v53 = vld [vmem:[%s5995_s2] sm:$0xff]  }
0x1350   : > { %v4879_v11 = vpop.eup %4878  ;;  %4583 = vmatpush3.bf16.msra.mxu0 %v4750_v53 }
0x1351   : > { %4880 = vrcp.f32 %v2612_v28  ;;  %v2613_v54 = vadd.f32 1.0, %v4879_v11  ;;  %4584 = vmatprep.subr.bf16.mxu0 %v5001_v9  ;;  %v4751_v11 = vld [vmem:[%s5995_s2 + $0x8] sm:$0xff]  }
0x1353   : > { %4882 = vrcp.f32 %v2613_v54 }
0x1354   : > { %4884 = vpow2.f32 %v4265_v38  ;;  %4585 = vmatpush3.bf16.msra.mxu0 %v4751_v11  ;;  %v3130_v38 = vld [vmem:[%s5994_s1] sm:$0x1] }
0x1355   : > { %4886 = vpow2.f32 %v4266_v0  ;;  %4598 = vmatprep.subr.bf16.mxu0 %v5001_v9 }
0x135b   : > { %v5668_v31 = vpop.eup %4880  ;;  %v2632_v33 = vpop.permute.xlu0 %2631 }
0x135c   : > { %v2637_v55 = vmul.f32 %v5668_v31, %v2632_v33 }
0x135d   : > { %v4883_v34 = vpop.eup %4882  ;;  %v2634_v32 = vpop.permute.xlu1 %2633 }
0x135e   : > { %v2638_v13 = vmul.f32 %v4883_v34, %v2634_v32  ;;  %2641 = vrot.lane.b32.xlu0 %v2637_v55, %s5003_s17  ;;  %v4885_v39 = vpop.eup %4884 }
0x135f   : > { %v4887_v41 = vpop.eup %4886  ;;  %v2825_v42 = vadd.f32 1.0, %v4885_v39  ;;  %v3147_v39 = vsel %vm540_vm0, %v3130_v38, 0 }
0x1360   : > { %2643 = vrot.lane.b32.xlu1 %v2638_v13, %s5003_s17  ;;  %v2826_v12 = vadd.f32 1.0, %v4887_v41 }
0x1361   : > { %4888 = vrcp.f32 %v2825_v42  ;;  %v4754_v42 = vld [vmem:[%s5143_s12 + $0x30] sm:$0xff]  }
0x1362   : > { %4890 = vrcp.f32 %v2826_v12 }
0x136b   : > { %v4889_v44 = vpop.eup %4888 }
0x136c   : > { %v4891_v47 = vpop.eup %4890 }
0x13ba   : > { %v2845_v59 = vpop.permute.xlu0 %2844 }
0x13bb   : > { %v2850_v46 = vmul.f32 %v4889_v44, %v2845_v59 }
0x13bc   : > { %v2847_v48 = vpop.permute.xlu1 %2846 }
0x13bd   : > { %v2851_v26 = vmul.f32 %v4891_v47, %v2847_v48  ;;  %2854 = vrot.lane.b32.xlu0 %v2850_v46, %s5003_s17 }
0x13bf   : > { %2856 = vrot.lane.b32.xlu1 %v2851_v26, %s5003_s17 }
0x13d0   : > { %v2642_v50 = vpop.permute.xlu0 %2641 }
0x13d1   : > { %v2647_v51 = vadd.f32 %v2642_v50, %v2537_v63 }
0x13d2   : > { %v2644_v52 = vpop.permute.xlu1 %2643 }
0x13d3   : > { %4892 = vtanh.f32 %v2647_v51  ;;  %v2648_v56 = vadd.f32 %v2644_v52, %v2540_v8 }
0x13d5   : > { %4894 = vtanh.f32 %v2648_v56 }
0x13dd   : > { %v4893_v57 = vpop.eup %4892 }
0x13de   : > { %2653 = vrot.lane.b32.xlu0 %v4893_v57, %s5003_s17 }
0x13df   : > { %v4895_v58 = vpop.eup %4894 }
0x13e0   : > { %2655 = vrot.lane.b32.xlu1 %v4895_v58, %s5003_s17 }
0x142f   : > { %v2855_v61 = vpop.permute.xlu0 %2854 }
0x1430   : > { %v2860_v62 = vadd.f32 %v2855_v61, %v2750_v4 }
0x1431   : > { %v2857_v29 = vpop.permute.xlu1 %2856 }
0x1432   : > { %4896 = vtanh.f32 %v2860_v62  ;;  %v2861_v2 = vadd.f32 %v2857_v29, %v2753_v35 }
0x1434   : > { %4898 = vtanh.f32 %v2861_v2 }
0x143c   : > { %v4897_v5 = vpop.eup %4896 }
0x143d   : > { %2866 = vrot.lane.b32.xlu0 %v4897_v5, %s5003_s17 }
0x143e   : > { %v4899_v63 = vpop.eup %4898 }
0x143f   : > { %2868 = vrot.lane.b32.xlu1 %v4899_v63, %s5003_s17 }
0x1450   : > { %v2654_v7 = vpop.permute.xlu0 %2653 }
0x1451   : > { %v2659_v8 = vsub.f32 %v5622_v1, %v2654_v7 }
0x1452   : > { %v2656_v6 = vpop.permute.xlu1 %2655 }
0x1453   : > { %v2660_v10 = vsub.f32 %v5624_v30, %v2656_v6  ;;  %2663 = vrot.lane.b32.xlu0 %v2659_v8, %s5004_s15 }
0x1455   : > { %2665 = vrot.lane.b32.xlu1 %v2660_v10, %s5004_s15 }
0x14af   : > { %v2867_v15 = vpop.permute.xlu0 %2866 }
0x14b0   : > { %v2872_v16 = vsub.f32 %v5650_v27, %v2867_v15 }
0x14b1   : > { %v2869_v17 = vpop.permute.xlu1 %2868 }
0x14b2   : > { %v2873_v18 = vsub.f32 %v5652_v49, %v2869_v17  ;;  %2876 = vrot.lane.b32.xlu0 %v2872_v16, %s5004_s15  ;;  %v4748_v49 = vld [vmem:[%s5997_s4] sm:$0xff]  }
0x14b3   : > { %4591 = vmatpush3.bf16.msra.mxu1 %v4748_v49 }
0x14b4   : > { %2878 = vrot.lane.b32.xlu1 %v2873_v18, %s5004_s15  ;;  %4592 = vmatprep.subr.bf16.mxu1 %v5001_v9 }
0x14b7   : > { %4593 = vmatpush3.bf16.msra.mxu1 %v4749_v23 }
0x14b8   : > { %4604 = vmatprep.subr.bf16.mxu1 %v5001_v9 }
0x14c5   : > { %v2664_v19 = vpop.permute.xlu0 %2663 }
0x14c6   : > { %v2669_v1 = vmul.f32 %v5668_v31, %v2664_v19 }
0x14c7   : > { %v2666_v20 = vpop.permute.xlu1 %2665 }
0x14c8   : > { %v2670_v21 = vmul.f32 %v4883_v34, %v2666_v20  ;;  %2673 = vrot.lane.b32.xlu0 %v2669_v1, %s5004_s15 }
0x14ca   : > { %2675 = vrot.lane.b32.xlu1 %v2670_v21, %s5004_s15 }
0x1524   : > { %v2877_v30 = vpop.permute.xlu0 %2876 }
0x1525   : > { %v2882_v22 = vmul.f32 %v4889_v44, %v2877_v30 }
0x1526   : > { %v2879_v45 = vpop.permute.xlu1 %2878 }
0x1527   : > { %v2883_v27 = vmul.f32 %v4891_v47, %v2879_v45  ;;  %2886 = vrot.lane.b32.xlu0 %v2882_v22, %s5004_s15 }
0x1529   : > { %2888 = vrot.lane.b32.xlu1 %v2883_v27, %s5004_s15 }
0x153a   : > { %v2674_v60 = vpop.permute.xlu0 %2673 }
0x153b   : > { %v2679_v25 = vadd.f32 %v4893_v57, %v2674_v60 }
0x153c   : > { %v2676_v24 = vpop.permute.xlu1 %2675 }
0x153d   : > { %v2680_v28 = vadd.f32 %v4895_v58, %v2676_v24  ;;  %2683 = vrot.lane.b32.xlu0 %v2679_v25, %s5003_s17 }
0x153f   : > { %2685 = vrot.lane.b32.xlu1 %v2680_v28, %s5003_s17 }
0x1599   : > { %v2887_v54 = vpop.permute.xlu0 %2886 }
0x159a   : > { %v2892_v31 = vadd.f32 %v4897_v5, %v2887_v54 }
0x159b   : > { %v2889_v33 = vpop.permute.xlu1 %2888 }
0x159c   : > { %v2893_v55 = vadd.f32 %v4899_v63, %v2889_v33  ;;  %2896 = vrot.lane.b32.xlu0 %v2892_v31, %s5003_s17 }
0x159e   : > { %v2904_v34 = vpack.c.bf16 %v2893_v55, %v2892_v31  ;;  %2898 = vrot.lane.b32.xlu1 %v2893_v55, %s5003_s17 }
0x15a0   : > { %2919 = vrot.lane.b32.xlu0 %v2904_v34, %s5003_s17 }
0x15a2   : > { %3058 = vrot.lane.b32.xlu1 %v5495_v14, %s5003_s17 }
0x15a4   : > { %3271 = vrot.lane.b32.xlu0 %v5501_v43, %s5003_s17  ;;  %v4753_v43 = vld [vmem:[%s5996_s3 + $0x8] sm:$0xff]  }
0x15af   : > { %v2684_v32 = vpop.permute.xlu0 %2683 }
0x15b0   : > { %2689 = vst.msk [vmem:[#allocation3] sm:$0xff] %vm514_vm2, %v2684_v32 }
0x15b1   : > { %v2686_v13 = vpop.permute.xlu1 %2685 }
0x15b2   : > { %2690 = vst.msk [vmem:[#allocation3 + $0x8] sm:$0xff] %vm514_vm2, %v2686_v13 }
0x15b7   : > { %v5721_v4 = vld [vmem:[#allocation3] sm:$0xff] }
0x15b9   : > { %v5723_v35 = vld [vmem:[#allocation3 + $0x8] sm:$0xff] }
0x15ba   : > { %v2977_v14 = vpack.c.bf16 %v5723_v35, %v5721_v4 }
0x15bc   : > { %4595 = vmatmul.mubr.msk.bf16.vlgmr.msra.gmra.mrb[44].mxu1 %vm514_vm2, %v2977_v14 }
0x15bd   : > { %4605 = vmatpush3.bf16.msra.mxu1 %v4752_v36  ;;  %4608 = vmatprep.mubr.msk.bf16.mxu1 %vm5002_vm1, %v5001_v9 }
0x15be   : > { %4606 = vmatprep.subr.bf16.mxu1 %v5001_v9 }
0x15c1   : > { %4607 = vmatpush3.bf16.msra.mxu1 %v4753_v43 }
0x15c2   : > { %4620 = vmatprep.subr.bf16.mxu1 %v5001_v9 }
0x160e   : > { %v2897_v37 = vpop.permute.xlu0 %2896 }
0x160f   : > { %2902 = vst.msk [vmem:[#allocation2] sm:$0xff] %vm514_vm2, %v2897_v37 }
0x1610   : > { %v2899_v0 = vpop.permute.xlu1 %2898 }
0x1611   : > { %2903 = vst.msk [vmem:[#allocation2 + $0x8] sm:$0xff] %vm514_vm2, %v2899_v0 }
0x1612   : > { %v2920_v41 = vpop.permute.xlu0 %2919 }
0x1613   : > { %4587 = vmatmul.mubr.msk.bf16.vlgmr.msra.gmra.mrb[44].mxu0 %vm514_vm2, %v2920_v41 }
0x1614   : > { %4599 = vmatpush3.bf16.msra.mxu0 %v3147_v39  ;;  %4600 = vmatprep.mubr.msk.bf16.mxu0 %vm5002_vm1, %v5001_v9  ;;  %v3059_v46 = vpop.permute.xlu1 %3058 }
0x1615   : > { %4612 = vmatprep.subr.bf16.mxu0 %v5001_v9 }
0x1616   : > { %v5749_v12 = vld [vmem:[#allocation2] sm:$0xff]  ;;  %v3272_v7 = vpop.permute.xlu0 %3271 }
0x1618   : > { %v5751_v44 = vld [vmem:[#allocation2 + $0x8] sm:$0xff] }
0x1619   : > { %v3190_v59 = vpack.c.bf16 %v5751_v44, %v5749_v12 }
0x161b   : > { %4601 = vmatmul.mubr.msk.bf16.vlgmr.msra.gmra.mrb[48].mxu0 %vm536_vm3, %v4754_v42  ;;  %4609 = vmatmul.mubr.msk.bf16.vlgmr.msra.gmra.mrb[48].mxu1 %vm514_vm2, %v3190_v59 }
0x161c   : > { %4624 = vmatprep.mubr.msk.bf16.mxu1 %vm5002_vm1, %v5001_v9  ;;  %4616 = vmatprep.mubr.msk.bf16.mxu0 %vm5002_vm1, %v5001_v9 }
0x168f   : > { %v3031_v47 = vpop.f32.mrb[44].mxu1 }
0x1690   : > { %v3061_v48 = vadd.f32 %v3059_v46, %v3031_v47  ;;  %v4596_v26 = vpop.f32.mrb[45].mxu1 }
0x1691   : > { %v3034_v50 = vpop.f32.mrb[46].mxu1 }
0x1692   : > { %v3062_v51 = vadd.f32 %v3059_v46, %v3034_v50  ;;  %v4597_v52 = vpop.f32.mrb[47].mxu1  ;;  %3065 = vrot.lane.b32.xlu1 %v3061_v48, %s5003_s17 }
0x1694   : > { %3067 = vrot.lane.b32.xlu0 %v3062_v51, %s5003_s17 }
0x16e6   : > { %v2970_v56 = vpop.f32.mrb[44].mxu0 }
0x16e7   : > { %v2971_v57 = vadd.f32 %v5554_v3, %v2970_v56  ;;  %v4588_v58 = vpop.f32.mrb[45].mxu0 }
0x16e8   : > { %v2973_v61 = vpop.f32.mrb[46].mxu0 }
0x16e9   : > { %v3038_v62 = vadd.f32 %v3031_v47, %v2971_v57  ;;  %v2974_v29 = vadd.f32 %v5554_v3, %v2973_v61  ;;  %v4589_v2 = vpop.f32.mrb[47].mxu0 }
0x16eb   : > { %v4275_v5 = vmul.f32 -1.442695, %v3038_v62  ;;  %v3039_v63 = vadd.f32 %v3034_v50, %v2974_v29 }
0x16ed   : > { %4900 = vpow2.f32 %v4275_v5  ;;  %v4276_v8 = vmul.f32 -1.442695, %v3039_v63 }
0x16ee   : > { %v3183_v6 = vpop.f32.mrb[48].mxu0  ;;  %v3244_v10 = vpop.f32.mrb[48].mxu1 }
0x16ef   : > { %4902 = vpow2.f32 %v4276_v8  ;;  %v3274_v15 = vadd.f32 %v3272_v7, %v3244_v10  ;;  %v4602_v16 = vpop.f32.mrb[49].mxu0  ;;  %v4610_v17 = vpop.f32.mrb[49].mxu1  ;;  %v3184_v53 = vadd.f32 %v5571_v40, %v3183_v6 }
0x16f0   : > { %v3186_v18 = vpop.f32.mrb[50].mxu0  ;;  %v3247_v19 = vpop.f32.mrb[50].mxu1 }
0x16f1   : > { %v3275_v1 = vadd.f32 %v3272_v7, %v3247_v19  ;;  %v4611_v20 = vpop.f32.mrb[51].mxu1  ;;  %3278 = vrot.lane.b32.xlu1 %v3274_v15, %s5003_s17  ;;  %v4603_v21 = vpop.f32.mrb[51].mxu0  ;;  %v3187_v28 = vadd.f32 %v5571_v40, %v3186_v18  ;;  %v3251_v11 = vadd.f32 %v3244_v10, %v3184_v53  ;;  %v4756_v15 = vld [vmem:[%s5997_s4 + $0x8] sm:$0xff]  }
0x16f2   : > { %v4758_v20 = vld [vmem:[%s5995_s2 + $0x8] sm:$0xff]  }
0x16f3   : > { %3280 = vrot.lane.b32.xlu0 %v3275_v1, %s5003_s17  ;;  %v3252_v54 = vadd.f32 %v3247_v19, %v3187_v28  ;;  %v4286_v31 = vmul.f32 -1.442695, %v3251_v11  ;;  %v4757_v19 = vld [vmem:[%s5995_s2] sm:$0xff]   ;;  %v4760_v11 = vld [vmem:[%s5996_s3 + $0x8] sm:$0xff]  }
0x16f4   : > { %4613 = vmatpush3.bf16.msra.mxu0 %v4757_v19 }
0x16f5   : > { %v4287_v33 = vmul.f32 -1.442695, %v3252_v54  ;;  %4614 = vmatprep.subr.bf16.mxu0 %v5001_v9 }
0x16f7   : > { %v4901_v3 = vpop.eup %4900 }
0x16f8   : > { %v3046_v30 = vadd.f32 1.0, %v4901_v3  ;;  %4615 = vmatpush3.bf16.msra.mxu0 %v4758_v20  ;;  %v4301_v20 = vld [vmem:[%s5998_s5] ss:$0 sm:$0xff] }
0x16f9   : > { %v4903_v22 = vpop.eup %4902  ;;  %4628 = vmatprep.subr.bf16.mxu0 %v5001_v9 }
0x16fa   : > { %4904 = vrcp.f32 %v3046_v30  ;;  %v3047_v45 = vadd.f32 1.0, %v4903_v22 }
0x16fc   : > { %4906 = vrcp.f32 %v3047_v45 }
0x16fd   : > { %4908 = vpow2.f32 %v4286_v31  ;;  %v3564_v31 = vld [vmem:[%s5994_s1] sm:$0x1] }
0x16fe   : > { %4910 = vpow2.f32 %v4287_v33 }
0x1704   : > { %v5767_v27 = vpop.eup %4904  ;;  %v3066_v49 = vpop.permute.xlu1 %3065 }
0x1705   : > { %v3071_v23 = vmul.f32 %v5767_v27, %v3066_v49  ;;  %v4309_v49 = vld [vmem:[%s6000_s7] ss:$0 sm:$0xff] }
0x1706   : > { %v4907_v60 = vpop.eup %4906  ;;  %v3068_v25 = vpop.permute.xlu0 %3067 }
0x1707   : > { %v3072_v24 = vmul.f32 %v4907_v60, %v3068_v25  ;;  %3075 = vrot.lane.b32.xlu1 %v3071_v23, %s5003_s17  ;;  %v4909_v55 = vpop.eup %4908 }
0x1708   : > { %v4911_v34 = vpop.eup %4910  ;;  %v3259_v32 = vadd.f32 1.0, %v4909_v55  ;;  %v3581_v55 = vsel %vm540_vm0, %v3564_v31, 0 }
0x1709   : > { %3077 = vrot.lane.b32.xlu0 %v3072_v24, %s5003_s17  ;;  %v3260_v13 = vadd.f32 1.0, %v4911_v34 }
0x170a   : > { %4912 = vrcp.f32 %v3259_v32  ;;  %v4761_v32 = vld [vmem:[%s5143_s12 + $0x38] sm:$0xff]  }
0x170b   : > { %4914 = vrcp.f32 %v3260_v13 }
0x1714   : > { %v4913_v36 = vpop.eup %4912 }
0x1715   : > { %v4915_v37 = vpop.eup %4914 }
0x1763   : > { %v3279_v14 = vpop.permute.xlu1 %3278 }
0x1764   : > { %v3284_v43 = vmul.f32 %v4913_v36, %v3279_v14 }
0x1765   : > { %v3281_v38 = vpop.permute.xlu0 %3280 }
0x1766   : > { %v3285_v0 = vmul.f32 %v4915_v37, %v3281_v38  ;;  %3288 = vrot.lane.b32.xlu1 %v3284_v43, %s5003_s17 }
0x1768   : > { %3290 = vrot.lane.b32.xlu0 %v3285_v0, %s5003_s17 }
0x1779   : > { %v3076_v40 = vpop.permute.xlu1 %3075 }
0x177a   : > { %v3081_v39 = vadd.f32 %v3076_v40, %v2971_v57 }
0x177b   : > { %v3078_v41 = vpop.permute.xlu0 %3077 }
0x177c   : > { %4916 = vtanh.f32 %v3081_v39  ;;  %v3082_v42 = vadd.f32 %v3078_v41, %v2974_v29 }
0x177e   : > { %4918 = vtanh.f32 %v3082_v42  ;;  %v5872_v42 = vld [vmem:[%s5999_s6] ss:$0 sm:$0xff] }
0x1786   : > { %v4917_v59 = vpop.eup %4916 }
0x1787   : > { %3087 = vrot.lane.b32.xlu1 %v4917_v59, %s5003_s17 }
0x1788   : > { %v4919_v46 = vpop.eup %4918 }
0x1789   : > { %3089 = vrot.lane.b32.xlu0 %v4919_v46, %s5003_s17 }
0x17d8   : > { %v3289_v47 = vpop.permute.xlu1 %3288 }
0x17d9   : > { %v3294_v48 = vadd.f32 %v3289_v47, %v3184_v53  ;;  %v4759_v53 = vld [vmem:[%s5996_s3] sm:$0xff]  }
0x17da   : > { %v3291_v26 = vpop.permute.xlu0 %3290 }
0x17db   : > { %4920 = vtanh.f32 %v3294_v48  ;;  %v3295_v50 = vadd.f32 %v3291_v26, %v3187_v28 }
0x17dd   : > { %4922 = vtanh.f32 %v3295_v50 }
0x17e5   : > { %v4921_v51 = vpop.eup %4920 }
0x17e6   : > { %3300 = vrot.lane.b32.xlu1 %v4921_v51, %s5003_s17 }
0x17e7   : > { %v4923_v52 = vpop.eup %4922 }
0x17e8   : > { %3302 = vrot.lane.b32.xlu0 %v4923_v52, %s5003_s17 }
0x17f9   : > { %v3088_v56 = vpop.permute.xlu1 %3087 }
0x17fa   : > { %v3093_v57 = vsub.f32 %v5721_v4, %v3088_v56 }
0x17fb   : > { %v3090_v58 = vpop.permute.xlu0 %3089 }
0x17fc   : > { %v3094_v61 = vsub.f32 %v5723_v35, %v3090_v58  ;;  %3097 = vrot.lane.b32.xlu1 %v3093_v57, %s5004_s15 }
0x17fe   : > { %3099 = vrot.lane.b32.xlu0 %v3094_v61, %s5004_s15 }
0x1858   : > { %v3301_v62 = vpop.permute.xlu1 %3300 }
0x1859   : > { %v3306_v29 = vsub.f32 %v5749_v12, %v3301_v62 }
0x185a   : > { %v3303_v2 = vpop.permute.xlu0 %3302 }
0x185b   : > { %v3307_v5 = vsub.f32 %v5751_v44, %v3303_v2  ;;  %3310 = vrot.lane.b32.xlu1 %v3306_v29, %s5004_s15  ;;  %v4755_v44 = vld [vmem:[%s5997_s4] sm:$0xff]  }
0x185c   : > { %4621 = vmatpush3.bf16.msra.mxu1 %v4755_v44 }
0x185d   : > { %3312 = vrot.lane.b32.xlu0 %v3307_v5, %s5004_s15  ;;  %4622 = vmatprep.subr.bf16.mxu1 %v5001_v9 }
0x1860   : > { %4623 = vmatpush3.bf16.msra.mxu1 %v4756_v15 }
0x1861   : > { %4634 = vmatprep.subr.bf16.mxu1 %v5001_v9 }
0x186e   : > { %v3098_v63 = vpop.permute.xlu1 %3097 }
0x186f   : > { %v3103_v4 = vmul.f32 %v5767_v27, %v3098_v63  ;;  %v5816_v27 = vld [vmem:[%s6001_s8] ss:$0 sm:$0xff] }
0x1870   : > { %v3100_v7 = vpop.permute.xlu0 %3099 }
0x1871   : > { %v3104_v8 = vmul.f32 %v4907_v60, %v3100_v7  ;;  %3107 = vrot.lane.b32.xlu1 %v3103_v4, %s5004_s15 }
0x1873   : > { %3109 = vrot.lane.b32.xlu0 %v3104_v8, %s5004_s15 }
0x18cd   : > { %v3311_v35 = vpop.permute.xlu1 %3310 }
0x18ce   : > { %v3316_v6 = vmul.f32 %v4913_v36, %v3311_v35 }
0x18cf   : > { %v3313_v10 = vpop.permute.xlu0 %3312 }
0x18d0   : > { %v3317_v12 = vmul.f32 %v4915_v37, %v3313_v10  ;;  %3320 = vrot.lane.b32.xlu1 %v3316_v6, %s5004_s15 }
0x18d2   : > { %3322 = vrot.lane.b32.xlu0 %v3317_v12, %s5004_s15 }
0x18e3   : > { %v3108_v16 = vpop.permute.xlu1 %3107 }
0x18e4   : > { %v3113_v17 = vadd.f32 %v4917_v59, %v3108_v16 }
0x18e5   : > { %v3110_v18 = vpop.permute.xlu0 %3109 }
0x18e6   : > { %v3114_v1 = vadd.f32 %v4919_v46, %v3110_v18  ;;  %3117 = vrot.lane.b32.xlu1 %v3113_v17, %s5003_s17 }
0x18e8   : > { %3119 = vrot.lane.b32.xlu0 %v3114_v1, %s5003_s17 }
0x1942   : > { %v3321_v21 = vpop.permute.xlu1 %3320 }
0x1943   : > { %v3326_v3 = vadd.f32 %v4921_v51, %v3321_v21 }
0x1944   : > { %v3323_v30 = vpop.permute.xlu0 %3322 }
0x1945   : > { %v3327_v22 = vadd.f32 %v4923_v52, %v3323_v30  ;;  %3330 = vrot.lane.b32.xlu1 %v3326_v3, %s5003_s17 }
0x1947   : > { %v3338_v45 = vpack.c.bf16 %v3327_v22, %v3326_v3  ;;  %3332 = vrot.lane.b32.xlu0 %v3327_v22, %s5003_s17 }
0x1949   : > { %3353 = vrot.lane.b32.xlu1 %v3338_v45, %s5003_s17 }
0x194b   : > { %3492 = vrot.lane.b32.xlu0 %v5816_v27, %s5003_s17 }
0x194d   : > { %3705 = vrot.lane.b32.xlu1 %v4309_v49, %s5003_s17 }
0x1958   : > { %v3118_v23 = vpop.permute.xlu1 %3117 }
0x1959   : > { %3123 = vst.msk [vmem:[#allocation3] sm:$0xff] %vm514_vm2, %v3118_v23 }
0x195a   : > { %v3120_v60 = vpop.permute.xlu0 %3119 }
0x195b   : > { %3124 = vst.msk [vmem:[#allocation3 + $0x8] sm:$0xff] %vm514_vm2, %v3120_v60 }
0x1960   : > { %v5827_v25 = vld [vmem:[#allocation3] sm:$0xff] }
0x1962   : > { %v5829_v24 = vld [vmem:[#allocation3 + $0x8] sm:$0xff] }
0x1963   : > { %v3411_v28 = vpack.c.bf16 %v5829_v24, %v5827_v25 }
0x1965   : > { %4625 = vmatmul.mubr.msk.bf16.vlgmr.msra.gmra.mrb[52].mxu1 %vm514_vm2, %v3411_v28 }
0x1966   : > { %4635 = vmatpush3.bf16.msra.mxu1 %v4759_v53  ;;  %4638 = vmatprep.mubr.msk.bf16.mxu1 %vm5002_vm1, %v5001_v9 }
0x1967   : > { %4636 = vmatprep.subr.bf16.mxu1 %v5001_v9 }
0x196a   : > { %4637 = vmatpush3.bf16.msra.mxu1 %v4760_v11 }
0x196b   : > { %4650 = vmatprep.subr.bf16.mxu1 %v5001_v9 }
0x19b7   : > { %v3331_v54 = vpop.permute.xlu1 %3330 }
0x19b8   : > { %3336 = vst.msk [vmem:[#allocation2] sm:$0xff] %vm514_vm2, %v3331_v54 }
0x19b9   : > { %v3333_v33 = vpop.permute.xlu0 %3332 }
0x19ba   : > { %3337 = vst.msk [vmem:[#allocation2 + $0x8] sm:$0xff] %vm514_vm2, %v3333_v33 }
0x19bb   : > { %v3354_v34 = vpop.permute.xlu1 %3353 }
0x19bc   : > { %4617 = vmatmul.mubr.msk.bf16.vlgmr.msra.gmra.mrb[52].mxu0 %vm514_vm2, %v3354_v34 }
0x19bd   : > { %4629 = vmatpush3.bf16.msra.mxu0 %v3581_v55  ;;  %4630 = vmatprep.mubr.msk.bf16.mxu0 %vm5002_vm1, %v5001_v9  ;;  %v3493_v43 = vpop.permute.xlu0 %3492 }
0x19be   : > { %4642 = vmatprep.subr.bf16.mxu0 %v5001_v9 }
0x19bf   : > { %v5855_v13 = vld [vmem:[#allocation2] sm:$0xff]  ;;  %v3706_v57 = vpop.permute.xlu1 %3705 }
0x19c1   : > { %v5857_v36 = vld [vmem:[#allocation2 + $0x8] sm:$0xff] }
0x19c2   : > { %v3624_v14 = vpack.c.bf16 %v5857_v36, %v5855_v13 }
0x19c4   : > { %4631 = vmatmul.mubr.msk.bf16.vlgmr.msra.gmra.mrb[56].mxu0 %vm536_vm3, %v4761_v32  ;;  %4639 = vmatmul.mubr.msk.bf16.vlgmr.msra.gmra.mrb[56].mxu1 %vm514_vm2, %v3624_v14 }
0x19c5   : > { %4654 = vmatprep.mubr.msk.bf16.mxu1 %vm5002_vm1, %v5001_v9  ;;  %4646 = vmatprep.mubr.msk.bf16.mxu0 %vm5002_vm1, %v5001_v9 }
0x1a38   : > { %v3465_v37 = vpop.f32.mrb[52].mxu1 }
0x1a39   : > { %v3495_v38 = vadd.f32 %v3493_v43, %v3465_v37  ;;  %v4626_v0 = vpop.f32.mrb[53].mxu1 }
0x1a3a   : > { %v3468_v40 = vpop.f32.mrb[54].mxu1 }
0x1a3b   : > { %v3496_v39 = vadd.f32 %v3493_v43, %v3468_v40  ;;  %v4627_v41 = vpop.f32.mrb[55].mxu1  ;;  %3499 = vrot.lane.b32.xlu0 %v3495_v38, %s5003_s17 }
0x1a3d   : > { %3501 = vrot.lane.b32.xlu1 %v3496_v39, %s5003_s17 }
0x1a8f   : > { %v3404_v59 = vpop.f32.mrb[52].mxu0 }
0x1a90   : > { %v3405_v46 = vadd.f32 %v5872_v42, %v3404_v59  ;;  %v4618_v47 = vpop.f32.mrb[53].mxu0 }
0x1a91   : > { %v3407_v48 = vpop.f32.mrb[54].mxu0 }
0x1a92   : > { %v3472_v26 = vadd.f32 %v3465_v37, %v3405_v46  ;;  %v3408_v50 = vadd.f32 %v5872_v42, %v3407_v48  ;;  %v4619_v51 = vpop.f32.mrb[55].mxu0 }
0x1a94   : > { %v4296_v52 = vmul.f32 -1.442695, %v3472_v26  ;;  %v3473_v56 = vadd.f32 %v3468_v40, %v3408_v50 }
0x1a96   : > { %4924 = vpow2.f32 %v4296_v52  ;;  %v4297_v58 = vmul.f32 -1.442695, %v3473_v56 }
0x1a97   : > { %v3617_v61 = vpop.f32.mrb[56].mxu0  ;;  %v3678_v62 = vpop.f32.mrb[56].mxu1 }
0x1a98   : > { %4926 = vpow2.f32 %v4297_v58  ;;  %v3708_v29 = vadd.f32 %v3706_v57, %v3678_v62  ;;  %v4632_v2 = vpop.f32.mrb[57].mxu0  ;;  %v4640_v5 = vpop.f32.mrb[57].mxu1  ;;  %v3618_v21 = vadd.f32 %v4301_v20, %v3617_v61 }
0x1a99   : > { %v3620_v63 = vpop.f32.mrb[58].mxu0  ;;  %v3681_v4 = vpop.f32.mrb[58].mxu1 }
0x1a9a   : > { %v3709_v7 = vadd.f32 %v3706_v57, %v3681_v4  ;;  %v4641_v8 = vpop.f32.mrb[59].mxu1  ;;  %3712 = vrot.lane.b32.xlu0 %v3708_v29, %s5003_s17  ;;  %v4633_v35 = vpop.f32.mrb[59].mxu0  ;;  %v3621_v3 = vadd.f32 %v4301_v20, %v3620_v63  ;;  %v3685_v30 = vadd.f32 %v3678_v62, %v3618_v21  ;;  %v4763_v63 = vld [vmem:[%s5997_s4 + $0x8] sm:$0xff]  }
0x1a9b   : > { %v4764_v35 = vld [vmem:[%s5995_s2] sm:$0xff]  }
0x1a9c   : > { %3714 = vrot.lane.b32.xlu1 %v3709_v7, %s5003_s17  ;;  %v3686_v22 = vadd.f32 %v3681_v4, %v3621_v3  ;;  %v4307_v45 = vmul.f32 -1.442695, %v3685_v30  ;;  %4643 = vmatpush3.bf16.msra.mxu0 %v4764_v35 }
0x1a9d   : > { %4644 = vmatprep.subr.bf16.mxu0 %v5001_v9 }
0x1a9e   : > { %v4308_v49 = vmul.f32 -1.442695, %v3686_v22 }
0x1aa0   : > { %v4925_v6 = vpop.eup %4924 }
0x1aa1   : > { %v3480_v10 = vadd.f32 1.0, %v4925_v6 }
0x1aa2   : > { %v4927_v12 = vpop.eup %4926 }
0x1aa3   : > { %4928 = vrcp.f32 %v3480_v10  ;;  %v3481_v44 = vadd.f32 1.0, %v4927_v12  ;;  %v4765_v10 = vld [vmem:[%s5995_s2 + $0x8] sm:$0xff]  }
0x1aa4   : > { %4645 = vmatpush3.bf16.msra.mxu0 %v4765_v10 }
0x1aa5   : > { %4930 = vrcp.f32 %v3481_v44  ;;  %4658 = vmatprep.subr.bf16.mxu0 %v5001_v9 }
0x1aa6   : > { %4932 = vpow2.f32 %v4307_v45 }
0x1aa7   : > { %4934 = vpow2.f32 %v4308_v49 }
0x1aad   : > { %v5878_v15 = vpop.eup %4928  ;;  %v3500_v16 = vpop.permute.xlu0 %3499 }
0x1aae   : > { %v3505_v17 = vmul.f32 %v5878_v15, %v3500_v16 }
0x1aaf   : > { %v5881_v18 = vpop.eup %4930  ;;  %v3502_v19 = vpop.permute.xlu1 %3501 }
0x1ab0   : > { %v3506_v1 = vmul.f32 %v5881_v18, %v3502_v19  ;;  %3509 = vrot.lane.b32.xlu0 %v3505_v17, %s5003_s17  ;;  %v4933_v23 = vpop.eup %4932 }
0x1ab1   : > { %v4935_v60 = vpop.eup %4934  ;;  %v3693_v53 = vadd.f32 1.0, %v4933_v23 }
0x1ab2   : > { %3511 = vrot.lane.b32.xlu1 %v3506_v1, %s5003_s17  ;;  %v3694_v28 = vadd.f32 1.0, %v4935_v60 }
0x1ab3   : > { %4936 = vrcp.f32 %v3693_v53 }
0x1ab4   : > { %4938 = vrcp.f32 %v3694_v28 }
0x1abd   : > { %v4937_v11 = vpop.eup %4936 }
0x1abe   : > { %v4939_v33 = vpop.eup %4938 }
0x1b0c   : > { %v3713_v54 = vpop.permute.xlu0 %3712 }
0x1b0d   : > { %v3718_v31 = vmul.f32 %v4937_v11, %v3713_v54 }
0x1b0e   : > { %v3715_v55 = vpop.permute.xlu1 %3714 }
0x1b0f   : > { %v3719_v34 = vmul.f32 %v4939_v33, %v3715_v55  ;;  %3722 = vrot.lane.b32.xlu0 %v3718_v31, %s5003_s17 }
0x1b11   : > { %3724 = vrot.lane.b32.xlu1 %v3719_v34, %s5003_s17 }
0x1b22   : > { %v3510_v32 = vpop.permute.xlu0 %3509 }
0x1b23   : > { %v3515_v14 = vadd.f32 %v3510_v32, %v3405_v46 }
0x1b24   : > { %v3512_v43 = vpop.permute.xlu1 %3511 }
0x1b25   : > { %4940 = vtanh.f32 %v3515_v14  ;;  %v3516_v37 = vadd.f32 %v3512_v43, %v3408_v50 }
0x1b27   : > { %4942 = vtanh.f32 %v3516_v37 }
0x1b2f   : > { %v4941_v38 = vpop.eup %4940 }
0x1b30   : > { %3521 = vrot.lane.b32.xlu0 %v4941_v38, %s5003_s17 }
0x1b31   : > { %v4943_v0 = vpop.eup %4942 }
0x1b32   : > { %3523 = vrot.lane.b32.xlu1 %v4943_v0, %s5003_s17 }
0x1b81   : > { %v3723_v40 = vpop.permute.xlu0 %3722 }
0x1b82   : > { %v3728_v39 = vadd.f32 %v3723_v40, %v3618_v21 }
0x1b83   : > { %v3725_v41 = vpop.permute.xlu1 %3724 }
0x1b84   : > { %4944 = vtanh.f32 %v3728_v39  ;;  %v3729_v59 = vadd.f32 %v3725_v41, %v3621_v3 }
0x1b86   : > { %4946 = vtanh.f32 %v3729_v59 }
0x1b8e   : > { %v4945_v47 = vpop.eup %4944 }
0x1b8f   : > { %3734 = vrot.lane.b32.xlu0 %v4945_v47, %s5003_s17 }
0x1b90   : > { %v4947_v46 = vpop.eup %4946 }
0x1b91   : > { %3736 = vrot.lane.b32.xlu1 %v4947_v46, %s5003_s17 }
0x1ba2   : > { %v3522_v48 = vpop.permute.xlu0 %3521 }
0x1ba3   : > { %v3527_v26 = vsub.f32 %v5827_v25, %v3522_v48 }
0x1ba4   : > { %v3524_v50 = vpop.permute.xlu1 %3523 }
0x1ba5   : > { %v3528_v51 = vsub.f32 %v5829_v24, %v3524_v50  ;;  %3531 = vrot.lane.b32.xlu0 %v3527_v26, %s5004_s15 }
0x1ba7   : > { %3533 = vrot.lane.b32.xlu1 %v3528_v51, %s5004_s15 }
0x1c01   : > { %v3735_v52 = vpop.permute.xlu0 %3734 }
0x1c02   : > { %v3740_v56 = vsub.f32 %v5855_v13, %v3735_v52 }
0x1c03   : > { %v3737_v57 = vpop.permute.xlu1 %3736 }
0x1c04   : > { %v3741_v58 = vsub.f32 %v5857_v36, %v3737_v57  ;;  %3744 = vrot.lane.b32.xlu0 %v3740_v56, %s5004_s15  ;;  %v4762_v36 = vld [vmem:[%s5997_s4] sm:$0xff]  }
0x1c05   : > { %4651 = vmatpush3.bf16.msra.mxu1 %v4762_v36 }
0x1c06   : > { %3746 = vrot.lane.b32.xlu1 %v3741_v58, %s5004_s15  ;;  %4652 = vmatprep.subr.bf16.mxu1 %v5001_v9 }
0x1c09   : > { %4653 = vmatpush3.bf16.msra.mxu1 %v4763_v63 }
0x1c17   : > { %v3532_v61 = vpop.permute.xlu0 %3531 }
0x1c18   : > { %v3537_v25 = vmul.f32 %v5878_v15, %v3532_v61 }
0x1c19   : > { %v3534_v62 = vpop.permute.xlu1 %3533 }
0x1c1a   : > { %v3538_v24 = vmul.f32 %v5881_v18, %v3534_v62  ;;  %3541 = vrot.lane.b32.xlu0 %v3537_v25, %s5004_s15 }
0x1c1c   : > { %3543 = vrot.lane.b32.xlu1 %v3538_v24, %s5004_s15 }
0x1c76   : > { %v3745_v29 = vpop.permute.xlu0 %3744 }
0x1c77   : > { %v3750_v2 = vmul.f32 %v4937_v11, %v3745_v29 }
0x1c78   : > { %v3747_v13 = vpop.permute.xlu1 %3746 }
0x1c79   : > { %v3751_v5 = vmul.f32 %v4939_v33, %v3747_v13  ;;  %3754 = vrot.lane.b32.xlu0 %v3750_v2, %s5004_s15  ;;  %v4766_v2 = vld [vmem:[%s6002_s9] sm:$0xff]   ;;  %v4767_v13 = vld [vmem:[%s6002_s9 + $0x8] sm:$0xff]  }
0x1c7b   : > { %3756 = vrot.lane.b32.xlu1 %v3751_v5, %s5004_s15 }
0x1c8c   : > { %v3542_v4 = vpop.permute.xlu0 %3541 }
0x1c8d   : > { %v3547_v7 = vadd.f32 %v4941_v38, %v3542_v4 }
0x1c8e   : > { %v3544_v8 = vpop.permute.xlu1 %3543 }
0x1c8f   : > { %v3548_v6 = vadd.f32 %v4943_v0, %v3544_v8  ;;  %3551 = vrot.lane.b32.xlu0 %v3547_v7, %s5003_s17 }
0x1c91   : > { %3553 = vrot.lane.b32.xlu1 %v3548_v6, %s5003_s17 }
0x1c95   : > { %3926 = vrot.lane.b32.xlu1 %v5816_v27, %s5003_s17 }
0x1ceb   : > { %v3755_v12 = vpop.permute.xlu0 %3754 }
0x1cec   : > { %v5928_v15 = vadd.f32 %v4945_v47, %v3755_v12 }
0x1ced   : > { %v3757_v44 = vpop.permute.xlu1 %3756 }
0x1cee   : > { %v5930_v16 = vadd.f32 %v4947_v46, %v3757_v44  ;;  %v4320_v44 = vld [vmem:[%s6003_s10] ss:$0 sm:$0xff] }
0x1cf0   : > { %v3772_v17 = vpack.c.bf16 %v5930_v16, %v5928_v15 }
0x1cf2   : > { %3787 = vrot.lane.b32.xlu0 %v3772_v17, %s5003_s17 }
0x1d01   : > { %v3552_v18 = vpop.permute.xlu0 %3551 }
0x1d02   : > { %3557 = vst.msk [vmem:[#allocation3] sm:$0xff] %vm514_vm2, %v3552_v18 }
0x1d03   : > { %v3554_v19 = vpop.permute.xlu1 %3553 }
0x1d04   : > { %3558 = vst.msk [vmem:[#allocation3 + $0x8] sm:$0xff] %vm514_vm2, %v3554_v19 }
0x1d07   : > { %v3927_v3 = vpop.permute.xlu1 %3926 }
0x1d09   : > { %v3773_v27 = vld [vmem:[#allocation3] sm:$0xff] }
0x1d0b   : > { %v3774_v1 = vld [vmem:[#allocation3 + $0x8] sm:$0xff] }
0x1d0c   : > { %v3845_v20 = vpack.c.bf16 %v3774_v1, %v3773_v27 }
0x1d0e   : > { %4655 = vmatmul.mubr.msk.bf16.vlgmr.msra.gmra.mrb[60].mxu1 %vm514_vm2, %v3845_v20 }
0x1d64   : > { %v3788_v21 = vpop.permute.xlu0 %3787 }
0x1d65   : > { %4647 = vmatmul.mubr.msk.bf16.vlgmr.msra.gmra.mrb[60].mxu0 %vm514_vm2, %v3788_v21 }
0x1d66   : > { %4662 = vmatprep.mubr.msk.bf16.mxu0 %vm5002_vm1, %v5001_v9  ;;  %4659 = vmatpush3.bf16.msra.mxu0 %v4766_v2 }
0x1d67   : > { %4660 = vmatprep.subr.bf16.mxu0 %v5001_v9 }
0x1d6a   : > { %4661 = vmatpush3.bf16.msra.mxu0 %v4767_v13 }
0x1de1   : > { %v3899_v30 = vpop.f32.mrb[60].mxu1 }
0x1de2   : > { %v3929_v22 = vadd.f32 %v3927_v3, %v3899_v30  ;;  %v4656_v45 = vpop.f32.mrb[61].mxu1 }
0x1de3   : > { %v3902_v49 = vpop.f32.mrb[62].mxu1 }
0x1de4   : > { %v3930_v23 = vadd.f32 %v3927_v3, %v3902_v49  ;;  %v4657_v60 = vpop.f32.mrb[63].mxu1  ;;  %3933 = vrot.lane.b32.xlu0 %v3929_v22, %s5003_s17 }
0x1de6   : > { %3935 = vrot.lane.b32.xlu1 %v3930_v23, %s5003_s17 }
0x1e38   : > { %v3838_v53 = vpop.f32.mrb[60].mxu0 }
0x1e39   : > { %v3839_v28 = vadd.f32 %v5872_v42, %v3838_v53  ;;  %v4648_v11 = vpop.f32.mrb[61].mxu0 }
0x1e3a   : > { %v3841_v54 = vpop.f32.mrb[62].mxu0 }
0x1e3b   : > { %v3906_v31 = vadd.f32 %v3899_v30, %v3839_v28  ;;  %v3842_v33 = vadd.f32 %v5872_v42, %v3841_v54  ;;  %v4649_v55 = vpop.f32.mrb[63].mxu0 }
0x1e3d   : > { %v4317_v34 = vmul.f32 -1.442695, %v3906_v31  ;;  %v3907_v32 = vadd.f32 %v3902_v49, %v3842_v33 }
0x1e3f   : > { %4948 = vpow2.f32 %v4317_v34  ;;  %v4318_v14 = vmul.f32 -1.442695, %v3907_v32 }
0x1e41   : > { %4950 = vpow2.f32 %v4318_v14 }
0x1e49   : > { %v4949_v43 = vpop.eup %4948 }
0x1e4a   : > { %v3914_v37 = vadd.f32 1.0, %v4949_v43 }
0x1e4b   : > { %v4951_v38 = vpop.eup %4950 }
0x1e4c   : > { %4952 = vrcp.f32 %v3914_v37  ;;  %v3915_v0 = vadd.f32 1.0, %v4951_v38 }
0x1e4e   : > { %4954 = vrcp.f32 %v3915_v0 }
0x1e56   : > { %v4953_v40 = vpop.eup %4952  ;;  %v3934_v39 = vpop.permute.xlu0 %3933 }
0x1e57   : > { %v3939_v41 = vmul.f32 %v4953_v40, %v3934_v39 }
0x1e58   : > { %v4955_v59 = vpop.eup %4954  ;;  %v3936_v47 = vpop.permute.xlu1 %3935 }
0x1e59   : > { %v3940_v46 = vmul.f32 %v4955_v59, %v3936_v47  ;;  %3943 = vrot.lane.b32.xlu0 %v3939_v41, %s5003_s17 }
0x1e5b   : > { %3945 = vrot.lane.b32.xlu1 %v3940_v46, %s5003_s17 }
0x1ecb   : > { %v3944_v42 = vpop.permute.xlu0 %3943 }
0x1ecc   : > { %v3949_v48 = vadd.f32 %v3944_v42, %v3839_v28 }
0x1ecd   : > { %v3946_v26 = vpop.permute.xlu1 %3945 }
0x1ece   : > { %4956 = vtanh.f32 %v3949_v48  ;;  %v3950_v50 = vadd.f32 %v3946_v26, %v3842_v33 }
0x1ed0   : > { %4958 = vtanh.f32 %v3950_v50 }
0x1ed8   : > { %v4957_v51 = vpop.eup %4956 }
0x1ed9   : > { %3955 = vrot.lane.b32.xlu0 %v4957_v51, %s5003_s17 }
0x1eda   : > { %v4959_v52 = vpop.eup %4958 }
0x1edb   : > { %3957 = vrot.lane.b32.xlu1 %v4959_v52, %s5003_s17 }
0x1f4b   : > { %v3956_v56 = vpop.permute.xlu0 %3955 }
0x1f4c   : > { %v3961_v57 = vsub.f32 %v3773_v27, %v3956_v56 }
0x1f4d   : > { %v3958_v58 = vpop.permute.xlu1 %3957 }
0x1f4e   : > { %v3962_v61 = vsub.f32 %v3774_v1, %v3958_v58  ;;  %3965 = vrot.lane.b32.xlu0 %v3961_v57, %s5004_s15 }
0x1f50   : > { %3967 = vrot.lane.b32.xlu1 %v3962_v61, %s5004_s15 }
0x1fc0   : > { %v3966_v25 = vpop.permute.xlu0 %3965 }
0x1fc1   : > { %v3971_v62 = vmul.f32 %v4953_v40, %v3966_v25 }
0x1fc2   : > { %v3968_v24 = vpop.permute.xlu1 %3967 }
0x1fc3   : > { %v3972_v29 = vmul.f32 %v4955_v59, %v3968_v24  ;;  %3975 = vrot.lane.b32.xlu0 %v3971_v62, %s5004_s15 }
0x1fc5   : > { %3977 = vrot.lane.b32.xlu1 %v3972_v29, %s5004_s15  ;;  %s4152_s15 = sshll.u32 %s4991_s19, 1 }
0x1fc6   : > { %p504_p9 = scmp.lt.s32.totalorder %s4152_s15, 3 }
0x1fc8   : > { %s6012_s15 = smov (!%p504_p9, %s4152_s15), 3 }
0x2035   : > { %v3976_v5 = vpop.permute.xlu0 %3975 }
0x2036   : > { %v3981_v36 = vadd.f32 %v4957_v51, %v3976_v5 }
0x2037   : > { %v3978_v63 = vpop.permute.xlu1 %3977 }
0x2038   : > { %v3982_v4 = vadd.f32 %v4959_v52, %v3978_v63  ;;  %3985 = vrot.lane.b32.xlu0 %v3981_v36, %s5003_s17 }
0x203a   : > { %3987 = vrot.lane.b32.xlu1 %v3982_v4, %s5003_s17 }
0x203c   : > { %3764 = vrot.lane.b32.xlu0 %v5928_v15, %s5003_s17 }
0x203e   : > { %3766 = vrot.lane.b32.xlu1 %v5930_v16, %s5003_s17  ;;  %s4153_s17 = sshll.u32 %s6012_s15, 3 }
0x203f   : > { %s507_s27 = scalar_lea.vmem %s6004_s11, %s4153_s17 }
0x20aa   : > { %v3986_v9 = vpop.permute.xlu0 %3985 }
0x20ab   : > { %3991 = vst.msk [vmem:[#allocation3] sm:$0xff] %vm514_vm2, %v3986_v9 }
0x20ac   : > { %v3988_v7 = vpop.permute.xlu1 %3987 }
0x20ad   : > { %3992 = vst.msk [vmem:[#allocation3 + $0x8] sm:$0xff] %vm514_vm2, %v3988_v7 }
0x20ae   : > { %v3765_v8 = vpop.permute.xlu0 %3764 }
0x20af   : > { %3770 = vst.msk [vmem:[#allocation2] sm:$0xff] %vm514_vm2, %v3765_v8 }
0x20b0   : > { %v3767_v35 = vpop.permute.xlu1 %3766 }
0x20b1   : > { %3771 = vst.msk [vmem:[#allocation2 + $0x8] sm:$0xff] %vm514_vm2, %v3767_v35 }
0x20b2   : > { %v3996_v6 = vld [vmem:[#allocation3] sm:$0xff] }
0x20b4   : > { %v3997_v10 = vld [vmem:[#allocation3 + $0x8] sm:$0xff] }
0x20b5   : > { %v3998_v12 = vpack.c.bf16 %v3997_v10, %v3996_v6 }
0x20b7   : > { %4663 = vmatmul.mubr.msk.bf16.vlgmr.msra.gmra.mrb[64].mxu0 %vm514_vm2, %v3998_v12 }
0x218a   : > { %v4059_v15 = vpop.f32.mrb[64].mxu0 }
0x218b   : > { %v4060_v16 = vadd.f32 %v4320_v44, %v4059_v15  ;;  %v4664_v17 = vpop.f32.mrb[65].mxu0 }
0x218c   : > { %v4062_v18 = vpop.f32.mrb[66].mxu0 }
0x218d   : > { %4067 = vst.msk [vmem:[%s507_s27] sm:$0xff] %vm4066_vm4, %v4060_v16  ;;  %v4063_v19 = vadd.f32 %v4320_v44, %v4062_v18  ;;  %v4665_v27 = vpop.f32.mrb[67].mxu0 }
0x218f   : > { %4068 = vst.msk [vmem:[%s507_s27 + $0x8] sm:$0xff] %vm4066_vm4, %v4063_v19 }
0x2190 PF: > { %s21_s21 = sadd.s32 1, %s4999_s21   ;;  %s6005_s17 = smov %s4987_s18 }
0x2191   : > { %p18_p10 = scmp.ge.s32.totalorder %s21_s21, 4   ;;  %s6006_s18 = smov %s5100_s25 }
0x2192   : > { %s6007_s19 = smov %s4995_s20  ;;  %s6008_s20 = smov %s6010_s22 }
0x2193   :  { %20 = sbr.rel (!%p18_p10) target bundleno = 3 (0x3), region = 155 }

</bundles_post_ra>
